<compile_context>
chip_gen: v7x
topology: tpu7x:2x2x1
jax: 0.10.0
libtpu: 0.0.40
codegen_flags: <defaults>
</compile_context>

<pallas_src>
import functools

import jax
import jax.numpy as jnp
import numpy as np
from jax.experimental import pallas as pl
from jax.experimental.pallas import tpu as pltpu

EMB = 768
H1 = 512
H2 = 768
H3 = 512
H4 = 300
LANE = 128
SUBLANE_BF16 = 16  # bf16 packs 16 rows per vreg tile


def _round_up(n, m):
    return (n + m - 1) // m * m


H4P = _round_up(H4, LANE)  # 384 — hidden4 width padded to a lane multiple


def mlp2_kernel(
    x_ref,
    w1_ref, b1_ref,
    w2_ref, b2_ref,
    w3_ref, b3_ref,
    w4_ref, b4_ref,
    wf_ref, bf_ref,
    out_ref, x2_ref,
):
    x = x_ref[...]  # already bf16

    # hidden1 + ReLU (f32 accumulate, f32 elementwise)
    h = jnp.dot(x, w1_ref[...], preferred_element_type=jnp.float32) + b1_ref[...]
    h = jnp.maximum(h, 0.0)

    # hidden2 + ReLU  -> X2 (second output)
    h = jnp.dot(h.astype(jnp.bfloat16), w2_ref[...],
                preferred_element_type=jnp.float32) + b2_ref[...]
    x2 = jnp.maximum(h, 0.0)
    x2_ref[...] = x2.astype(x2_ref.dtype)

    # hidden3 + ReLU
    h = jnp.dot(x2.astype(jnp.bfloat16), w3_ref[...],
                preferred_element_type=jnp.float32) + b3_ref[...]
    h = jnp.maximum(h, 0.0)

    # hidden4 + Sigmoid (padded to 384 cols; padded cols hit zero wf rows)
    h = jnp.dot(h.astype(jnp.bfloat16), w4_ref[...],
                preferred_element_type=jnp.float32) + b4_ref[...]
    h = jax.nn.sigmoid(h)

    # fc (no activation); padded output cols are sliced off by the wrapper
    y = jnp.dot(h.astype(jnp.bfloat16), wf_ref[...],
                preferred_element_type=jnp.float32) + bf_ref[...]
    out_ref[...] = y.astype(out_ref.dtype)


def _choose_tile(B, tm):
    """Pick a batch tile <= tm that minimizes padded rows (tie-break: larger)."""
    b16 = _round_up(B, SUBLANE_BF16)
    if b16 <= tm:
        return b16  # single tile; no padding beyond sublane rounding
    candidates = [c for c in (128, 256, 512, 1024, 2048) if c <= tm]
    if not candidates:
        candidates = [_round_up(tm, LANE)]
    best = candidates[0]
    best_pad = _round_up(b16, best)
    for c in candidates:
        pad = _round_up(b16, c)
        if pad < best_pad or (pad == best_pad and c > best):
            best, best_pad = c, pad
    return best


@functools.partial(jax.jit, static_argnames=("out_dim", "tm", "x2_dtype"))
def mlp2_forward(x, params, *, out_dim, tm=512, x2_dtype=jnp.bfloat16):
    """x: [B, 768] float32. params: prepare_params() output (lane-padded, bf16 W)."""
    B, D = x.shape
    assert D == EMB
    outp = params["wf"].shape[1]  # padded output width (multiple of 128)

    # Choose the batch tile to minimize padding, then pad the batch up to a
    # whole number of tiles so BlockSpec shapes divide evenly.
    tm_eff = _choose_tile(B, tm)
    b_pad = _round_up(B, tm_eff)
    if b_pad != B:
        x = jnp.pad(x, ((0, b_pad - B), (0, 0)))
    x = x.astype(jnp.bfloat16)  # matmul operand dtype; halves input DMA too
    grid = (b_pad // tm_eff,)

    def wmap(i):  # grid-invariant full weight/bias block
        return (0, 0)

    def xmap(i):  # batch-tiled
        return (i, 0)

    weight_specs = []
    weight_args = []
    for name_w, name_b in (("w1", "b1"), ("w2", "b2"), ("w3", "b3"),
                           ("w4", "b4"), ("wf", "bf")):
        for name in (name_w, name_b):
            arr = params[name]
            # Single-buffer: these blocks never change across the grid.
            weight_specs.append(
                pl.BlockSpec(arr.shape, wmap, pipeline_mode=pl.Buffered(1)))
            weight_args.append(arr)

    weight_bytes = sum(int(np.prod(a.shape)) * a.dtype.itemsize
                       for a in weight_args)
    flops = 2 * b_pad * (EMB * H1 + H1 * H2 + H2 * H3 + H3 * H4P + H4P * outp)
    bytes_accessed = (weight_bytes
                      + 2 * b_pad * EMB                       # x (bf16)
                      + b_pad * H2 * jnp.dtype(x2_dtype).itemsize
                      + 4 * b_pad * outp)                     # out (f32)

    out, x2 = pl.pallas_call(
        mlp2_kernel,
        out_shape=(
            jax.ShapeDtypeStruct((b_pad, outp), jnp.float32),
            jax.ShapeDtypeStruct((b_pad, H2), x2_dtype),
        ),
        grid_spec=pltpu.PrefetchScalarGridSpec(
            num_scalar_prefetch=0,
            grid=grid,
            in_specs=[pl.BlockSpec((tm_eff, EMB), xmap)] + weight_specs,
            out_specs=[
                pl.BlockSpec((tm_eff, outp), xmap),
                pl.BlockSpec((tm_eff, H2), xmap),
            ],
        ),
        compiler_params=pltpu.CompilerParams(
            dimension_semantics=("parallel",),
            vmem_limit_bytes=32 * 1024 * 1024,
        ),
        cost_estimate=pl.CostEstimate(
            flops=int(flops),
            transcendentals=int(2 * b_pad * H4P),  # sigmoid = exp + reciprocal
            bytes_accessed=int(bytes_accessed),
        ),
    )(x, *weight_args)

    return out[:B, :out_dim], x2[:B]


def init_params(key, output_dim):
    """Deterministic init matching the shapes/initializers in MLP2.__init__.

    kaiming_uniform (relu): U(-sqrt(6/fan_in), +sqrt(6/fan_in))
    xavier_uniform:         U(-sqrt(6/(fan_in+fan_out)), ...)
    biases (PyTorch default): U(-1/sqrt(fan_in), +1/sqrt(fan_in))
    Weights are stored transposed as (in, out) for the kernel.
    """
    def kaiming(key, fan_in, fan_out):
        bound = np.sqrt(6.0 / fan_in)
        return jax.random.uniform(key, (fan_in, fan_out), jnp.float32, -bound, bound)

    def xavier(key, fan_in, fan_out):
        bound = np.sqrt(6.0 / (fan_in + fan_out))
        return jax.random.uniform(key, (fan_in, fan_out), jnp.float32, -bound, bound)

    def bias(key, fan_in, fan_out):
        bound = 1.0 / np.sqrt(fan_in)
        return jax.random.uniform(key, (1, fan_out), jnp.float32, -bound, bound)

    keys = jax.random.split(key, 10)
    params = {
        "w1": kaiming(keys[0], EMB, H1), "b1": bias(keys[1], EMB, H1),
        "w2": kaiming(keys[2], H1, H2),  "b2": bias(keys[3], H1, H2),
        "w3": kaiming(keys[4], H2, H3),  "b3": bias(keys[5], H2, H3),
        "w4": xavier(keys[6], H3, H4),   "b4": bias(keys[7], H3, H4),
        "wf": xavier(keys[8], H4, output_dim),
        "bf": bias(keys[9], H4, output_dim),
    }
    return params


def prepare_params(params):
    """One-time host-side padding + dtype prep.

    * H4 (300) -> 384 and out_dim -> next multiple of 128 (zero padding keeps
      the math exact: padded hidden4 lanes produce sigmoid(0)=0.5 which hits
      all-zero wf rows; padded fc columns are exactly zero and sliced off).
    * Weights are cast to bf16 (MXU operand dtype); biases stay f32 so the
      bias add / activations remain in f32.
    """
    out_dim = params["wf"].shape[1]
    outp = _round_up(out_dim, LANE)
    p = dict(params)
    p["w4"] = jnp.pad(params["w4"], ((0, 0), (0, H4P - H4)))
    p["b4"] = jnp.pad(params["b4"], ((0, 0), (0, H4P - H4)))
    p["wf"] = jnp.pad(params["wf"], ((0, H4P - H4), (0, outp - out_dim)))
    p["bf"] = jnp.pad(params["bf"], ((0, 0), (0, outp - out_dim)))
    for name in ("w1", "w2", "w3", "w4", "wf"):
        p[name] = p[name].astype(jnp.bfloat16)
    return p


def reference_forward(x, params):
    """Pure-JAX f32 reference on the unpadded parameters."""
    h = jnp.maximum(x @ params["w1"] + params["b1"], 0.0)
    x2 = jnp.maximum(h @ params["w2"] + params["b2"], 0.0)
    h = jnp.maximum(x2 @ params["w3"] + params["b3"], 0.0)
    h = jax.nn.sigmoid(h @ params["w4"] + params["b4"])
    return h @ params["wf"] + params["bf"], x2


if __name__ == "__main__":
    key = jax.random.PRNGKey(0)
    k_param, k_x = jax.random.split(key)

    OUTPUT_DIM = 10
    BATCH = 16

    params = init_params(k_param, OUTPUT_DIM)
    padded_params = prepare_params(params)
    x = jax.random.normal(k_x, (BATCH, EMB), jnp.float32)

    out, x2 = mlp2_forward(x, padded_params, out_dim=OUTPUT_DIM, tm=512)
    out, x2 = jax.block_until_ready((out, x2))

    # bf16 matmul operands (and bf16 x2) vs f32 reference -> loosened tolerances.
    ref_out, ref_x2 = reference_forward(x, params)
    np.testing.assert_allclose(np.asarray(out, dtype=np.float32),
                               np.asarray(ref_out),
                               rtol=2e-2, atol=5e-2)
    np.testing.assert_allclose(np.asarray(x2, dtype=np.float32),
                               np.asarray(ref_x2),
                               rtol=2e-2, atol=5e-2)

    print("KERNEL_OK")
</pallas_src>

<mosaic_0001>
module attributes {stable_mosaic.version = 11 : i64} {
  func.func @mlp2_kernel(%arg0: i32, %arg1: memref<16x768xbf16, #tpu.memory_space<vmem>>, %arg2: memref<768x512xbf16, #tpu.memory_space<vmem>>, %arg3: memref<1x512xf32, #tpu.memory_space<vmem>>, %arg4: memref<512x768xbf16, #tpu.memory_space<vmem>>, %arg5: memref<1x768xf32, #tpu.memory_space<vmem>>, %arg6: memref<768x512xbf16, #tpu.memory_space<vmem>>, %arg7: memref<1x512xf32, #tpu.memory_space<vmem>>, %arg8: memref<512x384xbf16, #tpu.memory_space<vmem>>, %arg9: memref<1x384xf32, #tpu.memory_space<vmem>>, %arg10: memref<384x128xbf16, #tpu.memory_space<vmem>>, %arg11: memref<1x128xf32, #tpu.memory_space<vmem>>, %arg12: memref<16x128xf32, #tpu.memory_space<vmem>>, %arg13: memref<16x768xbf16, #tpu.memory_space<vmem>>) attributes {dimension_semantics = [#tpu.dimension_semantics<parallel>], iteration_bounds = array<i64: 1>, scalar_prefetch = 0 : i64, scratch_operands = 0 : i64, tpu.core_type = #tpu.core_type<tc>, window_params = [{transform_indices = @transform_0, window_bounds = array<i64: 16, 768>}, {pipeline_mode = #tpu.pipeline_mode<synchronous>, transform_indices = @transform_1, window_bounds = array<i64: 768, 512>}, {pipeline_mode = #tpu.pipeline_mode<synchronous>, transform_indices = @transform_2, window_bounds = array<i64: 1, 512>}, {pipeline_mode = #tpu.pipeline_mode<synchronous>, transform_indices = @transform_3, window_bounds = array<i64: 512, 768>}, {pipeline_mode = #tpu.pipeline_mode<synchronous>, transform_indices = @transform_4, window_bounds = array<i64: 1, 768>}, {pipeline_mode = #tpu.pipeline_mode<synchronous>, transform_indices = @transform_5, window_bounds = array<i64: 768, 512>}, {pipeline_mode = #tpu.pipeline_mode<synchronous>, transform_indices = @transform_6, window_bounds = array<i64: 1, 512>}, {pipeline_mode = #tpu.pipeline_mode<synchronous>, transform_indices = @transform_7, window_bounds = array<i64: 512, 384>}, {pipeline_mode = #tpu.pipeline_mode<synchronous>, transform_indices = @transform_8, window_bounds = array<i64: 1, 384>}, {pipeline_mode = #tpu.pipeline_mode<synchronous>, transform_indices = @transform_9, window_bounds = array<i64: 384, 128>}, {pipeline_mode = #tpu.pipeline_mode<synchronous>, transform_indices = @transform_10, window_bounds = array<i64: 1, 128>}, {transform_indices = @transform_11, window_bounds = array<i64: 16, 128>}, {transform_indices = @transform_12, window_bounds = array<i64: 16, 768>}]} {
    %c0 = arith.constant 0 : index
    %c0_0 = arith.constant 0 : index
    %0 = vector.load %arg1[%c0, %c0_0] : memref<16x768xbf16, #tpu.memory_space<vmem>>, vector<16x768xbf16>
    %c0_1 = arith.constant 0 : index
    %c0_2 = arith.constant 0 : index
    %1 = vector.load %arg2[%c0_1, %c0_2] : memref<768x512xbf16, #tpu.memory_space<vmem>>, vector<768x512xbf16>
    %cst = arith.constant dense<0.000000e+00> : vector<16x512xf32>
    %2 = tpu.matmul %0, %1, %cst {dimension_numbers = #tpu.dot_dimension_numbers<[1], [0], [0], [1], [0, 0, 1, 1], [], []>} : vector<16x768xbf16>, vector<768x512xbf16>, vector<16x512xf32> -> vector<16x512xf32>
    %c0_3 = arith.constant 0 : index
    %c0_4 = arith.constant 0 : index
    %3 = vector.load %arg3[%c0_3, %c0_4] : memref<1x512xf32, #tpu.memory_space<vmem>>, vector<1x512xf32>
    %4 = vector.broadcast %3 : vector<1x512xf32> to vector<16x512xf32>
    %5 = arith.addf %2, %4 : vector<16x512xf32>
    %cst_5 = arith.constant 0.000000e+00 : f32
    %6 = vector.broadcast %cst_5 : f32 to vector<16x512xf32>
    %7 = arith.maximumf %5, %6 : vector<16x512xf32>
    %8 = arith.truncf %7 : vector<16x512xf32> to vector<16x512xbf16>
    %c0_6 = arith.constant 0 : index
    %c0_7 = arith.constant 0 : index
    %9 = vector.load %arg4[%c0_6, %c0_7] : memref<512x768xbf16, #tpu.memory_space<vmem>>, vector<512x768xbf16>
    %cst_8 = arith.constant dense<0.000000e+00> : vector<16x768xf32>
    %10 = tpu.matmul %8, %9, %cst_8 {dimension_numbers = #tpu.dot_dimension_numbers<[1], [0], [0], [1], [0, 0, 1, 1], [], []>} : vector<16x512xbf16>, vector<512x768xbf16>, vector<16x768xf32> -> vector<16x768xf32>
    %c0_9 = arith.constant 0 : index
    %c0_10 = arith.constant 0 : index
    %11 = vector.load %arg5[%c0_9, %c0_10] : memref<1x768xf32, #tpu.memory_space<vmem>>, vector<1x768xf32>
    %12 = vector.broadcast %11 : vector<1x768xf32> to vector<16x768xf32>
    %13 = arith.addf %10, %12 : vector<16x768xf32>
    %cst_11 = arith.constant 0.000000e+00 : f32
    %14 = vector.broadcast %cst_11 : f32 to vector<16x768xf32>
    %15 = arith.maximumf %13, %14 : vector<16x768xf32>
    %16 = arith.truncf %15 : vector<16x768xf32> to vector<16x768xbf16>
    %c0_12 = arith.constant 0 : index
    %c0_13 = arith.constant 0 : index
    %17 = vector.load %arg13[%c0_12, %c0_13] : memref<16x768xbf16, #tpu.memory_space<vmem>>, vector<16x768xbf16>
    tpu.vector_store %arg13[%c0_12, %c0_13], %16 {strides = array<i32>} : memref<16x768xbf16, #tpu.memory_space<vmem>>, vector<16x768xbf16>,
    %18 = arith.truncf %15 : vector<16x768xf32> to vector<16x768xbf16>
    %c0_14 = arith.constant 0 : index
    %c0_15 = arith.constant 0 : index
    %19 = vector.load %arg6[%c0_14, %c0_15] : memref<768x512xbf16, #tpu.memory_space<vmem>>, vector<768x512xbf16>
    %cst_16 = arith.constant dense<0.000000e+00> : vector<16x512xf32>
    %20 = tpu.matmul %18, %19, %cst_16 {dimension_numbers = #tpu.dot_dimension_numbers<[1], [0], [0], [1], [0, 0, 1, 1], [], []>} : vector<16x768xbf16>, vector<768x512xbf16>, vector<16x512xf32> -> vector<16x512xf32>
    %c0_17 = arith.constant 0 : index
    %c0_18 = arith.constant 0 : index
    %21 = vector.load %arg7[%c0_17, %c0_18] : memref<1x512xf32, #tpu.memory_space<vmem>>, vector<1x512xf32>
    %22 = vector.broadcast %21 : vector<1x512xf32> to vector<16x512xf32>
    %23 = arith.addf %20, %22 : vector<16x512xf32>
    %cst_19 = arith.constant 0.000000e+00 : f32
    %24 = vector.broadcast %cst_19 : f32 to vector<16x512xf32>
    %25 = arith.maximumf %23, %24 : vector<16x512xf32>
    %26 = arith.truncf %25 : vector<16x512xf32> to vector<16x512xbf16>
    %c0_20 = arith.constant 0 : index
    %c0_21 = arith.constant 0 : index
    %27 = vector.load %arg8[%c0_20, %c0_21] : memref<512x384xbf16, #tpu.memory_space<vmem>>, vector<512x384xbf16>
    %cst_22 = arith.constant dense<0.000000e+00> : vector<16x384xf32>
    %28 = tpu.matmul %26, %27, %cst_22 {dimension_numbers = #tpu.dot_dimension_numbers<[1], [0], [0], [1], [0, 0, 1, 1], [], []>} : vector<16x512xbf16>, vector<512x384xbf16>, vector<16x384xf32> -> vector<16x384xf32>
    %c0_23 = arith.constant 0 : index
    %c0_24 = arith.constant 0 : index
    %29 = vector.load %arg9[%c0_23, %c0_24] : memref<1x384xf32, #tpu.memory_space<vmem>>, vector<1x384xf32>
    %30 = vector.broadcast %29 : vector<1x384xf32> to vector<16x384xf32>
    %31 = arith.addf %28, %30 : vector<16x384xf32>
    %32 = arith.negf %31 : vector<16x384xf32>
    %33 = math.exp %32 : vector<16x384xf32>
    %cst_25 = arith.constant 1.000000e+00 : f32
    %34 = vector.broadcast %cst_25 : f32 to vector<16x384xf32>
    %35 = arith.addf %34, %33 : vector<16x384xf32>
    %36 = arith.divf %34, %35 : vector<16x384xf32>
    %37 = arith.truncf %36 : vector<16x384xf32> to vector<16x384xbf16>
    %c0_26 = arith.constant 0 : index
    %c0_27 = arith.constant 0 : index
    %38 = vector.load %arg10[%c0_26, %c0_27] : memref<384x128xbf16, #tpu.memory_space<vmem>>, vector<384x128xbf16>
    %cst_28 = arith.constant dense<0.000000e+00> : vector<16x128xf32>
    %39 = tpu.matmul %37, %38, %cst_28 {dimension_numbers = #tpu.dot_dimension_numbers<[1], [0], [0], [1], [0, 0, 1, 1], [], []>} : vector<16x384xbf16>, vector<384x128xbf16>, vector<16x128xf32> -> vector<16x128xf32>
    %c0_29 = arith.constant 0 : index
    %c0_30 = arith.constant 0 : index
    %40 = vector.load %arg11[%c0_29, %c0_30] : memref<1x128xf32, #tpu.memory_space<vmem>>, vector<1x128xf32>
    %41 = vector.broadcast %40 : vector<1x128xf32> to vector<16x128xf32>
    %42 = arith.addf %39, %41 : vector<16x128xf32>
    %c0_31 = arith.constant 0 : index
    %c0_32 = arith.constant 0 : index
    %43 = vector.load %arg12[%c0_31, %c0_32] : memref<16x128xf32, #tpu.memory_space<vmem>>, vector<16x128xf32>
    tpu.vector_store %arg12[%c0_31, %c0_32], %42 {strides = array<i32>} : memref<16x128xf32, #tpu.memory_space<vmem>>, vector<16x128xf32>,
    return
  }
  func.func @transform_0(%arg0: i32) -> (i32, i32) {
    %c0_i32 = arith.constant 0 : i32
    %c0_i32_0 = arith.constant 0 : i32
    return %arg0, %c0_i32 : i32, i32
  }
  func.func @transform_1(%arg0: i32) -> (i32, i32) {
    %c0_i32 = arith.constant 0 : i32
    %c0_i32_0 = arith.constant 0 : i32
    %c0_i32_1 = arith.constant 0 : i32
    return %c0_i32, %c0_i32_0 : i32, i32
  }
  func.func @transform_2(%arg0: i32) -> (i32, i32) {
    %c0_i32 = arith.constant 0 : i32
    %c0_i32_0 = arith.constant 0 : i32
    %c0_i32_1 = arith.constant 0 : i32
    return %c0_i32, %c0_i32_0 : i32, i32
  }
  func.func @transform_3(%arg0: i32) -> (i32, i32) {
    %c0_i32 = arith.constant 0 : i32
    %c0_i32_0 = arith.constant 0 : i32
    %c0_i32_1 = arith.constant 0 : i32
    return %c0_i32, %c0_i32_0 : i32, i32
  }
  func.func @transform_4(%arg0: i32) -> (i32, i32) {
    %c0_i32 = arith.constant 0 : i32
    %c0_i32_0 = arith.constant 0 : i32
    %c0_i32_1 = arith.constant 0 : i32
    return %c0_i32, %c0_i32_0 : i32, i32
  }
  func.func @transform_5(%arg0: i32) -> (i32, i32) {
    %c0_i32 = arith.constant 0 : i32
    %c0_i32_0 = arith.constant 0 : i32
    %c0_i32_1 = arith.constant 0 : i32
    return %c0_i32, %c0_i32_0 : i32, i32
  }
  func.func @transform_6(%arg0: i32) -> (i32, i32) {
    %c0_i32 = arith.constant 0 : i32
    %c0_i32_0 = arith.constant 0 : i32
    %c0_i32_1 = arith.constant 0 : i32
    return %c0_i32, %c0_i32_0 : i32, i32
  }
  func.func @transform_7(%arg0: i32) -> (i32, i32) {
    %c0_i32 = arith.constant 0 : i32
    %c0_i32_0 = arith.constant 0 : i32
    %c0_i32_1 = arith.constant 0 : i32
    return %c0_i32, %c0_i32_0 : i32, i32
  }
  func.func @transform_8(%arg0: i32) -> (i32, i32) {
    %c0_i32 = arith.constant 0 : i32
    %c0_i32_0 = arith.constant 0 : i32
    %c0_i32_1 = arith.constant 0 : i32
    return %c0_i32, %c0_i32_0 : i32, i32
  }
  func.func @transform_9(%arg0: i32) -> (i32, i32) {
    %c0_i32 = arith.constant 0 : i32
    %c0_i32_0 = arith.constant 0 : i32
    %c0_i32_1 = arith.constant 0 : i32
    return %c0_i32, %c0_i32_0 : i32, i32
  }
  func.func @transform_10(%arg0: i32) -> (i32, i32) {
    %c0_i32 = arith.constant 0 : i32
    %c0_i32_0 = arith.constant 0 : i32
    %c0_i32_1 = arith.constant 0 : i32
    return %c0_i32, %c0_i32_0 : i32, i32
  }
  func.func @transform_11(%arg0: i32) -> (i32, i32) {
    %c0_i32 = arith.constant 0 : i32
    %c0_i32_0 = arith.constant 0 : i32
    return %arg0, %c0_i32 : i32, i32
  }
  func.func @transform_12(%arg0: i32) -> (i32, i32) {
    %c0_i32 = arith.constant 0 : i32
    %c0_i32_0 = arith.constant 0 : i32
    return %arg0, %c0_i32 : i32, i32
  }
}

</mosaic_0001>

<bundles_post_ra>
// kernel: mlp2_forward.1
= control target key start
LH: loop header
LB: loop body
LE: loop exit
PB: predicated region body
PF: predicated region fallthrough
CT: control target
= control target key end

     0   :  { %18 = vsyncpa [#allocation3], 0  ;;  %s8119_s0 = inlined_call_operand.vmem [shape: bf16[16,768], index: 0, kind: input, shape index: {}]   ;;  %s8120_s1 = inlined_call_operand.hbm [shape: bf16[768,512], index: 1, kind: input, shape index: {}]   ;;  %s8121_s2 = inlined_call_operand.vmem [shape: f32[1,512], index: 2, kind: input, shape index: {}]   ;;  %s8122_s3 = inlined_call_operand.hbm [shape: bf16[512,768], index: 3, kind: input, shape index: {}]   ;;  %s8123_s4 = inlined_call_operand.vmem [shape: f32[1,768], index: 4, kind: input, shape index: {}]   ;;  %s8124_s5 = inlined_call_operand.hbm [shape: bf16[768,512], index: 5, kind: input, shape index: {}]   ;;  %s8125_s6 = inlined_call_operand.vmem [shape: f32[1,512], index: 6, kind: input, shape index: {}]   ;;  %s8126_s7 = inlined_call_operand.hbm [shape: bf16[512,384], index: 7, kind: input, shape index: {}]   ;;  %s8127_s8 = inlined_call_operand.vmem [shape: f32[1,384], index: 8, kind: input, shape index: {}]   ;;  %s8128_s9 = inlined_call_operand.hbm [shape: bf16[384,128], index: 9, kind: input, shape index: {}]   ;;  %s8129_s10 = inlined_call_operand.vmem [shape: f32[1,128], index: 10, kind: input, shape index: {}]   ;;  %s8130_s11 = inlined_call_operand.hbm [shape: f32[16,128], index: 11, kind: output, shape index: {0}]   ;;  %s8131_s12 = inlined_call_operand.hbm [shape: bf16[16,768], index: 12, kind: output, shape index: {1}]  }
   0x1   :  { %19 = vsyncpa [#allocation6], 0 }
   0x2   :  { %20 = vsyncpa [#allocation9], 0 }
   0x3   :  { %21 = vsyncpa [#allocation4], 0 }
   0x4   :  { %22 = vsyncpa [#allocation13], 0  ;;  %s7841_s21 = smov [#allocation5]   ;;  %s7677_s25 = scalar_lea.hbm %s8122_s3, 24576 }
   0x5   :  { %s44_s22 = sshll.u32 %s7841_s21, 4  ;;  %p7678_p0 = scmp.ne.s32.totalorder %s8122_s3, %s7677_s25  ;;  %s45_s22 = int_to_ptr.vmem [resolvable:$true] %s44_s22 }
   0x6   :  { %p7681_p1 = scmp.lt.u32.totalorder %s7677_s25, %s8122_s3 }
   0x8   :  { %p7683_p2 = pnand %p7681_p1, %p7678_p0 }
   0xa   :  { %7686 = shalt.err (!%p7683_p2)
}
   0xb   :  { %s7687_s30 = scalar_lea.vmem %s45_s22, 24576  ;;  %p7692_p4 = scmp.lt.s32.totalorder %s45_s22, %s45_s22 }
   0xc   :  { %p7688_p3 = scmp.ne.s32.totalorder %s45_s22, %s7687_s30  ;;  %p7693_p5 = scmp.lt.s32.totalorder %s7687_s30, %s7687_s30 }
   0xe   :  { %p7694_p6 = por %p7693_p5, %p7692_p4 }
  0x10   :  { %p7695_p7 = pnand %p7694_p6, %p7688_p3 }
  0x12   :  { %7698 = shalt.err (!%p7695_p7)
}
  0x13   :  { %s7842_s13 = smov 384   ;;  %s7843_s14 = smov 24  }
  0x14   :  { %50 = dma.hbm_to_vmem [thread:$0]  %s8122_s3, 24576, %s45_s22, [#allocation6], %s7842_s13, %s7842_s13, %s7843_s14  }
  0x15   :  { %s7844_s17 = smov [#allocation8]   ;;  %s7699_s21 = scalar_lea.hbm %s8126_s7, 12288 }
  0x16   :  { %s72_s18 = sshll.u32 %s7844_s17, 4  ;;  %p7700_p8 = scmp.ne.s32.totalorder %s8126_s7, %s7699_s21  ;;  %s73_s18 = int_to_ptr.vmem [resolvable:$true] %s72_s18 }
  0x17   :  { %p7703_p9 = scmp.lt.u32.totalorder %s7699_s21, %s8126_s7 }
  0x19   :  { %p7705_p10 = pnand %p7703_p9, %p7700_p8 }
  0x1b   :  { %7708 = shalt.err (!%p7705_p10)
}
  0x1c   :  { %s7709_s27 = scalar_lea.vmem %s73_s18, 12288  ;;  %p7714_p12 = scmp.lt.s32.totalorder %s73_s18, %s73_s18 }
  0x1d   :  { %p7710_p11 = scmp.ne.s32.totalorder %s73_s18, %s7709_s27  ;;  %p7715_p13 = scmp.lt.s32.totalorder %s7709_s27, %s7709_s27 }
  0x1f   :  { %p7716_p0 = por %p7715_p13, %p7714_p12 }
  0x21   :  { %p7717_p1 = pnand %p7716_p0, %p7710_p11 }
  0x23   :  { %7720 = shalt.err (!%p7717_p1)
}
  0x24   :  { %s7845_s3 = smov 192   ;;  %s7846_s22 = smov 12  }
  0x25   :  { %78 = dma.hbm_to_vmem [thread:$0]  %s8126_s7, 12288, %s73_s18, [#allocation9], %s7845_s3, %s7845_s3, %s7846_s22  }
  0x26   :  { %s7847_s30 = smov [#allocation2]   ;;  %s7721_s19 = scalar_lea.hbm %s8120_s1, 24576 }
  0x27   :  { %s30_s15 = sshll.u32 %s7847_s30, 4  ;;  %p7722_p2 = scmp.ne.s32.totalorder %s8120_s1, %s7721_s19  ;;  %s31_s15 = int_to_ptr.vmem [resolvable:$true] %s30_s15 }
  0x28   :  { %p7725_p3 = scmp.lt.u32.totalorder %s7721_s19, %s8120_s1 }
  0x2a   :  { %p7727_p4 = pnand %p7725_p3, %p7722_p2 }
  0x2c   :  { %7730 = shalt.err (!%p7727_p4)
}
  0x2d   :  { %s7731_s25 = scalar_lea.vmem %s31_s15, 24576  ;;  %p7736_p6 = scmp.lt.s32.totalorder %s31_s15, %s31_s15 }
  0x2e   :  { %p7732_p5 = scmp.ne.s32.totalorder %s31_s15, %s7731_s25  ;;  %p7737_p7 = scmp.lt.s32.totalorder %s7731_s25, %s7731_s25 }
  0x30   :  { %p7738_p8 = por %p7737_p7, %p7736_p6 }
  0x32   :  { %p7739_p9 = pnand %p7738_p8, %p7732_p5 }
  0x34   :  { %7742 = shalt.err (!%p7739_p9)
}
  0x35   :  { %s7848_s7 = smov 256   ;;  %s7849_s18 = smov 16  }
  0x36   :  { %36 = dma.hbm_to_vmem [thread:$0]  %s8120_s1, 24576, %s31_s15, [#allocation3], %s7848_s7, %s7848_s7, %s7849_s18  }
  0x37   :  { %s7850_s3 = smov [#allocation7]   ;;  %s7851_s28 = smov [#allocation10]  }
  0x38   :  { %s58_s22 = sshll.u32 %s7850_s3, 4  ;;  %s86_s29 = sshll.u32 %s7851_s28, 4  ;;  %s59_s22 = int_to_ptr.vmem [resolvable:$true] %s58_s22  ;;  %s87_s29 = int_to_ptr.vmem [resolvable:$true] %s86_s29 }
  0x39   :  { %s7743_s17 = scalar_lea.hbm %s8124_s5, 24576 }
  0x3a   :  { %p7744_p10 = scmp.ne.s32.totalorder %s8124_s5, %s7743_s17  ;;  %p7747_p11 = scmp.lt.u32.totalorder %s7743_s17, %s8124_s5 }
  0x3c   :  { %p7749_p12 = pnand %p7747_p11, %p7744_p10 }
  0x3e   :  { %7752 = shalt.err (!%p7749_p12)
}
  0x3f   :  { %s7753_s1 = scalar_lea.vmem %s59_s22, 24576  ;;  %p7758_p0 = scmp.lt.s32.totalorder %s59_s22, %s59_s22 }
  0x40   :  { %p7754_p13 = scmp.ne.s32.totalorder %s59_s22, %s7753_s1  ;;  %p7759_p1 = scmp.lt.s32.totalorder %s7753_s1, %s7753_s1 }
  0x42   :  { %p7760_p2 = por %p7759_p1, %p7758_p0 }
  0x44   :  { %p7761_p3 = pnand %p7760_p2, %p7754_p13 }
  0x46   :  { %7764 = shalt.err (!%p7761_p3)
}
  0x47   :  { %64 = dma.hbm_to_vmem [thread:$0]  %s8124_s5, 24576, %s59_s22, [#allocation6], %s7848_s7, %s7848_s7, %s7849_s18  }
  0x48   :  { %s7765_s27 = scalar_lea.hbm %s8128_s9, 3072 }
  0x49   :  { %p7766_p4 = scmp.ne.s32.totalorder %s8128_s9, %s7765_s27  ;;  %p7769_p5 = scmp.lt.u32.totalorder %s7765_s27, %s8128_s9 }
  0x4b   :  { %p7771_p6 = pnand %p7769_p5, %p7766_p4 }
  0x4d   :  { %7774 = shalt.err (!%p7771_p6)
}
  0x4e   :  { %s7775_s17 = scalar_lea.vmem %s87_s29, 3072  ;;  %p7780_p8 = scmp.lt.s32.totalorder %s87_s29, %s87_s29 }
  0x4f   :  { %p7776_p7 = scmp.ne.s32.totalorder %s87_s29, %s7775_s17  ;;  %p7781_p9 = scmp.lt.s32.totalorder %s7775_s17, %s7775_s17 }
  0x51   :  { %p7782_p10 = por %p7781_p9, %p7780_p8 }
  0x53   :  { %p7783_p11 = pnand %p7782_p10, %p7776_p7 }
  0x55   :  { %7786 = shalt.err (!%p7783_p11)
}
  0x56   :  { %s7852_s5 = smov 64   ;;  %s7853_s7 = smov 4  }
  0x57   :  { %92 = dma.hbm_to_vmem [thread:$0]  %s8128_s9, 3072, %s87_s29, [#allocation9], %s7852_s5, %s7852_s5, %s7853_s7  }
  0x58   :  { %7831 = dma.done.wait [#allocation3], 24576  }
  0x59   :  { %7832 = vsyncadd [#allocation3], 4294942720 }
  0x5a   :  { %7833 = dma.done.wait [#allocation6], 49152  }
  0x5b   :  { %7834 = vsyncadd [#allocation6], 4294918144 }
  0x5c   :  { %7835 = dma.done.wait [#allocation9], 15360  }
  0x5d   :  { %7836 = vsyncadd [#allocation9], 4294951936  ;;  %v6628_v0 = vld [vmem:[#allocation2 + $0x4] ss:$16 sps:$4 sm:$0xff]   ;;  %v6630_v1 = vld [vmem:[#allocation2 + $0xc] ss:$16 sps:$4 sm:$0xff]  }
  0x5e   :  { %1321 = vmatprep.subr.bf16.mxu0 %v6628_v0  ;;  %v6632_v2 = vld [vmem:[#allocation2] ss:$16 sps:$4 sm:$0xff]   ;;  %v6633_v3 = vld [vmem:[#allocation2 + $0x8] ss:$16 sps:$4 sm:$0xff]   ;;  %1450 = vmatprep.subr.bf16.mxu1 %v6630_v1  ;;  %v6634_v4 = vld [vmem:[#allocation2 + $0x24] ss:$16 sps:$4 sm:$0xff]  }
  0x5f   :  { %1322 = vmatpush1.bf16.msra.mxu0 %v6632_v2  ;;  %1451 = vmatpush1.bf16.msra.mxu1 %v6633_v3  ;;  %v6636_v5 = vld [vmem:[#allocation2 + $0x2c] ss:$16 sps:$4 sm:$0xff]   ;;  %v6638_v6 = vld [vmem:[#allocation2 + $0x20] ss:$16 sps:$4 sm:$0xff]   ;;  %v6639_v7 = vld [vmem:[#allocation2 + $0x28] ss:$16 sps:$4 sm:$0xff]  }
  0x60   :  { %1323 = vmatprep.subr.bf16.mxu0 %v6634_v4  ;;  %1452 = vmatprep.subr.bf16.mxu1 %v6636_v5  ;;  %v6640_v8 = vld [vmem:[#allocation2 + $0x44] ss:$16 sps:$4 sm:$0xff]   ;;  %v6642_v9 = vld [vmem:[#allocation2 + $0x4c] ss:$16 sps:$4 sm:$0xff]   ;;  %v6644_v10 = vld [vmem:[#allocation2 + $0x40] ss:$16 sps:$4 sm:$0xff]  }
  0x61   :  { %v6645_v11 = vld [vmem:[#allocation2 + $0x48] ss:$16 sps:$4 sm:$0xff]   ;;  %v6646_v12 = vld [vmem:[#allocation2 + $0x64] ss:$16 sps:$4 sm:$0xff]   ;;  %v6648_v13 = vld [vmem:[#allocation2 + $0x6c] ss:$16 sps:$4 sm:$0xff]  }
  0x62   :  { %v6650_v14 = vld [vmem:[#allocation2 + $0x60] ss:$16 sps:$4 sm:$0xff]   ;;  %v6651_v15 = vld [vmem:[#allocation2 + $0x68] ss:$16 sps:$4 sm:$0xff]   ;;  %v6652_v16 = vld [vmem:[#allocation2 + $0x84] ss:$16 sps:$4 sm:$0xff]  }
  0x63   :  { %1324 = vmatpush1.bf16.msra.mxu0 %v6638_v6  ;;  %1453 = vmatpush1.bf16.msra.mxu1 %v6639_v7  ;;  %v6654_v17 = vld [vmem:[#allocation2 + $0x8c] ss:$16 sps:$4 sm:$0xff]   ;;  %v6656_v18 = vld [vmem:[#allocation2 + $0x80] ss:$16 sps:$4 sm:$0xff]   ;;  %v6657_v19 = vld [vmem:[#allocation2 + $0x88] ss:$16 sps:$4 sm:$0xff]  }
  0x64   :  { %1325 = vmatprep.subr.bf16.mxu0 %v6640_v8  ;;  %1454 = vmatprep.subr.bf16.mxu1 %v6642_v9  ;;  %v6658_v20 = vld [vmem:[#allocation2 + $0xa4] ss:$16 sps:$4 sm:$0xff]   ;;  %v6660_v21 = vld [vmem:[#allocation2 + $0xac] ss:$16 sps:$4 sm:$0xff]   ;;  %v6662_v22 = vld [vmem:[#allocation2 + $0xa0] ss:$16 sps:$4 sm:$0xff]  }
  0x65   :  { %v6663_v23 = vld [vmem:[#allocation2 + $0xa8] ss:$16 sps:$4 sm:$0xff]   ;;  %v6664_v24 = vld [vmem:[#allocation2 + $0xc4] ss:$16 sps:$4 sm:$0xff]   ;;  %v6666_v25 = vld [vmem:[#allocation2 + $0xcc] ss:$16 sps:$4 sm:$0xff]  }
  0x66   :  { %v6668_v26 = vld [vmem:[#allocation2 + $0xc0] ss:$16 sps:$4 sm:$0xff]   ;;  %v6669_v27 = vld [vmem:[#allocation2 + $0xc8] ss:$16 sps:$4 sm:$0xff]   ;;  %v6670_v28 = vld [vmem:[#allocation2 + $0xe4] ss:$16 sps:$4 sm:$0xff]  }
  0x67   :  { %1326 = vmatpush1.bf16.msra.mxu0 %v6644_v10  ;;  %1455 = vmatpush1.bf16.msra.mxu1 %v6645_v11  ;;  %v6672_v29 = vld [vmem:[#allocation2 + $0xec] ss:$16 sps:$4 sm:$0xff]   ;;  %v6674_v30 = vld [vmem:[#allocation2 + $0xe0] ss:$16 sps:$4 sm:$0xff]   ;;  %v6675_v31 = vld [vmem:[#allocation2 + $0xe8] ss:$16 sps:$4 sm:$0xff]  }
  0x68   :  { %1327 = vmatprep.subr.bf16.mxu0 %v6646_v12  ;;  %1456 = vmatprep.subr.bf16.mxu1 %v6648_v13  ;;  %v6676_v32 = vld [vmem:[#allocation2 + $0x104] ss:$16 sps:$4 sm:$0xff]   ;;  %v6678_v33 = vld [vmem:[#allocation2 + $0x10c] ss:$16 sps:$4 sm:$0xff]   ;;  %v6680_v34 = vld [vmem:[#allocation2 + $0x100] ss:$16 sps:$4 sm:$0xff]  }
  0x69   :  { %v6681_v35 = vld [vmem:[#allocation2 + $0x108] ss:$16 sps:$4 sm:$0xff]   ;;  %v6682_v36 = vld [vmem:[#allocation2 + $0x124] ss:$16 sps:$4 sm:$0xff]   ;;  %v6684_v37 = vld [vmem:[#allocation2 + $0x12c] ss:$16 sps:$4 sm:$0xff]  }
  0x6a   :  { %v6686_v38 = vld [vmem:[#allocation2 + $0x120] ss:$16 sps:$4 sm:$0xff]   ;;  %v6687_v39 = vld [vmem:[#allocation2 + $0x128] ss:$16 sps:$4 sm:$0xff]   ;;  %v6688_v40 = vld [vmem:[#allocation2 + $0x144] ss:$16 sps:$4 sm:$0xff]  }
  0x6b   :  { %1328 = vmatpush1.bf16.msra.mxu0 %v6650_v14  ;;  %1457 = vmatpush1.bf16.msra.mxu1 %v6651_v15  ;;  %v6690_v41 = vld [vmem:[#allocation2 + $0x14c] ss:$16 sps:$4 sm:$0xff]   ;;  %v6692_v42 = vld [vmem:[#allocation2 + $0x140] ss:$16 sps:$4 sm:$0xff]   ;;  %v6693_v43 = vld [vmem:[#allocation2 + $0x148] ss:$16 sps:$4 sm:$0xff]  }
  0x6c   :  { %1329 = vmatprep.subr.bf16.mxu0 %v6652_v16  ;;  %1458 = vmatprep.subr.bf16.mxu1 %v6654_v17  ;;  %v6694_v44 = vld [vmem:[#allocation2 + $0x164] ss:$16 sps:$4 sm:$0xff]   ;;  %v6696_v45 = vld [vmem:[#allocation2 + $0x16c] ss:$16 sps:$4 sm:$0xff]   ;;  %v6698_v46 = vld [vmem:[#allocation2 + $0x160] ss:$16 sps:$4 sm:$0xff]  }
  0x6d   :  { %v6699_v47 = vld [vmem:[#allocation2 + $0x168] ss:$16 sps:$4 sm:$0xff]   ;;  %v6726_v48 = vld [vmem:[%s8119_s0 + $0x4] ss:$24 sps:$4 sm:$0xff]   ;;  %v6704_v51 = vld [vmem:[#allocation2 + $0x180] ss:$16 sps:$4 sm:$0xff]  }
  0x6e   :  { %v6700_v49 = vld [vmem:[#allocation2 + $0x184] ss:$16 sps:$4 sm:$0xff]   ;;  %v6702_v50 = vld [vmem:[#allocation2 + $0x18c] ss:$16 sps:$4 sm:$0xff]   ;;  %1353 = vmatprep.mubr.bf16.mxu0 %v6726_v48  ;;  %1482 = vmatprep.mubr.bf16.mxu1 %v6726_v48  ;;  %v6705_v52 = vld [vmem:[#allocation2 + $0x188] ss:$16 sps:$4 sm:$0xff]  }
  0x6f   :  { %1330 = vmatpush1.bf16.msra.mxu0 %v6656_v18  ;;  %1459 = vmatpush1.bf16.msra.mxu1 %v6657_v19  ;;  %v6706_v53 = vld [vmem:[#allocation2 + $0x1a4] ss:$16 sps:$4 sm:$0xff]   ;;  %v6708_v54 = vld [vmem:[#allocation2 + $0x1ac] ss:$16 sps:$4 sm:$0xff]   ;;  %v6710_v55 = vld [vmem:[#allocation2 + $0x1a0] ss:$16 sps:$4 sm:$0xff]  }
  0x70   :  { %1331 = vmatprep.subr.bf16.mxu0 %v6658_v20  ;;  %1460 = vmatprep.subr.bf16.mxu1 %v6660_v21  ;;  %v6711_v56 = vld [vmem:[#allocation2 + $0x1a8] ss:$16 sps:$4 sm:$0xff]   ;;  %v6712_v57 = vld [vmem:[#allocation2 + $0x1c4] ss:$16 sps:$4 sm:$0xff]   ;;  %v6714_v58 = vld [vmem:[#allocation2 + $0x1cc] ss:$16 sps:$4 sm:$0xff]  }
  0x71   :  { %v6716_v59 = vld [vmem:[#allocation2 + $0x1c0] ss:$16 sps:$4 sm:$0xff]   ;;  %v6717_v60 = vld [vmem:[#allocation2 + $0x1c8] ss:$16 sps:$4 sm:$0xff]   ;;  %v6718_v61 = vld [vmem:[#allocation2 + $0x1e4] ss:$16 sps:$4 sm:$0xff]  }
  0x72   :  { %v6720_v62 = vld [vmem:[#allocation2 + $0x1ec] ss:$16 sps:$4 sm:$0xff]   ;;  %v6722_v63 = vld [vmem:[#allocation2 + $0x1e0] ss:$16 sps:$4 sm:$0xff]   ;;  %v6723_v0 = vld [vmem:[#allocation2 + $0x1e8] ss:$16 sps:$4 sm:$0xff]  }
  0x73   :  { %1332 = vmatpush1.bf16.msra.mxu0 %v6662_v22  ;;  %1461 = vmatpush1.bf16.msra.mxu1 %v6663_v23  ;;  %v6729_v1 = vld [vmem:[#allocation2 + $0x204] ss:$16 sps:$4 sm:$0xff]   ;;  %v6732_v2 = vld [vmem:[#allocation2 + $0x20c] ss:$16 sps:$4 sm:$0xff]   ;;  %v6724_v3 = vld [vmem:[%s8119_s0] ss:$24 sps:$4 sm:$0xff]  }
  0x74   :  { %1333 = vmatprep.subr.bf16.mxu0 %v6664_v24  ;;  %1462 = vmatprep.subr.bf16.mxu1 %v6666_v25  ;;  %v6727_v4 = vld [vmem:[#allocation2 + $0x200] ss:$16 sps:$4 sm:$0xff]   ;;  %v6730_v5 = vld [vmem:[#allocation2 + $0x208] ss:$16 sps:$4 sm:$0xff]   ;;  %v6735_v6 = vld [vmem:[#allocation2 + $0x224] ss:$16 sps:$4 sm:$0xff]  }
  0x75   :  { %v6738_v7 = vld [vmem:[#allocation2 + $0x22c] ss:$16 sps:$4 sm:$0xff]   ;;  %v6733_v8 = vld [vmem:[#allocation2 + $0x220] ss:$16 sps:$4 sm:$0xff]   ;;  %v6736_v9 = vld [vmem:[#allocation2 + $0x228] ss:$16 sps:$4 sm:$0xff]  }
  0x76   :  { %v6741_v10 = vld [vmem:[#allocation2 + $0x244] ss:$16 sps:$4 sm:$0xff]   ;;  %v6744_v11 = vld [vmem:[#allocation2 + $0x24c] ss:$16 sps:$4 sm:$0xff]   ;;  %v6739_v12 = vld [vmem:[#allocation2 + $0x240] ss:$16 sps:$4 sm:$0xff]  }
  0x77   :  { %1334 = vmatpush1.bf16.msra.mxu0 %v6668_v26  ;;  %1463 = vmatpush1.bf16.msra.mxu1 %v6669_v27  ;;  %v6742_v13 = vld [vmem:[#allocation2 + $0x248] ss:$16 sps:$4 sm:$0xff]   ;;  %v6747_v14 = vld [vmem:[#allocation2 + $0x264] ss:$16 sps:$4 sm:$0xff]   ;;  %v6750_v15 = vld [vmem:[#allocation2 + $0x26c] ss:$16 sps:$4 sm:$0xff]  }
  0x78   :  { %1335 = vmatprep.subr.bf16.mxu0 %v6670_v28  ;;  %1464 = vmatprep.subr.bf16.mxu1 %v6672_v29  ;;  %v6745_v16 = vld [vmem:[#allocation2 + $0x260] ss:$16 sps:$4 sm:$0xff]   ;;  %v6748_v17 = vld [vmem:[#allocation2 + $0x268] ss:$16 sps:$4 sm:$0xff]   ;;  %v6753_v18 = vld [vmem:[#allocation2 + $0x284] ss:$16 sps:$4 sm:$0xff]  }
  0x79   :  { %v6756_v19 = vld [vmem:[#allocation2 + $0x28c] ss:$16 sps:$4 sm:$0xff]   ;;  %v6751_v20 = vld [vmem:[#allocation2 + $0x280] ss:$16 sps:$4 sm:$0xff]   ;;  %v6754_v21 = vld [vmem:[#allocation2 + $0x288] ss:$16 sps:$4 sm:$0xff]  }
  0x7a   :  { %v6759_v22 = vld [vmem:[#allocation2 + $0x2a4] ss:$16 sps:$4 sm:$0xff]   ;;  %v6762_v23 = vld [vmem:[#allocation2 + $0x2ac] ss:$16 sps:$4 sm:$0xff]   ;;  %v6757_v24 = vld [vmem:[#allocation2 + $0x2a0] ss:$16 sps:$4 sm:$0xff]  }
  0x7b   :  { %1336 = vmatpush1.bf16.msra.mxu0 %v6674_v30  ;;  %1465 = vmatpush1.bf16.msra.mxu1 %v6675_v31  ;;  %v6760_v25 = vld [vmem:[#allocation2 + $0x2a8] ss:$16 sps:$4 sm:$0xff]   ;;  %v6765_v26 = vld [vmem:[#allocation2 + $0x2c4] ss:$16 sps:$4 sm:$0xff]   ;;  %v6768_v27 = vld [vmem:[#allocation2 + $0x2cc] ss:$16 sps:$4 sm:$0xff]  }
  0x7c   :  { %1337 = vmatprep.subr.bf16.mxu0 %v6676_v32  ;;  %1466 = vmatprep.subr.bf16.mxu1 %v6678_v33  ;;  %v6763_v28 = vld [vmem:[#allocation2 + $0x2c0] ss:$16 sps:$4 sm:$0xff]   ;;  %v6766_v29 = vld [vmem:[#allocation2 + $0x2c8] ss:$16 sps:$4 sm:$0xff]   ;;  %v6825_v30 = vld [vmem:[%s8119_s0 + $0xc] ss:$24 sps:$4 sm:$0xff]  }
  0x7d   :  { %v6771_v31 = vld [vmem:[#allocation2 + $0x2e4] ss:$16 sps:$4 sm:$0xff]   ;;  %v6774_v32 = vld [vmem:[#allocation2 + $0x2ec] ss:$16 sps:$4 sm:$0xff]   ;;  %v6769_v33 = vld [vmem:[#allocation2 + $0x2e0] ss:$16 sps:$4 sm:$0xff]  }
  0x7e   :  { %v6798_v48 = vld [vmem:[#allocation2 + $0x36c] ss:$16 sps:$4 sm:$0xff]   ;;  %vm7855_vm0 = vmmov 0  }
  0x7f   :  { %1338 = vmatpush1.bf16.msra.mxu0 %v6680_v34  ;;  %1467 = vmatpush1.bf16.msra.mxu1 %v6681_v35  ;;  %v6772_v34 = vld [vmem:[#allocation2 + $0x2e8] ss:$16 sps:$4 sm:$0xff]   ;;  %v6777_v35 = vld [vmem:[#allocation2 + $0x304] ss:$16 sps:$4 sm:$0xff]  }
  0x80   :  { %1339 = vmatprep.subr.bf16.mxu0 %v6682_v36  ;;  %1468 = vmatprep.subr.bf16.mxu1 %v6684_v37  ;;  %v6780_v36 = vld [vmem:[#allocation2 + $0x30c] ss:$16 sps:$4 sm:$0xff]   ;;  %v6775_v37 = vld [vmem:[#allocation2 + $0x300] ss:$16 sps:$4 sm:$0xff]  }
  0x83   :  { %1340 = vmatpush1.bf16.msra.mxu0 %v6686_v38  ;;  %1469 = vmatpush1.bf16.msra.mxu1 %v6687_v39  ;;  %v6778_v38 = vld [vmem:[#allocation2 + $0x308] ss:$16 sps:$4 sm:$0xff]   ;;  %v6783_v39 = vld [vmem:[#allocation2 + $0x324] ss:$16 sps:$4 sm:$0xff]  }
  0x84   :  { %1341 = vmatprep.subr.bf16.mxu0 %v6688_v40  ;;  %1470 = vmatprep.subr.bf16.mxu1 %v6690_v41  ;;  %v6786_v40 = vld [vmem:[#allocation2 + $0x32c] ss:$16 sps:$4 sm:$0xff]   ;;  %v6781_v41 = vld [vmem:[#allocation2 + $0x320] ss:$16 sps:$4 sm:$0xff]  }
  0x87   :  { %1342 = vmatpush1.bf16.msra.mxu0 %v6692_v42  ;;  %1471 = vmatpush1.bf16.msra.mxu1 %v6693_v43  ;;  %v6784_v42 = vld [vmem:[#allocation2 + $0x328] ss:$16 sps:$4 sm:$0xff]   ;;  %v6789_v43 = vld [vmem:[#allocation2 + $0x344] ss:$16 sps:$4 sm:$0xff]  }
  0x88   :  { %1343 = vmatprep.subr.bf16.mxu0 %v6694_v44  ;;  %1472 = vmatprep.subr.bf16.mxu1 %v6696_v45  ;;  %v6792_v44 = vld [vmem:[#allocation2 + $0x34c] ss:$16 sps:$4 sm:$0xff]   ;;  %v6787_v45 = vld [vmem:[#allocation2 + $0x340] ss:$16 sps:$4 sm:$0xff]  }
  0x8b   :  { %1344 = vmatpush1.bf16.msra.mxu0 %v6698_v46  ;;  %1473 = vmatpush1.bf16.msra.mxu1 %v6699_v47  ;;  %v6790_v46 = vld [vmem:[#allocation2 + $0x348] ss:$16 sps:$4 sm:$0xff]   ;;  %v6795_v47 = vld [vmem:[#allocation2 + $0x364] ss:$16 sps:$4 sm:$0xff]  }
  0x8c   :  { %1345 = vmatprep.subr.bf16.mxu0 %v6700_v49  ;;  %1474 = vmatprep.subr.bf16.mxu1 %v6702_v50  ;;  %v6793_v49 = vld [vmem:[#allocation2 + $0x360] ss:$16 sps:$4 sm:$0xff]   ;;  %v6796_v50 = vld [vmem:[#allocation2 + $0x368] ss:$16 sps:$4 sm:$0xff]  }
  0x8f   :  { %1346 = vmatpush1.bf16.msra.mxu0 %v6704_v51  ;;  %1475 = vmatpush1.bf16.msra.mxu1 %v6705_v52  ;;  %v6801_v51 = vld [vmem:[#allocation2 + $0x384] ss:$16 sps:$4 sm:$0xff]   ;;  %v6804_v52 = vld [vmem:[#allocation2 + $0x38c] ss:$16 sps:$4 sm:$0xff]  }
  0x90   :  { %1347 = vmatprep.subr.bf16.mxu0 %v6706_v53  ;;  %1476 = vmatprep.subr.bf16.mxu1 %v6708_v54  ;;  %v6799_v53 = vld [vmem:[#allocation2 + $0x380] ss:$16 sps:$4 sm:$0xff]   ;;  %v6802_v54 = vld [vmem:[#allocation2 + $0x388] ss:$16 sps:$4 sm:$0xff]  }
  0x93   :  { %1348 = vmatpush1.bf16.msra.mxu0 %v6710_v55  ;;  %1477 = vmatpush1.bf16.msra.mxu1 %v6711_v56  ;;  %v6807_v55 = vld [vmem:[#allocation2 + $0x3a4] ss:$16 sps:$4 sm:$0xff]   ;;  %v6810_v56 = vld [vmem:[#allocation2 + $0x3ac] ss:$16 sps:$4 sm:$0xff]  }
  0x94   :  { %1349 = vmatprep.subr.bf16.mxu0 %v6712_v57  ;;  %1478 = vmatprep.subr.bf16.mxu1 %v6714_v58  ;;  %v6805_v57 = vld [vmem:[#allocation2 + $0x3a0] ss:$16 sps:$4 sm:$0xff]   ;;  %v6808_v58 = vld [vmem:[#allocation2 + $0x3a8] ss:$16 sps:$4 sm:$0xff]  }
  0x97   :  { %1350 = vmatpush1.bf16.msra.mxu0 %v6716_v59  ;;  %1479 = vmatpush1.bf16.msra.mxu1 %v6717_v60  ;;  %v6813_v59 = vld [vmem:[#allocation2 + $0x3c4] ss:$16 sps:$4 sm:$0xff]   ;;  %v6816_v60 = vld [vmem:[#allocation2 + $0x3cc] ss:$16 sps:$4 sm:$0xff]  }
  0x98   :  { %1351 = vmatprep.subr.bf16.mxu0 %v6718_v61  ;;  %1480 = vmatprep.subr.bf16.mxu1 %v6720_v62  ;;  %v6811_v61 = vld [vmem:[#allocation2 + $0x3c0] ss:$16 sps:$4 sm:$0xff]   ;;  %v6814_v62 = vld [vmem:[#allocation2 + $0x3c8] ss:$16 sps:$4 sm:$0xff]  }
  0x9b   :  { %1352 = vmatpush1.bf16.msra.mxu0 %v6722_v63  ;;  %1481 = vmatpush1.bf16.msra.mxu1 %v6723_v0  ;;  %v6819_v63 = vld [vmem:[#allocation2 + $0x3e4] ss:$16 sps:$4 sm:$0xff]   ;;  %v6822_v0 = vld [vmem:[#allocation2 + $0x3ec] ss:$16 sps:$4 sm:$0xff]  }
  0x9c   :  { %1364 = vmatprep.subr.bf16.mxu0 %v6729_v1  ;;  %1493 = vmatprep.subr.bf16.mxu1 %v6732_v2  ;;  %v6817_v1 = vld [vmem:[#allocation2 + $0x3e0] ss:$16 sps:$4 sm:$0xff]   ;;  %v6820_v2 = vld [vmem:[#allocation2 + $0x3e8] ss:$16 sps:$4 sm:$0xff]  }
  0x9e   :  { %1354 = vmatmul.mubr.bf16.vlgmr.msra.gmra.mrb[0].mxu0 %v6724_v3  ;;  %1483 = vmatmul.mubr.bf16.vlgmr.msra.gmra.mrb[0].mxu1 %v6724_v3  ;;  %v6828_v3 = vld [vmem:[#allocation2 + $0x404] ss:$16 sps:$4 sm:$0xff]  }
  0x9f   :  { %1365 = vmatpush1.bf16.msra.mxu0 %v6727_v4  ;;  %1494 = vmatpush1.bf16.msra.mxu1 %v6730_v5  ;;  %v6831_v4 = vld [vmem:[#allocation2 + $0x40c] ss:$16 sps:$4 sm:$0xff]   ;;  %v6823_v5 = vld [vmem:[%s8119_s0 + $0x8] ss:$24 sps:$4 sm:$0xff]  }
  0xa0   :  { %1366 = vmatprep.subr.bf16.mxu0 %v6735_v6  ;;  %1495 = vmatprep.subr.bf16.mxu1 %v6738_v7  ;;  %v6826_v6 = vld [vmem:[#allocation2 + $0x400] ss:$16 sps:$4 sm:$0xff]   ;;  %v6829_v7 = vld [vmem:[#allocation2 + $0x408] ss:$16 sps:$4 sm:$0xff]  }
  0xa1   :  { %1396 = vmatprep.mubr.bf16.mxu0 %v6825_v30  ;;  %1525 = vmatprep.mubr.bf16.mxu1 %v6825_v30  ;;  %v6867_v30 = vld [vmem:[#allocation2 + $0x4cc] ss:$16 sps:$4 sm:$0xff]  }
  0xa3   :  { %1367 = vmatpush1.bf16.msra.mxu0 %v6733_v8  ;;  %1496 = vmatpush1.bf16.msra.mxu1 %v6736_v9  ;;  %v6834_v8 = vld [vmem:[#allocation2 + $0x424] ss:$16 sps:$4 sm:$0xff]   ;;  %v6837_v9 = vld [vmem:[#allocation2 + $0x42c] ss:$16 sps:$4 sm:$0xff]  }
  0xa4   :  { %1368 = vmatprep.subr.bf16.mxu0 %v6741_v10  ;;  %1497 = vmatprep.subr.bf16.mxu1 %v6744_v11  ;;  %v6832_v10 = vld [vmem:[#allocation2 + $0x420] ss:$16 sps:$4 sm:$0xff]   ;;  %v6835_v11 = vld [vmem:[#allocation2 + $0x428] ss:$16 sps:$4 sm:$0xff]  }
  0xa7   :  { %1369 = vmatpush1.bf16.msra.mxu0 %v6739_v12  ;;  %1498 = vmatpush1.bf16.msra.mxu1 %v6742_v13  ;;  %v6924_v12 = vld [vmem:[%s8119_s0 + $0x14] ss:$24 sps:$4 sm:$0xff]  }
  0xa8   :  { %1370 = vmatprep.subr.bf16.mxu0 %v6747_v14  ;;  %1499 = vmatprep.subr.bf16.mxu1 %v6750_v15  ;;  %v6840_v13 = vld [vmem:[#allocation2 + $0x444] ss:$16 sps:$4 sm:$0xff]   ;;  %v6843_v14 = vld [vmem:[#allocation2 + $0x44c] ss:$16 sps:$4 sm:$0xff]   ;;  %v6838_v15 = vld [vmem:[#allocation2 + $0x440] ss:$16 sps:$4 sm:$0xff]  }
  0xab   :  { %1371 = vmatpush1.bf16.msra.mxu0 %v6745_v16  ;;  %1500 = vmatpush1.bf16.msra.mxu1 %v6748_v17  ;;  %v6841_v16 = vld [vmem:[#allocation2 + $0x448] ss:$16 sps:$4 sm:$0xff]   ;;  %v6846_v17 = vld [vmem:[#allocation2 + $0x464] ss:$16 sps:$4 sm:$0xff]  }
  0xac   :  { %1372 = vmatprep.subr.bf16.mxu0 %v6753_v18  ;;  %1501 = vmatprep.subr.bf16.mxu1 %v6756_v19  ;;  %v6849_v18 = vld [vmem:[#allocation2 + $0x46c] ss:$16 sps:$4 sm:$0xff]   ;;  %v6844_v19 = vld [vmem:[#allocation2 + $0x460] ss:$16 sps:$4 sm:$0xff]  }
  0xaf   :  { %1373 = vmatpush1.bf16.msra.mxu0 %v6751_v20  ;;  %1502 = vmatpush1.bf16.msra.mxu1 %v6754_v21  ;;  %v6847_v20 = vld [vmem:[#allocation2 + $0x468] ss:$16 sps:$4 sm:$0xff]   ;;  %v6852_v21 = vld [vmem:[#allocation2 + $0x484] ss:$16 sps:$4 sm:$0xff]  }
  0xb0   :  { %1374 = vmatprep.subr.bf16.mxu0 %v6759_v22  ;;  %1503 = vmatprep.subr.bf16.mxu1 %v6762_v23  ;;  %v6855_v22 = vld [vmem:[#allocation2 + $0x48c] ss:$16 sps:$4 sm:$0xff]   ;;  %v6850_v23 = vld [vmem:[#allocation2 + $0x480] ss:$16 sps:$4 sm:$0xff]  }
  0xb3   :  { %1375 = vmatpush1.bf16.msra.mxu0 %v6757_v24  ;;  %1504 = vmatpush1.bf16.msra.mxu1 %v6760_v25  ;;  %v6853_v24 = vld [vmem:[#allocation2 + $0x488] ss:$16 sps:$4 sm:$0xff]   ;;  %v6858_v25 = vld [vmem:[#allocation2 + $0x4a4] ss:$16 sps:$4 sm:$0xff]  }
  0xb4   :  { %1376 = vmatprep.subr.bf16.mxu0 %v6765_v26  ;;  %1505 = vmatprep.subr.bf16.mxu1 %v6768_v27  ;;  %v6861_v26 = vld [vmem:[#allocation2 + $0x4ac] ss:$16 sps:$4 sm:$0xff]   ;;  %v6856_v27 = vld [vmem:[#allocation2 + $0x4a0] ss:$16 sps:$4 sm:$0xff]  }
  0xb7   :  { %1377 = vmatpush1.bf16.msra.mxu0 %v6763_v28  ;;  %1506 = vmatpush1.bf16.msra.mxu1 %v6766_v29  ;;  %v6859_v28 = vld [vmem:[#allocation2 + $0x4a8] ss:$16 sps:$4 sm:$0xff]   ;;  %v6864_v29 = vld [vmem:[#allocation2 + $0x4c4] ss:$16 sps:$4 sm:$0xff]  }
  0xb8   :  { %1378 = vmatprep.subr.bf16.mxu0 %v6771_v31  ;;  %1507 = vmatprep.subr.bf16.mxu1 %v6774_v32  ;;  %v6862_v31 = vld [vmem:[#allocation2 + $0x4c0] ss:$16 sps:$4 sm:$0xff]   ;;  %v6865_v32 = vld [vmem:[#allocation2 + $0x4c8] ss:$16 sps:$4 sm:$0xff]  }
  0xbb   :  { %1379 = vmatpush1.bf16.msra.mxu0 %v6769_v33  ;;  %1508 = vmatpush1.bf16.msra.mxu1 %v6772_v34  ;;  %v6870_v33 = vld [vmem:[#allocation2 + $0x4e4] ss:$16 sps:$4 sm:$0xff]   ;;  %v6873_v34 = vld [vmem:[#allocation2 + $0x4ec] ss:$16 sps:$4 sm:$0xff]  }
  0xbc   :  { %1380 = vmatprep.subr.bf16.mxu0 %v6777_v35  ;;  %1509 = vmatprep.subr.bf16.mxu1 %v6780_v36  ;;  %v6868_v35 = vld [vmem:[#allocation2 + $0x4e0] ss:$16 sps:$4 sm:$0xff]   ;;  %v6871_v36 = vld [vmem:[#allocation2 + $0x4e8] ss:$16 sps:$4 sm:$0xff]  }
  0xbf   :  { %1381 = vmatpush1.bf16.msra.mxu0 %v6775_v37  ;;  %1510 = vmatpush1.bf16.msra.mxu1 %v6778_v38  ;;  %v6876_v37 = vld [vmem:[#allocation2 + $0x504] ss:$16 sps:$4 sm:$0xff]   ;;  %v6879_v38 = vld [vmem:[#allocation2 + $0x50c] ss:$16 sps:$4 sm:$0xff]  }
  0xc0   :  { %1382 = vmatprep.subr.bf16.mxu0 %v6783_v39  ;;  %1511 = vmatprep.subr.bf16.mxu1 %v6786_v40  ;;  %v6874_v39 = vld [vmem:[#allocation2 + $0x500] ss:$16 sps:$4 sm:$0xff]   ;;  %v6877_v40 = vld [vmem:[#allocation2 + $0x508] ss:$16 sps:$4 sm:$0xff]  }
  0xc3   :  { %1383 = vmatpush1.bf16.msra.mxu0 %v6781_v41  ;;  %1512 = vmatpush1.bf16.msra.mxu1 %v6784_v42  ;;  %v6882_v41 = vld [vmem:[#allocation2 + $0x524] ss:$16 sps:$4 sm:$0xff]   ;;  %v6885_v42 = vld [vmem:[#allocation2 + $0x52c] ss:$16 sps:$4 sm:$0xff]  }
  0xc4   :  { %1384 = vmatprep.subr.bf16.mxu0 %v6789_v43  ;;  %1513 = vmatprep.subr.bf16.mxu1 %v6792_v44  ;;  %v6880_v43 = vld [vmem:[#allocation2 + $0x520] ss:$16 sps:$4 sm:$0xff]   ;;  %v6883_v44 = vld [vmem:[#allocation2 + $0x528] ss:$16 sps:$4 sm:$0xff]  }
  0xc7   :  { %1385 = vmatpush1.bf16.msra.mxu0 %v6787_v45  ;;  %1514 = vmatpush1.bf16.msra.mxu1 %v6790_v46  ;;  %v6888_v45 = vld [vmem:[#allocation2 + $0x544] ss:$16 sps:$4 sm:$0xff]   ;;  %v6891_v46 = vld [vmem:[#allocation2 + $0x54c] ss:$16 sps:$4 sm:$0xff]  }
  0xc8   :  { %1386 = vmatprep.subr.bf16.mxu0 %v6795_v47  ;;  %1515 = vmatprep.subr.bf16.mxu1 %v6798_v48  ;;  %v6886_v47 = vld [vmem:[#allocation2 + $0x540] ss:$16 sps:$4 sm:$0xff]   ;;  %v6889_v48 = vld [vmem:[#allocation2 + $0x548] ss:$16 sps:$4 sm:$0xff]  }
  0xcb   :  { %1387 = vmatpush1.bf16.msra.mxu0 %v6793_v49  ;;  %1516 = vmatpush1.bf16.msra.mxu1 %v6796_v50  ;;  %v6894_v49 = vld [vmem:[#allocation2 + $0x564] ss:$16 sps:$4 sm:$0xff]   ;;  %v6897_v50 = vld [vmem:[#allocation2 + $0x56c] ss:$16 sps:$4 sm:$0xff]  }
  0xcc   :  { %1388 = vmatprep.subr.bf16.mxu0 %v6801_v51  ;;  %1517 = vmatprep.subr.bf16.mxu1 %v6804_v52  ;;  %v6892_v51 = vld [vmem:[#allocation2 + $0x560] ss:$16 sps:$4 sm:$0xff]   ;;  %v6895_v52 = vld [vmem:[#allocation2 + $0x568] ss:$16 sps:$4 sm:$0xff]  }
  0xcf   :  { %1389 = vmatpush1.bf16.msra.mxu0 %v6799_v53  ;;  %1518 = vmatpush1.bf16.msra.mxu1 %v6802_v54  ;;  %v6900_v53 = vld [vmem:[#allocation2 + $0x584] ss:$16 sps:$4 sm:$0xff]   ;;  %v6903_v54 = vld [vmem:[#allocation2 + $0x58c] ss:$16 sps:$4 sm:$0xff]  }
  0xd0   :  { %1390 = vmatprep.subr.bf16.mxu0 %v6807_v55  ;;  %1519 = vmatprep.subr.bf16.mxu1 %v6810_v56  ;;  %v6898_v55 = vld [vmem:[#allocation2 + $0x580] ss:$16 sps:$4 sm:$0xff]   ;;  %v6901_v56 = vld [vmem:[#allocation2 + $0x588] ss:$16 sps:$4 sm:$0xff]  }
  0xd3   :  { %1391 = vmatpush1.bf16.msra.mxu0 %v6805_v57  ;;  %1520 = vmatpush1.bf16.msra.mxu1 %v6808_v58  ;;  %v6906_v57 = vld [vmem:[#allocation2 + $0x5a4] ss:$16 sps:$4 sm:$0xff]   ;;  %v6909_v58 = vld [vmem:[#allocation2 + $0x5ac] ss:$16 sps:$4 sm:$0xff]  }
  0xd4   :  { %1392 = vmatprep.subr.bf16.mxu0 %v6813_v59  ;;  %1521 = vmatprep.subr.bf16.mxu1 %v6816_v60  ;;  %v6904_v59 = vld [vmem:[#allocation2 + $0x5a0] ss:$16 sps:$4 sm:$0xff]   ;;  %v6907_v60 = vld [vmem:[#allocation2 + $0x5a8] ss:$16 sps:$4 sm:$0xff]  }
  0xd7   :  { %1393 = vmatpush1.bf16.msra.mxu0 %v6811_v61  ;;  %1522 = vmatpush1.bf16.msra.mxu1 %v6814_v62  ;;  %v6912_v61 = vld [vmem:[#allocation2 + $0x5c4] ss:$16 sps:$4 sm:$0xff]   ;;  %v6915_v62 = vld [vmem:[#allocation2 + $0x5cc] ss:$16 sps:$4 sm:$0xff]  }
  0xd8   :  { %1394 = vmatprep.subr.bf16.mxu0 %v6819_v63  ;;  %1523 = vmatprep.subr.bf16.mxu1 %v6822_v0  ;;  %v6910_v63 = vld [vmem:[#allocation2 + $0x5c0] ss:$16 sps:$4 sm:$0xff]   ;;  %v6913_v0 = vld [vmem:[#allocation2 + $0x5c8] ss:$16 sps:$4 sm:$0xff]  }
  0xdb   :  { %1395 = vmatpush1.bf16.msra.mxu0 %v6817_v1  ;;  %1524 = vmatpush1.bf16.msra.mxu1 %v6820_v2  ;;  %v6918_v1 = vld [vmem:[#allocation2 + $0x5e4] ss:$16 sps:$4 sm:$0xff]   ;;  %v6921_v2 = vld [vmem:[#allocation2 + $0x5ec] ss:$16 sps:$4 sm:$0xff]  }
  0xdc   :  { %1407 = vmatprep.subr.bf16.mxu0 %v6828_v3  ;;  %1536 = vmatprep.subr.bf16.mxu1 %v6831_v4  ;;  %v6916_v3 = vld [vmem:[#allocation2 + $0x5e0] ss:$16 sps:$4 sm:$0xff]   ;;  %v6919_v4 = vld [vmem:[#allocation2 + $0x5e8] ss:$16 sps:$4 sm:$0xff]  }
  0xde   :  { %1397 = vmatmul.mubr.bf16.vlgmr.msra.gmra.mrb[0].mxu0 %v6823_v5  ;;  %1526 = vmatmul.mubr.bf16.vlgmr.msra.gmra.mrb[0].mxu1 %v6823_v5  ;;  %v6927_v5 = vld [vmem:[#allocation5 + $0x4] ss:$24 sps:$4 sm:$0xff]  }
  0xdf   :  { %1408 = vmatpush1.bf16.msra.mxu0 %v6826_v6  ;;  %1537 = vmatpush1.bf16.msra.mxu1 %v6829_v7  ;;  %v6930_v6 = vld [vmem:[#allocation5 + $0xc] ss:$24 sps:$4 sm:$0xff]   ;;  %v6922_v7 = vld [vmem:[%s8119_s0 + $0x10] ss:$24 sps:$4 sm:$0xff]  }
  0xe0   :  { %1409 = vmatprep.subr.bf16.mxu0 %v6834_v8  ;;  %1538 = vmatprep.subr.bf16.mxu1 %v6837_v9  ;;  %v6925_v8 = vld [vmem:[#allocation5] ss:$24 sps:$4 sm:$0xff]  }
  0xe1   :  { %1439 = vmatprep.mubr.bf16.mxu0 %v6924_v12  ;;  %1568 = vmatprep.mubr.bf16.mxu1 %v6924_v12  ;;  %v6928_v9 = vld [vmem:[#allocation5 + $0x8] ss:$24 sps:$4 sm:$0xff]  }
  0xe2   :  { %v6931_v12 = vld [vmem:[#allocation5 + $0x30] ss:$24 sps:$4 sm:$0xff]  }
  0xe3   :  { %1410 = vmatpush1.bf16.msra.mxu0 %v6832_v10  ;;  %1539 = vmatpush1.bf16.msra.mxu1 %v6835_v11  ;;  %v6933_v10 = vld [vmem:[#allocation5 + $0x34] ss:$24 sps:$4 sm:$0xff]  }
  0xe4   :  { %1411 = vmatprep.subr.bf16.mxu0 %v6840_v13  ;;  %1540 = vmatprep.subr.bf16.mxu1 %v6843_v14  ;;  %v6936_v11 = vld [vmem:[#allocation5 + $0x3c] ss:$24 sps:$4 sm:$0xff]   ;;  %v6934_v13 = vld [vmem:[#allocation5 + $0x38] ss:$24 sps:$4 sm:$0xff]  }
  0xe5   :  { %v6939_v14 = vld [vmem:[#allocation5 + $0x64] ss:$24 sps:$4 sm:$0xff]  }
  0xe7   :  { %1412 = vmatpush1.bf16.msra.mxu0 %v6838_v15  ;;  %1541 = vmatpush1.bf16.msra.mxu1 %v6841_v16  ;;  %v6942_v15 = vld [vmem:[#allocation5 + $0x6c] ss:$24 sps:$4 sm:$0xff]   ;;  %v6937_v16 = vld [vmem:[#allocation5 + $0x60] ss:$24 sps:$4 sm:$0xff]  }
  0xe8   :  { %1413 = vmatprep.subr.bf16.mxu0 %v6846_v17  ;;  %1542 = vmatprep.subr.bf16.mxu1 %v6849_v18  ;;  %v6940_v17 = vld [vmem:[#allocation5 + $0x68] ss:$24 sps:$4 sm:$0xff]   ;;  %v6945_v18 = vld [vmem:[#allocation5 + $0x94] ss:$24 sps:$4 sm:$0xff]  }
  0xeb   :  { %1414 = vmatpush1.bf16.msra.mxu0 %v6844_v19  ;;  %1543 = vmatpush1.bf16.msra.mxu1 %v6847_v20  ;;  %v6948_v19 = vld [vmem:[#allocation5 + $0x9c] ss:$24 sps:$4 sm:$0xff]   ;;  %v6943_v20 = vld [vmem:[#allocation5 + $0x90] ss:$24 sps:$4 sm:$0xff]  }
  0xec   :  { %1415 = vmatprep.subr.bf16.mxu0 %v6852_v21  ;;  %1544 = vmatprep.subr.bf16.mxu1 %v6855_v22  ;;  %v6946_v21 = vld [vmem:[#allocation5 + $0x98] ss:$24 sps:$4 sm:$0xff]   ;;  %v6951_v22 = vld [vmem:[#allocation5 + $0xc4] ss:$24 sps:$4 sm:$0xff]  }
  0xef   :  { %1416 = vmatpush1.bf16.msra.mxu0 %v6850_v23  ;;  %1545 = vmatpush1.bf16.msra.mxu1 %v6853_v24  ;;  %v6954_v23 = vld [vmem:[#allocation5 + $0xcc] ss:$24 sps:$4 sm:$0xff]   ;;  %v6949_v24 = vld [vmem:[#allocation5 + $0xc0] ss:$24 sps:$4 sm:$0xff]  }
  0xf0   :  { %1417 = vmatprep.subr.bf16.mxu0 %v6858_v25  ;;  %1546 = vmatprep.subr.bf16.mxu1 %v6861_v26  ;;  %v6952_v25 = vld [vmem:[#allocation5 + $0xc8] ss:$24 sps:$4 sm:$0xff]   ;;  %v6957_v26 = vld [vmem:[#allocation5 + $0xf4] ss:$24 sps:$4 sm:$0xff]  }
  0xf3   :  { %1418 = vmatpush1.bf16.msra.mxu0 %v6856_v27  ;;  %1547 = vmatpush1.bf16.msra.mxu1 %v6859_v28  ;;  %v6960_v27 = vld [vmem:[#allocation5 + $0xfc] ss:$24 sps:$4 sm:$0xff]   ;;  %v6955_v28 = vld [vmem:[#allocation5 + $0xf0] ss:$24 sps:$4 sm:$0xff]  }
  0xf4   :  { %1419 = vmatprep.subr.bf16.mxu0 %v6864_v29  ;;  %1548 = vmatprep.subr.bf16.mxu1 %v6867_v30  ;;  %v6958_v29 = vld [vmem:[#allocation5 + $0xf8] ss:$24 sps:$4 sm:$0xff]   ;;  %v6963_v30 = vld [vmem:[#allocation5 + $0x124] ss:$24 sps:$4 sm:$0xff]  }
  0xf7   :  { %1420 = vmatpush1.bf16.msra.mxu0 %v6862_v31  ;;  %1549 = vmatpush1.bf16.msra.mxu1 %v6865_v32  ;;  %v6966_v31 = vld [vmem:[#allocation5 + $0x12c] ss:$24 sps:$4 sm:$0xff]   ;;  %v6961_v32 = vld [vmem:[#allocation5 + $0x120] ss:$24 sps:$4 sm:$0xff]  }
  0xf8   :  { %1421 = vmatprep.subr.bf16.mxu0 %v6870_v33  ;;  %1550 = vmatprep.subr.bf16.mxu1 %v6873_v34  ;;  %v6964_v33 = vld [vmem:[#allocation5 + $0x128] ss:$24 sps:$4 sm:$0xff]   ;;  %v6969_v34 = vld [vmem:[#allocation5 + $0x154] ss:$24 sps:$4 sm:$0xff]  }
  0xfb   :  { %1422 = vmatpush1.bf16.msra.mxu0 %v6868_v35  ;;  %1551 = vmatpush1.bf16.msra.mxu1 %v6871_v36  ;;  %v6972_v35 = vld [vmem:[#allocation5 + $0x15c] ss:$24 sps:$4 sm:$0xff]   ;;  %v6967_v36 = vld [vmem:[#allocation5 + $0x150] ss:$24 sps:$4 sm:$0xff]  }
  0xfc   :  { %1423 = vmatprep.subr.bf16.mxu0 %v6876_v37  ;;  %1552 = vmatprep.subr.bf16.mxu1 %v6879_v38  ;;  %v6970_v37 = vld [vmem:[#allocation5 + $0x158] ss:$24 sps:$4 sm:$0xff]   ;;  %v6975_v38 = vld [vmem:[#allocation5 + $0x184] ss:$24 sps:$4 sm:$0xff]  }
  0xff   :  { %1424 = vmatpush1.bf16.msra.mxu0 %v6874_v39  ;;  %1553 = vmatpush1.bf16.msra.mxu1 %v6877_v40  ;;  %v6978_v39 = vld [vmem:[#allocation5 + $0x18c] ss:$24 sps:$4 sm:$0xff]   ;;  %v6973_v40 = vld [vmem:[#allocation5 + $0x180] ss:$24 sps:$4 sm:$0xff]  }
 0x100   :  { %1425 = vmatprep.subr.bf16.mxu0 %v6882_v41  ;;  %1554 = vmatprep.subr.bf16.mxu1 %v6885_v42  ;;  %v6976_v41 = vld [vmem:[#allocation5 + $0x188] ss:$24 sps:$4 sm:$0xff]   ;;  %v6981_v42 = vld [vmem:[#allocation5 + $0x1b4] ss:$24 sps:$4 sm:$0xff]  }
 0x103   :  { %1426 = vmatpush1.bf16.msra.mxu0 %v6880_v43  ;;  %1555 = vmatpush1.bf16.msra.mxu1 %v6883_v44  ;;  %v6984_v43 = vld [vmem:[#allocation5 + $0x1bc] ss:$24 sps:$4 sm:$0xff]   ;;  %v6979_v44 = vld [vmem:[#allocation5 + $0x1b0] ss:$24 sps:$4 sm:$0xff]  }
 0x104   :  { %1427 = vmatprep.subr.bf16.mxu0 %v6888_v45  ;;  %1556 = vmatprep.subr.bf16.mxu1 %v6891_v46  ;;  %v6982_v45 = vld [vmem:[#allocation5 + $0x1b8] ss:$24 sps:$4 sm:$0xff]   ;;  %v6987_v46 = vld [vmem:[#allocation5 + $0x1e4] ss:$24 sps:$4 sm:$0xff]  }
 0x107   :  { %1428 = vmatpush1.bf16.msra.mxu0 %v6886_v47  ;;  %1557 = vmatpush1.bf16.msra.mxu1 %v6889_v48  ;;  %v6990_v47 = vld [vmem:[#allocation5 + $0x1ec] ss:$24 sps:$4 sm:$0xff]   ;;  %v6985_v48 = vld [vmem:[#allocation5 + $0x1e0] ss:$24 sps:$4 sm:$0xff]  }
 0x108   :  { %1429 = vmatprep.subr.bf16.mxu0 %v6894_v49  ;;  %1558 = vmatprep.subr.bf16.mxu1 %v6897_v50  ;;  %v6988_v49 = vld [vmem:[#allocation5 + $0x1e8] ss:$24 sps:$4 sm:$0xff]   ;;  %v6993_v50 = vld [vmem:[#allocation5 + $0x214] ss:$24 sps:$4 sm:$0xff]  }
 0x10b   :  { %1430 = vmatpush1.bf16.msra.mxu0 %v6892_v51  ;;  %1559 = vmatpush1.bf16.msra.mxu1 %v6895_v52  ;;  %v6996_v51 = vld [vmem:[#allocation5 + $0x21c] ss:$24 sps:$4 sm:$0xff]   ;;  %v6991_v52 = vld [vmem:[#allocation5 + $0x210] ss:$24 sps:$4 sm:$0xff]  }
 0x10c   :  { %1431 = vmatprep.subr.bf16.mxu0 %v6900_v53  ;;  %1560 = vmatprep.subr.bf16.mxu1 %v6903_v54  ;;  %v6994_v53 = vld [vmem:[#allocation5 + $0x218] ss:$24 sps:$4 sm:$0xff]   ;;  %v6999_v54 = vld [vmem:[#allocation5 + $0x244] ss:$24 sps:$4 sm:$0xff]  }
 0x10f   :  { %1432 = vmatpush1.bf16.msra.mxu0 %v6898_v55  ;;  %1561 = vmatpush1.bf16.msra.mxu1 %v6901_v56  ;;  %v7002_v55 = vld [vmem:[#allocation5 + $0x24c] ss:$24 sps:$4 sm:$0xff]   ;;  %v6997_v56 = vld [vmem:[#allocation5 + $0x240] ss:$24 sps:$4 sm:$0xff]  }
 0x110   :  { %1433 = vmatprep.subr.bf16.mxu0 %v6906_v57  ;;  %1562 = vmatprep.subr.bf16.mxu1 %v6909_v58  ;;  %v7000_v57 = vld [vmem:[#allocation5 + $0x248] ss:$24 sps:$4 sm:$0xff]   ;;  %v7005_v58 = vld [vmem:[#allocation5 + $0x274] ss:$24 sps:$4 sm:$0xff]  }
 0x113   :  { %1434 = vmatpush1.bf16.msra.mxu0 %v6904_v59  ;;  %1563 = vmatpush1.bf16.msra.mxu1 %v6907_v60  ;;  %v7008_v59 = vld [vmem:[#allocation5 + $0x27c] ss:$24 sps:$4 sm:$0xff]   ;;  %v7003_v60 = vld [vmem:[#allocation5 + $0x270] ss:$24 sps:$4 sm:$0xff]  }
 0x114   :  { %1435 = vmatprep.subr.bf16.mxu0 %v6912_v61  ;;  %1564 = vmatprep.subr.bf16.mxu1 %v6915_v62  ;;  %v7006_v61 = vld [vmem:[#allocation5 + $0x278] ss:$24 sps:$4 sm:$0xff]   ;;  %v7011_v62 = vld [vmem:[#allocation5 + $0x2a4] ss:$24 sps:$4 sm:$0xff]  }
 0x117   :  { %1436 = vmatpush1.bf16.msra.mxu0 %v6910_v63  ;;  %1565 = vmatpush1.bf16.msra.mxu1 %v6913_v0  ;;  %v7014_v63 = vld [vmem:[#allocation5 + $0x2ac] ss:$24 sps:$4 sm:$0xff]   ;;  %v7009_v0 = vld [vmem:[#allocation5 + $0x2a0] ss:$24 sps:$4 sm:$0xff]  }
 0x118   :  { %1437 = vmatprep.subr.bf16.mxu0 %v6918_v1  ;;  %1566 = vmatprep.subr.bf16.mxu1 %v6921_v2  ;;  %v7012_v1 = vld [vmem:[#allocation5 + $0x2a8] ss:$24 sps:$4 sm:$0xff]   ;;  %v7017_v2 = vld [vmem:[#allocation5 + $0x2d4] ss:$24 sps:$4 sm:$0xff]  }
 0x11b   :  { %1438 = vmatpush1.bf16.msra.mxu0 %v6916_v3  ;;  %1567 = vmatpush1.bf16.msra.mxu1 %v6919_v4  ;;  %v7020_v3 = vld [vmem:[#allocation5 + $0x2dc] ss:$24 sps:$4 sm:$0xff]   ;;  %v7015_v4 = vld [vmem:[#allocation5 + $0x2d0] ss:$24 sps:$4 sm:$0xff]  }
 0x11c   :  { %2775 = vmatprep.subr.bf16.mxu0 %v6927_v5  ;;  %2861 = vmatprep.subr.bf16.mxu1 %v6930_v6  ;;  %v7018_v5 = vld [vmem:[#allocation5 + $0x2d8] ss:$24 sps:$4 sm:$0xff]   ;;  %v7023_v6 = vld [vmem:[#allocation5 + $0x304] ss:$24 sps:$4 sm:$0xff]  }
 0x11e   :  { %1440 = vmatmul.mubr.bf16.vlgmr.msra.gmra.mrb[0].mxu0 %v6922_v7  ;;  %1569 = vmatmul.mubr.bf16.vlgmr.msra.gmra.mrb[0].mxu1 %v6922_v7  ;;  %v7026_v7 = vld [vmem:[#allocation5 + $0x30c] ss:$24 sps:$4 sm:$0xff]  }
 0x11f   :  { %2776 = vmatpush1.bf16.msra.mxu0 %v6925_v8  ;;  %2862 = vmatpush1.bf16.msra.mxu1 %v6928_v9  ;;  %v311_v8 = vlaneseq }
 0x120   :  { %2777 = vmatprep.subr.bf16.mxu0 %v6933_v10  ;;  %2863 = vmatprep.subr.bf16.mxu1 %v6936_v11 }
 0x121   :  { %v8006_v9 = vshrl.u32 %v311_v8, 7  ;;  %v7060_v8 = vld [vmem:[#allocation5 + $0x428] ss:$24 sps:$4 sm:$0xff]  }
 0x123   :  { %2778 = vmatpush1.bf16.msra.mxu0 %v6931_v12  ;;  %2864 = vmatpush1.bf16.msra.mxu1 %v6934_v13  ;;  %v8009_v10 = vsub.s32 0, %v8006_v9  ;;  %v8012_v11 = vsub.s32 2, %v8006_v9  ;;  %v309_v12 = vld [vmem:[%s8121_s2] sm:$0xf]  ;;  %v8018_v13 = vsub.s32 1, %v8006_v9 }
 0x124   :  { %2779 = vmatprep.subr.bf16.mxu0 %v6939_v14  ;;  %2865 = vmatprep.subr.bf16.mxu1 %v6942_v15  ;;  %v8021_v14 = vsub.s32 3, %v8006_v9 }
 0x125   :  { %v314_v15 = vrot.slane %v309_v12, %v8009_v10 }
 0x127   :  { %2780 = vmatpush1.bf16.msra.mxu0 %v6937_v16  ;;  %2866 = vmatpush1.bf16.msra.mxu1 %v6940_v17  ;;  %v322_v16 = vrot.slane %v309_v12, %v8012_v11  ;;  %v318_v17 = vrot.slane %v309_v12, %v8018_v13 }
 0x128   :  { %2781 = vmatprep.subr.bf16.mxu0 %v6945_v18  ;;  %2867 = vmatprep.subr.bf16.mxu1 %v6948_v19  ;;  %v326_v18 = vrot.slane %v309_v12, %v8021_v14  ;;  %v7065_v12 = vld [vmem:[#allocation5 + $0x454] ss:$24 sps:$4 sm:$0xff]  }
 0x12b   :  { %2782 = vmatpush1.bf16.msra.mxu0 %v6943_v20  ;;  %2868 = vmatpush1.bf16.msra.mxu1 %v6946_v21 }
 0x12c   :  { %2783 = vmatprep.subr.bf16.mxu0 %v6951_v22  ;;  %2869 = vmatprep.subr.bf16.mxu1 %v6954_v23 }
 0x12f   :  { %2784 = vmatpush1.bf16.msra.mxu0 %v6949_v24  ;;  %2870 = vmatpush1.bf16.msra.mxu1 %v6952_v25 }
 0x130   :  { %2785 = vmatprep.subr.bf16.mxu0 %v6957_v26  ;;  %2871 = vmatprep.subr.bf16.mxu1 %v6960_v27 }
 0x133   :  { %2786 = vmatpush1.bf16.msra.mxu0 %v6955_v28  ;;  %2872 = vmatpush1.bf16.msra.mxu1 %v6958_v29 }
 0x134   :  { %2787 = vmatprep.subr.bf16.mxu0 %v6963_v30  ;;  %2873 = vmatprep.subr.bf16.mxu1 %v6966_v31 }
 0x137   :  { %2788 = vmatpush1.bf16.msra.mxu0 %v6961_v32  ;;  %2874 = vmatpush1.bf16.msra.mxu1 %v6964_v33 }
 0x138   :  { %2789 = vmatprep.subr.bf16.mxu0 %v6969_v34  ;;  %2875 = vmatprep.subr.bf16.mxu1 %v6972_v35 }
 0x13b   :  { %2790 = vmatpush1.bf16.msra.mxu0 %v6967_v36  ;;  %2876 = vmatpush1.bf16.msra.mxu1 %v6970_v37 }
 0x13c   :  { %2791 = vmatprep.subr.bf16.mxu0 %v6975_v38  ;;  %2877 = vmatprep.subr.bf16.mxu1 %v6978_v39 }
 0x13f   :  { %2792 = vmatpush1.bf16.msra.mxu0 %v6973_v40  ;;  %2878 = vmatpush1.bf16.msra.mxu1 %v6976_v41 }
 0x140   :  { %2793 = vmatprep.subr.bf16.mxu0 %v6981_v42  ;;  %2879 = vmatprep.subr.bf16.mxu1 %v6984_v43 }
 0x143   :  { %2794 = vmatpush1.bf16.msra.mxu0 %v6979_v44  ;;  %2880 = vmatpush1.bf16.msra.mxu1 %v6982_v45 }
 0x144   :  { %2795 = vmatprep.subr.bf16.mxu0 %v6987_v46  ;;  %2881 = vmatprep.subr.bf16.mxu1 %v6990_v47  ;;  %v7021_v47 = vld [vmem:[#allocation5 + $0x300] ss:$24 sps:$4 sm:$0xff]  }
 0x147   :  { %2796 = vmatpush1.bf16.msra.mxu0 %v6985_v48  ;;  %2882 = vmatpush1.bf16.msra.mxu1 %v6988_v49  ;;  %v7024_v48 = vld [vmem:[#allocation5 + $0x308] ss:$24 sps:$4 sm:$0xff]   ;;  %v7029_v49 = vld [vmem:[#allocation5 + $0x334] ss:$24 sps:$4 sm:$0xff]  }
 0x148   :  { %2797 = vmatprep.subr.bf16.mxu0 %v6993_v50  ;;  %2883 = vmatprep.subr.bf16.mxu1 %v6996_v51  ;;  %v7032_v50 = vld [vmem:[#allocation5 + $0x33c] ss:$24 sps:$4 sm:$0xff]   ;;  %v7027_v51 = vld [vmem:[#allocation5 + $0x330] ss:$24 sps:$4 sm:$0xff]  }
 0x14b   :  { %2798 = vmatpush1.bf16.msra.mxu0 %v6991_v52  ;;  %2884 = vmatpush1.bf16.msra.mxu1 %v6994_v53  ;;  %v7030_v52 = vld [vmem:[#allocation5 + $0x338] ss:$24 sps:$4 sm:$0xff]   ;;  %v7035_v53 = vld [vmem:[#allocation5 + $0x364] ss:$24 sps:$4 sm:$0xff]  }
 0x14c   :  { %2799 = vmatprep.subr.bf16.mxu0 %v6999_v54  ;;  %2885 = vmatprep.subr.bf16.mxu1 %v7002_v55  ;;  %v7038_v54 = vld [vmem:[#allocation5 + $0x36c] ss:$24 sps:$4 sm:$0xff]   ;;  %v7033_v55 = vld [vmem:[#allocation5 + $0x360] ss:$24 sps:$4 sm:$0xff]  }
 0x14f   :  { %2800 = vmatpush1.bf16.msra.mxu0 %v6997_v56  ;;  %2886 = vmatpush1.bf16.msra.mxu1 %v7000_v57  ;;  %v7036_v56 = vld [vmem:[#allocation5 + $0x368] ss:$24 sps:$4 sm:$0xff]   ;;  %v7041_v57 = vld [vmem:[#allocation5 + $0x394] ss:$24 sps:$4 sm:$0xff]  }
 0x150   :  { %2801 = vmatprep.subr.bf16.mxu0 %v7005_v58  ;;  %2887 = vmatprep.subr.bf16.mxu1 %v7008_v59  ;;  %v7044_v58 = vld [vmem:[#allocation5 + $0x39c] ss:$24 sps:$4 sm:$0xff]   ;;  %v7039_v59 = vld [vmem:[#allocation5 + $0x390] ss:$24 sps:$4 sm:$0xff]  }
 0x153   :  { %2802 = vmatpush1.bf16.msra.mxu0 %v7003_v60  ;;  %2888 = vmatpush1.bf16.msra.mxu1 %v7006_v61  ;;  %v7042_v60 = vld [vmem:[#allocation5 + $0x398] ss:$24 sps:$4 sm:$0xff]   ;;  %v7047_v61 = vld [vmem:[#allocation5 + $0x3c4] ss:$24 sps:$4 sm:$0xff]  }
 0x154   :  { %2803 = vmatprep.subr.bf16.mxu0 %v7011_v62  ;;  %2889 = vmatprep.subr.bf16.mxu1 %v7014_v63  ;;  %v7050_v62 = vld [vmem:[#allocation5 + $0x3cc] ss:$24 sps:$4 sm:$0xff]   ;;  %v7045_v63 = vld [vmem:[#allocation5 + $0x3c0] ss:$24 sps:$4 sm:$0xff]  }
 0x157   :  { %2804 = vmatpush1.bf16.msra.mxu0 %v7009_v0  ;;  %2890 = vmatpush1.bf16.msra.mxu1 %v7012_v1  ;;  %v7048_v0 = vld [vmem:[#allocation5 + $0x3c8] ss:$24 sps:$4 sm:$0xff]   ;;  %v7053_v1 = vld [vmem:[#allocation5 + $0x3f4] ss:$24 sps:$4 sm:$0xff]  }
 0x158   :  { %2805 = vmatprep.subr.bf16.mxu0 %v7017_v2  ;;  %2891 = vmatprep.subr.bf16.mxu1 %v7020_v3  ;;  %v7056_v2 = vld [vmem:[#allocation5 + $0x3fc] ss:$24 sps:$4 sm:$0xff]   ;;  %v7051_v3 = vld [vmem:[#allocation5 + $0x3f0] ss:$24 sps:$4 sm:$0xff]  }
 0x15b   :  { %2806 = vmatpush1.bf16.msra.mxu0 %v7015_v4  ;;  %2892 = vmatpush1.bf16.msra.mxu1 %v7018_v5  ;;  %v7054_v4 = vld [vmem:[#allocation5 + $0x3f8] ss:$24 sps:$4 sm:$0xff]   ;;  %v7059_v5 = vld [vmem:[#allocation5 + $0x424] ss:$24 sps:$4 sm:$0xff]  }
 0x15c   :  { %2818 = vmatprep.subr.bf16.mxu0 %v7023_v6  ;;  %2904 = vmatprep.subr.bf16.mxu1 %v7026_v7  ;;  %v7062_v6 = vld [vmem:[#allocation5 + $0x42c] ss:$24 sps:$4 sm:$0xff]   ;;  %v7057_v7 = vld [vmem:[#allocation5 + $0x420] ss:$24 sps:$4 sm:$0xff]  }
 0x1f1   :  { %v1441_v19 = vpop.f32.mrb[0].mxu0  ;;  %v1570_v20 = vpop.f32.mrb[0].mxu1 }
 0x1f2   :  { %v6529_v21 = vadd.f32 %v1441_v19, %v314_v15  ;;  %v6533_v22 = vadd.f32 %v1570_v20, %v322_v16  ;;  %v1443_v23 = vpop.f32.mrb[1].mxu0  ;;  %v1572_v24 = vpop.f32.mrb[1].mxu1  ;;  %v7074_v19 = vld [vmem:[#allocation5 + $0x48c] ss:$24 sps:$4 sm:$0xff]   ;;  %v7069_v20 = vld [vmem:[#allocation5 + $0x480] ss:$24 sps:$4 sm:$0xff]  }
 0x1f3   :  { %v6530_v25 = vadd.f32 %v1443_v23, %v318_v17  ;;  %v6534_v26 = vadd.f32 %v1572_v24, %v326_v18  ;;  %v1445_v27 = vpop.f32.mrb[2].mxu0  ;;  %v1574_v28 = vpop.f32.mrb[2].mxu1  ;;  %v7080_v23 = vld [vmem:[#allocation5 + $0x4bc] ss:$24 sps:$4 sm:$0xff]   ;;  %v7075_v24 = vld [vmem:[#allocation5 + $0x4b0] ss:$24 sps:$4 sm:$0xff]  }
 0x1f4   :  { %v6531_v29 = vadd.f32 %v1445_v27, %v314_v15  ;;  %v6535_v30 = vadd.f32 %v1574_v28, %v322_v16  ;;  %v1447_v31 = vpop.f32.mrb[3].mxu0  ;;  %v1576_v32 = vpop.f32.mrb[3].mxu1  ;;  %v1579_v35 = vmax.f32 %v6529_v21, 0.0  ;;  %v1581_v36 = vmax.f32 %v6533_v22, 0.0  ;;  %v7068_v15 = vld [vmem:[#allocation5 + $0x45c] ss:$24 sps:$4 sm:$0xff]  }
 0x1f5   :  { %v6532_v33 = vadd.f32 %v1447_v31, %v318_v17  ;;  %v6536_v34 = vadd.f32 %v1576_v32, %v326_v18  ;;  %v1580_v39 = vmax.f32 %v6530_v25, 0.0  ;;  %v1582_v40 = vmax.f32 %v6534_v26, 0.0  ;;  %v7063_v16 = vld [vmem:[#allocation5 + $0x450] ss:$24 sps:$4 sm:$0xff]   ;;  %v7071_v18 = vld [vmem:[#allocation5 + $0x484] ss:$24 sps:$4 sm:$0xff]  }
 0x1f6   :  { %v1583_v37 = vmax.f32 %v6531_v29, 0.0  ;;  %v1585_v38 = vmax.f32 %v6535_v30, 0.0  ;;  %v7066_v17 = vld [vmem:[#allocation5 + $0x458] ss:$24 sps:$4 sm:$0xff]   ;;  %v7072_v21 = vld [vmem:[#allocation5 + $0x488] ss:$24 sps:$4 sm:$0xff]  }
 0x1f7   :  { %v1584_v41 = vmax.f32 %v6532_v33, 0.0  ;;  %v1586_v42 = vmax.f32 %v6536_v34, 0.0  ;;  %v7077_v22 = vld [vmem:[#allocation5 + $0x4b4] ss:$24 sps:$4 sm:$0xff]   ;;  %v7078_v25 = vld [vmem:[#allocation5 + $0x4b8] ss:$24 sps:$4 sm:$0xff]  }
 0x1f8   :  { %v8027_v43 = vpack.c.bf16 %v1583_v37, %v1579_v35  ;;  %v8029_v44 = vpack.c.bf16 %v1585_v38, %v1581_v36  ;;  %v7083_v26 = vld [vmem:[#allocation5 + $0x4e4] ss:$24 sps:$4 sm:$0xff]   ;;  %v7081_v28 = vld [vmem:[#allocation5 + $0x4e0] ss:$24 sps:$4 sm:$0xff]   ;;  %v7089_v30 = vld [vmem:[#allocation5 + $0x514] ss:$24 sps:$4 sm:$0xff]  }
 0x1f9   :  { %v8031_v45 = vpack.c.bf16 %v1584_v41, %v1580_v39  ;;  %v8033_v46 = vpack.c.bf16 %v1586_v42, %v1582_v40  ;;  %v7086_v27 = vld [vmem:[#allocation5 + $0x4ec] ss:$24 sps:$4 sm:$0xff]   ;;  %v7084_v29 = vld [vmem:[#allocation5 + $0x4e8] ss:$24 sps:$4 sm:$0xff]   ;;  %v7092_v31 = vld [vmem:[#allocation5 + $0x51c] ss:$24 sps:$4 sm:$0xff]  }
 0x1fa   :  { %v7087_v32 = vld [vmem:[#allocation5 + $0x510] ss:$24 sps:$4 sm:$0xff]   ;;  %v7095_v34 = vld [vmem:[#allocation5 + $0x544] ss:$24 sps:$4 sm:$0xff]   ;;  %v7093_v36 = vld [vmem:[#allocation5 + $0x540] ss:$24 sps:$4 sm:$0xff]  }
 0x1fb   :  { %2807 = vmatprep.mubr.bf16.mxu0 %v8031_v45  ;;  %2893 = vmatprep.mubr.bf16.mxu1 %v8031_v45  ;;  %v7090_v33 = vld [vmem:[#allocation5 + $0x518] ss:$24 sps:$4 sm:$0xff]   ;;  %v7098_v35 = vld [vmem:[#allocation5 + $0x54c] ss:$24 sps:$4 sm:$0xff]   ;;  %v7096_v37 = vld [vmem:[#allocation5 + $0x548] ss:$24 sps:$4 sm:$0xff]  }
 0x1fc   :  { %2808 = vmatmul.mubr.bf16.vlgmr.msra.gmra.mrb[4].mxu0 %v8027_v43  ;;  %2894 = vmatmul.mubr.bf16.vlgmr.msra.gmra.mrb[4].mxu1 %v8027_v43  ;;  %v7101_v38 = vld [vmem:[#allocation5 + $0x574] ss:$24 sps:$4 sm:$0xff]   ;;  %v7099_v40 = vld [vmem:[#allocation5 + $0x570] ss:$24 sps:$4 sm:$0xff]   ;;  %v7107_v42 = vld [vmem:[#allocation5 + $0x5a4] ss:$24 sps:$4 sm:$0xff]  }
 0x1fd   :  { %2819 = vmatpush1.bf16.msra.mxu0 %v7021_v47  ;;  %2905 = vmatpush1.bf16.msra.mxu1 %v7024_v48  ;;  %v7104_v39 = vld [vmem:[#allocation5 + $0x57c] ss:$24 sps:$4 sm:$0xff]   ;;  %v7102_v41 = vld [vmem:[#allocation5 + $0x578] ss:$24 sps:$4 sm:$0xff]   ;;  %v7110_v47 = vld [vmem:[#allocation5 + $0x5ac] ss:$24 sps:$4 sm:$0xff]  }
 0x1fe   :  { %2850 = vmatprep.mubr.bf16.mxu0 %v8033_v46  ;;  %2936 = vmatprep.mubr.bf16.mxu1 %v8033_v46  ;;  %v7105_v48 = vld [vmem:[#allocation5 + $0x5a0] ss:$24 sps:$4 sm:$0xff]  }
 0x1ff   :  { %2820 = vmatprep.subr.bf16.mxu0 %v7029_v49  ;;  %2906 = vmatprep.subr.bf16.mxu1 %v7032_v50  ;;  %v7108_v49 = vld [vmem:[#allocation5 + $0x5a8] ss:$24 sps:$4 sm:$0xff]   ;;  %v7113_v50 = vld [vmem:[#allocation5 + $0x5d4] ss:$24 sps:$4 sm:$0xff]  }
 0x201   :  { %2821 = vmatpush1.bf16.msra.mxu0 %v7027_v51  ;;  %2907 = vmatpush1.bf16.msra.mxu1 %v7030_v52  ;;  %v7116_v51 = vld [vmem:[#allocation5 + $0x5dc] ss:$24 sps:$4 sm:$0xff]   ;;  %v7111_v52 = vld [vmem:[#allocation5 + $0x5d0] ss:$24 sps:$4 sm:$0xff]  }
 0x202   :  { %2822 = vmatprep.subr.bf16.mxu0 %v7035_v53  ;;  %2908 = vmatprep.subr.bf16.mxu1 %v7038_v54  ;;  %v7114_v53 = vld [vmem:[#allocation5 + $0x5d8] ss:$24 sps:$4 sm:$0xff]   ;;  %v7119_v54 = vld [vmem:[#allocation5 + $0x14] ss:$24 sps:$4 sm:$0xff]  }
 0x205   :  { %2823 = vmatpush1.bf16.msra.mxu0 %v7033_v55  ;;  %2909 = vmatpush1.bf16.msra.mxu1 %v7036_v56  ;;  %v7117_v55 = vld [vmem:[#allocation5 + $0x10] ss:$24 sps:$4 sm:$0xff]   ;;  %v7122_v56 = vld [vmem:[#allocation5 + $0x44] ss:$24 sps:$4 sm:$0xff]  }
 0x206   :  { %2824 = vmatprep.subr.bf16.mxu0 %v7041_v57  ;;  %2910 = vmatprep.subr.bf16.mxu1 %v7044_v58  ;;  %v7213_v57 = vld [vmem:[#allocation7] ss:$16 sps:$4 sm:$0xff]   ;;  %v7215_v58 = vld [vmem:[#allocation7 + $0x4] ss:$16 sps:$4 sm:$0xff]  }
 0x209   :  { %2825 = vmatpush1.bf16.msra.mxu0 %v7039_v59  ;;  %2911 = vmatpush1.bf16.msra.mxu1 %v7042_v60  ;;  %v7120_v59 = vld [vmem:[#allocation5 + $0x40] ss:$24 sps:$4 sm:$0xff]   ;;  %v7221_v60 = vld [vmem:[#allocation7 + $0x24] ss:$16 sps:$4 sm:$0xff]  }
 0x20a   :  { %2826 = vmatprep.subr.bf16.mxu0 %v7047_v61  ;;  %2912 = vmatprep.subr.bf16.mxu1 %v7050_v62  ;;  %v7125_v61 = vld [vmem:[#allocation5 + $0x74] ss:$24 sps:$4 sm:$0xff]   ;;  %v7219_v62 = vld [vmem:[#allocation7 + $0x20] ss:$16 sps:$4 sm:$0xff]  }
 0x20d   :  { %2827 = vmatpush1.bf16.msra.mxu0 %v7045_v63  ;;  %2913 = vmatpush1.bf16.msra.mxu1 %v7048_v0  ;;  %v7123_v63 = vld [vmem:[#allocation5 + $0x70] ss:$24 sps:$4 sm:$0xff]   ;;  %v7227_v0 = vld [vmem:[#allocation7 + $0x44] ss:$16 sps:$4 sm:$0xff]  }
 0x20e   :  { %2828 = vmatprep.subr.bf16.mxu0 %v7053_v1  ;;  %2914 = vmatprep.subr.bf16.mxu1 %v7056_v2  ;;  %v7128_v1 = vld [vmem:[#allocation5 + $0xa4] ss:$24 sps:$4 sm:$0xff]   ;;  %v7225_v2 = vld [vmem:[#allocation7 + $0x40] ss:$16 sps:$4 sm:$0xff]  }
 0x211   :  { %2829 = vmatpush1.bf16.msra.mxu0 %v7051_v3  ;;  %2915 = vmatpush1.bf16.msra.mxu1 %v7054_v4  ;;  %v7126_v3 = vld [vmem:[#allocation5 + $0xa0] ss:$24 sps:$4 sm:$0xff]   ;;  %v7233_v4 = vld [vmem:[#allocation7 + $0x64] ss:$16 sps:$4 sm:$0xff]  }
 0x212   :  { %2830 = vmatprep.subr.bf16.mxu0 %v7059_v5  ;;  %2916 = vmatprep.subr.bf16.mxu1 %v7062_v6  ;;  %v7231_v5 = vld [vmem:[#allocation7 + $0x60] ss:$16 sps:$4 sm:$0xff]  }
 0x213   :  { %v7129_v6 = vld [vmem:[#allocation5 + $0xd0] ss:$24 sps:$4 sm:$0xff]  }
 0x215   :  { %2831 = vmatpush1.bf16.msra.mxu0 %v7057_v7  ;;  %2917 = vmatpush1.bf16.msra.mxu1 %v7060_v8  ;;  %v7239_v7 = vld [vmem:[#allocation7 + $0x84] ss:$16 sps:$4 sm:$0xff]  }
 0x216   :  { %2832 = vmatprep.subr.bf16.mxu0 %v7065_v12  ;;  %2918 = vmatprep.subr.bf16.mxu1 %v7068_v15  ;;  %v7134_v8 = vld [vmem:[#allocation5 + $0x104] ss:$24 sps:$4 sm:$0xff]   ;;  %v7237_v12 = vld [vmem:[#allocation7 + $0x80] ss:$16 sps:$4 sm:$0xff]  }
 0x217   :  { %v7132_v15 = vld [vmem:[#allocation5 + $0x100] ss:$24 sps:$4 sm:$0xff]  }
 0x219   :  { %2833 = vmatpush1.bf16.msra.mxu0 %v7063_v16  ;;  %2919 = vmatpush1.bf16.msra.mxu1 %v7066_v17  ;;  %v7245_v16 = vld [vmem:[#allocation7 + $0xa4] ss:$16 sps:$4 sm:$0xff]  }
 0x21a   :  { %2834 = vmatprep.subr.bf16.mxu0 %v7071_v18  ;;  %2920 = vmatprep.subr.bf16.mxu1 %v7074_v19  ;;  %v7137_v17 = vld [vmem:[#allocation5 + $0x134] ss:$24 sps:$4 sm:$0xff]   ;;  %v7243_v18 = vld [vmem:[#allocation7 + $0xa0] ss:$16 sps:$4 sm:$0xff]  }
 0x21b   :  { %v7135_v19 = vld [vmem:[#allocation5 + $0x130] ss:$24 sps:$4 sm:$0xff]  }
 0x21d   :  { %2835 = vmatpush1.bf16.msra.mxu0 %v7069_v20  ;;  %2921 = vmatpush1.bf16.msra.mxu1 %v7072_v21  ;;  %v7251_v20 = vld [vmem:[#allocation7 + $0xc4] ss:$16 sps:$4 sm:$0xff]  }
 0x21e   :  { %2836 = vmatprep.subr.bf16.mxu0 %v7077_v22  ;;  %2922 = vmatprep.subr.bf16.mxu1 %v7080_v23  ;;  %v7140_v21 = vld [vmem:[#allocation5 + $0x164] ss:$24 sps:$4 sm:$0xff]   ;;  %v7249_v22 = vld [vmem:[#allocation7 + $0xc0] ss:$16 sps:$4 sm:$0xff]  }
 0x21f   :  { %v7138_v23 = vld [vmem:[#allocation5 + $0x160] ss:$24 sps:$4 sm:$0xff]  }
 0x221   :  { %2837 = vmatpush1.bf16.msra.mxu0 %v7075_v24  ;;  %2923 = vmatpush1.bf16.msra.mxu1 %v7078_v25  ;;  %v7257_v24 = vld [vmem:[#allocation7 + $0xe4] ss:$16 sps:$4 sm:$0xff]  }
 0x222   :  { %2838 = vmatprep.subr.bf16.mxu0 %v7083_v26  ;;  %2924 = vmatprep.subr.bf16.mxu1 %v7086_v27  ;;  %v7143_v25 = vld [vmem:[#allocation5 + $0x194] ss:$24 sps:$4 sm:$0xff]   ;;  %v7255_v26 = vld [vmem:[#allocation7 + $0xe0] ss:$16 sps:$4 sm:$0xff]  }
 0x223   :  { %v7141_v27 = vld [vmem:[#allocation5 + $0x190] ss:$24 sps:$4 sm:$0xff]  }
 0x225   :  { %2839 = vmatpush1.bf16.msra.mxu0 %v7081_v28  ;;  %2925 = vmatpush1.bf16.msra.mxu1 %v7084_v29  ;;  %v7263_v28 = vld [vmem:[#allocation7 + $0x104] ss:$16 sps:$4 sm:$0xff]  }
 0x226   :  { %2840 = vmatprep.subr.bf16.mxu0 %v7089_v30  ;;  %2926 = vmatprep.subr.bf16.mxu1 %v7092_v31  ;;  %v7146_v29 = vld [vmem:[#allocation5 + $0x1c4] ss:$24 sps:$4 sm:$0xff]   ;;  %v7261_v30 = vld [vmem:[#allocation7 + $0x100] ss:$16 sps:$4 sm:$0xff]  }
 0x227   :  { %v7144_v31 = vld [vmem:[#allocation5 + $0x1c0] ss:$24 sps:$4 sm:$0xff]  }
 0x229   :  { %2841 = vmatpush1.bf16.msra.mxu0 %v7087_v32  ;;  %2927 = vmatpush1.bf16.msra.mxu1 %v7090_v33  ;;  %v7269_v32 = vld [vmem:[#allocation7 + $0x124] ss:$16 sps:$4 sm:$0xff]  }
 0x22a   :  { %2842 = vmatprep.subr.bf16.mxu0 %v7095_v34  ;;  %2928 = vmatprep.subr.bf16.mxu1 %v7098_v35  ;;  %v7149_v33 = vld [vmem:[#allocation5 + $0x1f4] ss:$24 sps:$4 sm:$0xff]   ;;  %v7267_v34 = vld [vmem:[#allocation7 + $0x120] ss:$16 sps:$4 sm:$0xff]  }
 0x22b   :  { %v7147_v35 = vld [vmem:[#allocation5 + $0x1f0] ss:$24 sps:$4 sm:$0xff]  }
 0x22d   :  { %2843 = vmatpush1.bf16.msra.mxu0 %v7093_v36  ;;  %2929 = vmatpush1.bf16.msra.mxu1 %v7096_v37  ;;  %v7275_v36 = vld [vmem:[#allocation7 + $0x144] ss:$16 sps:$4 sm:$0xff]  }
 0x22e   :  { %2844 = vmatprep.subr.bf16.mxu0 %v7101_v38  ;;  %2930 = vmatprep.subr.bf16.mxu1 %v7104_v39  ;;  %v7152_v37 = vld [vmem:[#allocation5 + $0x224] ss:$24 sps:$4 sm:$0xff]   ;;  %v7273_v38 = vld [vmem:[#allocation7 + $0x140] ss:$16 sps:$4 sm:$0xff]  }
 0x22f   :  { %v7150_v39 = vld [vmem:[#allocation5 + $0x220] ss:$24 sps:$4 sm:$0xff]  }
 0x231   :  { %2845 = vmatpush1.bf16.msra.mxu0 %v7099_v40  ;;  %2931 = vmatpush1.bf16.msra.mxu1 %v7102_v41  ;;  %v7281_v40 = vld [vmem:[#allocation7 + $0x164] ss:$16 sps:$4 sm:$0xff]  }
 0x232   :  { %2846 = vmatprep.subr.bf16.mxu0 %v7107_v42  ;;  %2932 = vmatprep.subr.bf16.mxu1 %v7110_v47  ;;  %v7155_v41 = vld [vmem:[#allocation5 + $0x254] ss:$24 sps:$4 sm:$0xff]   ;;  %v7279_v42 = vld [vmem:[#allocation7 + $0x160] ss:$16 sps:$4 sm:$0xff]  }
 0x233   :  { %v7153_v47 = vld [vmem:[#allocation5 + $0x250] ss:$24 sps:$4 sm:$0xff]  }
 0x235   :  { %2847 = vmatpush1.bf16.msra.mxu0 %v7105_v48  ;;  %2933 = vmatpush1.bf16.msra.mxu1 %v7108_v49  ;;  %v7287_v48 = vld [vmem:[#allocation7 + $0x184] ss:$16 sps:$4 sm:$0xff]  }
 0x236   :  { %2848 = vmatprep.subr.bf16.mxu0 %v7113_v50  ;;  %2934 = vmatprep.subr.bf16.mxu1 %v7116_v51  ;;  %v7158_v49 = vld [vmem:[#allocation5 + $0x284] ss:$24 sps:$4 sm:$0xff]   ;;  %v7285_v50 = vld [vmem:[#allocation7 + $0x180] ss:$16 sps:$4 sm:$0xff]  }
 0x237   :  { %v7156_v51 = vld [vmem:[#allocation5 + $0x280] ss:$24 sps:$4 sm:$0xff]  }
 0x239   :  { %2849 = vmatpush1.bf16.msra.mxu0 %v7111_v52  ;;  %2935 = vmatpush1.bf16.msra.mxu1 %v7114_v53  ;;  %v7293_v52 = vld [vmem:[#allocation7 + $0x1a4] ss:$16 sps:$4 sm:$0xff]  }
 0x23a   :  { %2947 = vmatprep.subr.bf16.mxu0 %v7119_v54  ;;  %4261 = vmatprep.subr.bf16.mxu1 %v7215_v58  ;;  %v7161_v53 = vld [vmem:[#allocation5 + $0x2b4] ss:$24 sps:$4 sm:$0xff]   ;;  %v7291_v54 = vld [vmem:[#allocation7 + $0x1a0] ss:$16 sps:$4 sm:$0xff]  }
 0x23b   :  { %v7167_v58 = vld [vmem:[#allocation5 + $0x314] ss:$24 sps:$4 sm:$0xff]  }
 0x23c   :  { %2851 = vmatmul.mubr.bf16.vlgmr.msra.gmra.mrb[4].mxu0 %v8029_v44  ;;  %2937 = vmatmul.mubr.bf16.vlgmr.msra.gmra.mrb[4].mxu1 %v8029_v44 }
 0x23d   :  { %2948 = vmatpush1.bf16.msra.mxu0 %v7117_v55  ;;  %2979 = vmatprep.mubr.bf16.mxu0 %v8031_v45  ;;  %v7131_v45 = vld [vmem:[#allocation5 + $0xd4] ss:$24 sps:$4 sm:$0xff]   ;;  %v7159_v55 = vld [vmem:[#allocation5 + $0x2b0] ss:$24 sps:$4 sm:$0xff]  }
 0x23e   :  { %2949 = vmatprep.subr.bf16.mxu0 %v7122_v56  ;;  %4262 = vmatpush1.bf16.msra.mxu1 %v7213_v57  ;;  %v7164_v56 = vld [vmem:[#allocation5 + $0x2e4] ss:$24 sps:$4 sm:$0xff]   ;;  %v7162_v57 = vld [vmem:[#allocation5 + $0x2e0] ss:$24 sps:$4 sm:$0xff]  }
 0x23f   :  { %4263 = vmatprep.subr.bf16.mxu1 %v7221_v60  ;;  %v7170_v60 = vld [vmem:[#allocation5 + $0x344] ss:$24 sps:$4 sm:$0xff]  }
 0x241   :  { %2950 = vmatpush1.bf16.msra.mxu0 %v7120_v59  ;;  %v7165_v59 = vld [vmem:[#allocation5 + $0x310] ss:$24 sps:$4 sm:$0xff]  }
 0x242   :  { %2951 = vmatprep.subr.bf16.mxu0 %v7125_v61  ;;  %4264 = vmatpush1.bf16.msra.mxu1 %v7219_v62  ;;  %v7168_v61 = vld [vmem:[#allocation5 + $0x340] ss:$24 sps:$4 sm:$0xff]   ;;  %v7173_v62 = vld [vmem:[#allocation5 + $0x374] ss:$24 sps:$4 sm:$0xff]  }
 0x243   :  { %4265 = vmatprep.subr.bf16.mxu1 %v7227_v0  ;;  %v7176_v0 = vld [vmem:[#allocation5 + $0x3a4] ss:$24 sps:$4 sm:$0xff]  }
 0x245   :  { %2952 = vmatpush1.bf16.msra.mxu0 %v7123_v63  ;;  %v7171_v63 = vld [vmem:[#allocation5 + $0x370] ss:$24 sps:$4 sm:$0xff]  }
 0x246   :  { %2953 = vmatprep.subr.bf16.mxu0 %v7128_v1  ;;  %4266 = vmatpush1.bf16.msra.mxu1 %v7225_v2  ;;  %v7174_v1 = vld [vmem:[#allocation5 + $0x3a0] ss:$24 sps:$4 sm:$0xff]   ;;  %v7179_v2 = vld [vmem:[#allocation5 + $0x3d4] ss:$24 sps:$4 sm:$0xff]  }
 0x247   :  { %4267 = vmatprep.subr.bf16.mxu1 %v7233_v4  ;;  %v7182_v4 = vld [vmem:[#allocation5 + $0x404] ss:$24 sps:$4 sm:$0xff]  }
 0x249   :  { %2954 = vmatpush1.bf16.msra.mxu0 %v7126_v3  ;;  %v7177_v3 = vld [vmem:[#allocation5 + $0x3d0] ss:$24 sps:$4 sm:$0xff]  }
 0x24a   :  { %2955 = vmatprep.subr.bf16.mxu0 %v7131_v45  ;;  %4268 = vmatpush1.bf16.msra.mxu1 %v7231_v5  ;;  %v7185_v45 = vld [vmem:[#allocation5 + $0x434] ss:$24 sps:$4 sm:$0xff]   ;;  %v7297_v5 = vld [vmem:[#allocation7 + $0x1c0] ss:$16 sps:$4 sm:$0xff]  }
 0x24b   :  { %4269 = vmatprep.subr.bf16.mxu1 %v7239_v7  ;;  %v7188_v7 = vld [vmem:[#allocation5 + $0x464] ss:$24 sps:$4 sm:$0xff]  }
 0x24d   :  { %2956 = vmatpush1.bf16.msra.mxu0 %v7129_v6  ;;  %v7183_v6 = vld [vmem:[#allocation5 + $0x430] ss:$24 sps:$4 sm:$0xff]  }
 0x24e   :  { %2957 = vmatprep.subr.bf16.mxu0 %v7134_v8  ;;  %4270 = vmatpush1.bf16.msra.mxu1 %v7237_v12  ;;  %v7305_v8 = vld [vmem:[#allocation7 + $0x1e4] ss:$16 sps:$4 sm:$0xff]   ;;  %v7303_v12 = vld [vmem:[#allocation7 + $0x1e0] ss:$16 sps:$4 sm:$0xff]  }
 0x24f   :  { %4271 = vmatprep.subr.bf16.mxu1 %v7245_v16  ;;  %v7191_v16 = vld [vmem:[#allocation5 + $0x494] ss:$24 sps:$4 sm:$0xff]  }
 0x251   :  { %2958 = vmatpush1.bf16.msra.mxu0 %v7132_v15  ;;  %v7186_v15 = vld [vmem:[#allocation5 + $0x460] ss:$24 sps:$4 sm:$0xff]  }
 0x252   :  { %2959 = vmatprep.subr.bf16.mxu0 %v7137_v17  ;;  %4272 = vmatpush1.bf16.msra.mxu1 %v7243_v18  ;;  %v7311_v17 = vld [vmem:[#allocation7 + $0x204] ss:$16 sps:$4 sm:$0xff]   ;;  %v7189_v18 = vld [vmem:[#allocation5 + $0x490] ss:$24 sps:$4 sm:$0xff]  }
 0x253   :  { %4273 = vmatprep.subr.bf16.mxu1 %v7251_v20  ;;  %v7192_v20 = vld [vmem:[#allocation5 + $0x4c0] ss:$24 sps:$4 sm:$0xff]  }
 0x255   :  { %2960 = vmatpush1.bf16.msra.mxu0 %v7135_v19  ;;  %v7194_v19 = vld [vmem:[#allocation5 + $0x4c4] ss:$24 sps:$4 sm:$0xff]  }
 0x256   :  { %2961 = vmatprep.subr.bf16.mxu0 %v7140_v21  ;;  %4274 = vmatpush1.bf16.msra.mxu1 %v7249_v22  ;;  %v7197_v21 = vld [vmem:[#allocation5 + $0x4f4] ss:$24 sps:$4 sm:$0xff]   ;;  %v7195_v22 = vld [vmem:[#allocation5 + $0x4f0] ss:$24 sps:$4 sm:$0xff]  }
 0x257   :  { %4275 = vmatprep.subr.bf16.mxu1 %v7257_v24  ;;  %v7198_v24 = vld [vmem:[#allocation5 + $0x520] ss:$24 sps:$4 sm:$0xff]  }
 0x259   :  { %2962 = vmatpush1.bf16.msra.mxu0 %v7138_v23  ;;  %v7200_v23 = vld [vmem:[#allocation5 + $0x524] ss:$24 sps:$4 sm:$0xff]  }
 0x25a   :  { %2963 = vmatprep.subr.bf16.mxu0 %v7143_v25  ;;  %4276 = vmatpush1.bf16.msra.mxu1 %v7255_v26  ;;  %v7203_v25 = vld [vmem:[#allocation5 + $0x554] ss:$24 sps:$4 sm:$0xff]   ;;  %v7201_v26 = vld [vmem:[#allocation5 + $0x550] ss:$24 sps:$4 sm:$0xff]  }
 0x25b   :  { %4277 = vmatprep.subr.bf16.mxu1 %v7263_v28  ;;  %v7204_v28 = vld [vmem:[#allocation5 + $0x580] ss:$24 sps:$4 sm:$0xff]  }
 0x25d   :  { %2964 = vmatpush1.bf16.msra.mxu0 %v7141_v27  ;;  %v7206_v27 = vld [vmem:[#allocation5 + $0x584] ss:$24 sps:$4 sm:$0xff]  }
 0x25e   :  { %2965 = vmatprep.subr.bf16.mxu0 %v7146_v29  ;;  %4278 = vmatpush1.bf16.msra.mxu1 %v7261_v30  ;;  %v7209_v29 = vld [vmem:[#allocation5 + $0x5b4] ss:$24 sps:$4 sm:$0xff]   ;;  %v7207_v30 = vld [vmem:[#allocation5 + $0x5b0] ss:$24 sps:$4 sm:$0xff]  }
 0x25f   :  { %4279 = vmatprep.subr.bf16.mxu1 %v7269_v32  ;;  %v7210_v32 = vld [vmem:[#allocation5 + $0x5e0] ss:$24 sps:$4 sm:$0xff]  }
 0x261   :  { %2966 = vmatpush1.bf16.msra.mxu0 %v7144_v31  ;;  %v7212_v31 = vld [vmem:[#allocation5 + $0x5e4] ss:$24 sps:$4 sm:$0xff]  }
 0x262   :  { %2967 = vmatprep.subr.bf16.mxu0 %v7149_v33  ;;  %4280 = vmatpush1.bf16.msra.mxu1 %v7267_v34  ;;  %v7218_v33 = vld [vmem:[#allocation7 + $0xc] ss:$16 sps:$4 sm:$0xff]   ;;  %v7216_v34 = vld [vmem:[#allocation7 + $0x8] ss:$16 sps:$4 sm:$0xff]  }
 0x263   :  { %4281 = vmatprep.subr.bf16.mxu1 %v7275_v36  ;;  %v7222_v36 = vld [vmem:[#allocation7 + $0x28] ss:$16 sps:$4 sm:$0xff]  }
 0x265   :  { %2968 = vmatpush1.bf16.msra.mxu0 %v7147_v35  ;;  %v7224_v35 = vld [vmem:[#allocation7 + $0x2c] ss:$16 sps:$4 sm:$0xff]  }
 0x266   :  { %2969 = vmatprep.subr.bf16.mxu0 %v7152_v37  ;;  %4282 = vmatpush1.bf16.msra.mxu1 %v7273_v38  ;;  %v7230_v37 = vld [vmem:[#allocation7 + $0x4c] ss:$16 sps:$4 sm:$0xff]   ;;  %v7228_v38 = vld [vmem:[#allocation7 + $0x48] ss:$16 sps:$4 sm:$0xff]  }
 0x267   :  { %4283 = vmatprep.subr.bf16.mxu1 %v7281_v40  ;;  %v7234_v40 = vld [vmem:[#allocation7 + $0x68] ss:$16 sps:$4 sm:$0xff]  }
 0x269   :  { %2970 = vmatpush1.bf16.msra.mxu0 %v7150_v39  ;;  %v7236_v39 = vld [vmem:[#allocation7 + $0x6c] ss:$16 sps:$4 sm:$0xff]  }
 0x26a   :  { %2971 = vmatprep.subr.bf16.mxu0 %v7155_v41  ;;  %4284 = vmatpush1.bf16.msra.mxu1 %v7279_v42  ;;  %v7242_v41 = vld [vmem:[#allocation7 + $0x8c] ss:$16 sps:$4 sm:$0xff]   ;;  %v7240_v42 = vld [vmem:[#allocation7 + $0x88] ss:$16 sps:$4 sm:$0xff]  }
 0x26b   :  { %4285 = vmatprep.subr.bf16.mxu1 %v7287_v48  ;;  %v7246_v48 = vld [vmem:[#allocation7 + $0xa8] ss:$16 sps:$4 sm:$0xff]  }
 0x26d   :  { %2972 = vmatpush1.bf16.msra.mxu0 %v7153_v47  ;;  %v7248_v47 = vld [vmem:[#allocation7 + $0xac] ss:$16 sps:$4 sm:$0xff]  }
 0x26e   :  { %2973 = vmatprep.subr.bf16.mxu0 %v7158_v49  ;;  %4286 = vmatpush1.bf16.msra.mxu1 %v7285_v50  ;;  %v7252_v49 = vld [vmem:[#allocation7 + $0xc8] ss:$16 sps:$4 sm:$0xff]   ;;  %v7260_v50 = vld [vmem:[#allocation7 + $0xec] ss:$16 sps:$4 sm:$0xff]  }
 0x26f   :  { %4287 = vmatprep.subr.bf16.mxu1 %v7293_v52  ;;  %v7266_v52 = vld [vmem:[#allocation7 + $0x10c] ss:$16 sps:$4 sm:$0xff]  }
 0x271   :  { %2974 = vmatpush1.bf16.msra.mxu0 %v7156_v51  ;;  %v7258_v51 = vld [vmem:[#allocation7 + $0xe8] ss:$16 sps:$4 sm:$0xff]  }
 0x272   :  { %2975 = vmatprep.subr.bf16.mxu0 %v7161_v53  ;;  %4288 = vmatpush1.bf16.msra.mxu1 %v7291_v54  ;;  %v7264_v53 = vld [vmem:[#allocation7 + $0x108] ss:$16 sps:$4 sm:$0xff]   ;;  %v7272_v54 = vld [vmem:[#allocation7 + $0x12c] ss:$16 sps:$4 sm:$0xff]  }
 0x275   :  { %2976 = vmatpush1.bf16.msra.mxu0 %v7159_v55  ;;  %v7270_v55 = vld [vmem:[#allocation7 + $0x128] ss:$16 sps:$4 sm:$0xff]  }
 0x276   :  { %2977 = vmatprep.subr.bf16.mxu0 %v7164_v56  ;;  %v7278_v56 = vld [vmem:[#allocation7 + $0x14c] ss:$16 sps:$4 sm:$0xff]  }
 0x279   :  { %2978 = vmatpush1.bf16.msra.mxu0 %v7162_v57  ;;  %v7276_v57 = vld [vmem:[#allocation7 + $0x148] ss:$16 sps:$4 sm:$0xff]  }
 0x27a   :  { %2990 = vmatprep.subr.bf16.mxu0 %v7167_v58  ;;  %v7284_v58 = vld [vmem:[#allocation7 + $0x16c] ss:$16 sps:$4 sm:$0xff]  }
 0x27c   :  { %2980 = vmatmul.mubr.bf16.vlgmr.msra.gmra.mrb[8].mxu0 %v8027_v43  ;;  %v7180_v43 = vld [vmem:[#allocation5 + $0x400] ss:$24 sps:$4 sm:$0xff]  }
 0x27d   :  { %2991 = vmatpush1.bf16.msra.mxu0 %v7165_v59  ;;  %3022 = vmatprep.mubr.bf16.mxu0 %v8033_v46  ;;  %v7299_v46 = vld [vmem:[#allocation7 + $0x1c4] ss:$16 sps:$4 sm:$0xff]   ;;  %v7282_v59 = vld [vmem:[#allocation7 + $0x168] ss:$16 sps:$4 sm:$0xff]  }
 0x27e   :  { %2992 = vmatprep.subr.bf16.mxu0 %v7170_v60  ;;  %4289 = vmatprep.subr.bf16.mxu1 %v7299_v46  ;;  %v7290_v60 = vld [vmem:[#allocation7 + $0x18c] ss:$16 sps:$4 sm:$0xff]  }
 0x27f   :  { %4290 = vmatpush1.bf16.msra.mxu1 %v7297_v5 }
 0x280   :  { %4291 = vmatprep.subr.bf16.mxu1 %v7305_v8 }
 0x281   :  { %2993 = vmatpush1.bf16.msra.mxu0 %v7168_v61  ;;  %v7288_v61 = vld [vmem:[#allocation7 + $0x188] ss:$16 sps:$4 sm:$0xff]  }
 0x282   :  { %2994 = vmatprep.subr.bf16.mxu0 %v7173_v62  ;;  %v7296_v62 = vld [vmem:[#allocation7 + $0x1ac] ss:$16 sps:$4 sm:$0xff]  }
 0x283   :  { %4292 = vmatpush1.bf16.msra.mxu1 %v7303_v12 }
 0x284   :  { %4304 = vmatprep.subr.bf16.mxu1 %v7311_v17 }
 0x285   :  { %2995 = vmatpush1.bf16.msra.mxu0 %v7171_v63  ;;  %v7294_v63 = vld [vmem:[#allocation7 + $0x1a8] ss:$16 sps:$4 sm:$0xff]  }
 0x286   :  { %2996 = vmatprep.subr.bf16.mxu0 %v7176_v0  ;;  %v7302_v0 = vld [vmem:[#allocation7 + $0x1cc] ss:$16 sps:$4 sm:$0xff]  }
 0x289   :  { %2997 = vmatpush1.bf16.msra.mxu0 %v7174_v1  ;;  %v7300_v1 = vld [vmem:[#allocation7 + $0x1c8] ss:$16 sps:$4 sm:$0xff]  }
 0x28a   :  { %2998 = vmatprep.subr.bf16.mxu0 %v7179_v2  ;;  %v7308_v2 = vld [vmem:[#allocation7 + $0x1ec] ss:$16 sps:$4 sm:$0xff]  }
 0x28d   :  { %2999 = vmatpush1.bf16.msra.mxu0 %v7177_v3  ;;  %v7306_v3 = vld [vmem:[#allocation7 + $0x1e8] ss:$16 sps:$4 sm:$0xff]  }
 0x28e   :  { %3000 = vmatprep.subr.bf16.mxu0 %v7182_v4  ;;  %v7314_v4 = vld [vmem:[#allocation7 + $0x20c] ss:$16 sps:$4 sm:$0xff]  }
 0x291   :  { %3001 = vmatpush1.bf16.msra.mxu0 %v7180_v43  ;;  %v8050_v43 = vld [vmem:[%s8123_s4] sm:$0x3f] }
 0x292   :  { %3002 = vmatprep.subr.bf16.mxu0 %v7185_v45  ;;  %v1788_v45 = vrot.slane %v8050_v43, %v8009_v10  ;;  %v1796_v46 = vrot.slane %v8050_v43, %v8012_v11  ;;  %v1792_v5 = vrot.slane %v8050_v43, %v8018_v13 }
 0x295   :  { %3003 = vmatpush1.bf16.msra.mxu0 %v7183_v6  ;;  %v1800_v6 = vrot.slane %v8050_v43, %v8021_v14 }
 0x296   :  { %3004 = vmatprep.subr.bf16.mxu0 %v7188_v7 }
 0x299   :  { %3005 = vmatpush1.bf16.msra.mxu0 %v7186_v15 }
 0x29a   :  { %3006 = vmatprep.subr.bf16.mxu0 %v7191_v16 }
 0x29d   :  { %3007 = vmatpush1.bf16.msra.mxu0 %v7189_v18 }
 0x29e   :  { %3008 = vmatprep.subr.bf16.mxu0 %v7194_v19 }
 0x2a1   :  { %3009 = vmatpush1.bf16.msra.mxu0 %v7192_v20 }
 0x2a2   :  { %3010 = vmatprep.subr.bf16.mxu0 %v7197_v21 }
 0x2a5   :  { %3011 = vmatpush1.bf16.msra.mxu0 %v7195_v22 }
 0x2a6   :  { %3012 = vmatprep.subr.bf16.mxu0 %v7200_v23 }
 0x2a9   :  { %3013 = vmatpush1.bf16.msra.mxu0 %v7198_v24 }
 0x2aa   :  { %3014 = vmatprep.subr.bf16.mxu0 %v7203_v25 }
 0x2ad   :  { %3015 = vmatpush1.bf16.msra.mxu0 %v7201_v26 }
 0x2ae   :  { %3016 = vmatprep.subr.bf16.mxu0 %v7206_v27 }
 0x2b1   :  { %3017 = vmatpush1.bf16.msra.mxu0 %v7204_v28 }
 0x2b2   :  { %3018 = vmatprep.subr.bf16.mxu0 %v7209_v29 }
 0x2b5   :  { %3019 = vmatpush1.bf16.msra.mxu0 %v7207_v30 }
 0x2b6   :  { %3020 = vmatprep.subr.bf16.mxu0 %v7212_v31 }
 0x2b9   :  { %3021 = vmatpush1.bf16.msra.mxu0 %v7210_v32 }
 0x2ba   :  { %4390 = vmatprep.subr.bf16.mxu0 %v7218_v33 }
 0x2bc   :  { %3023 = vmatmul.mubr.bf16.vlgmr.msra.gmra.mrb[8].mxu0 %v8029_v44  ;;  %v7254_v44 = vld [vmem:[#allocation7 + $0xcc] ss:$16 sps:$4 sm:$0xff]  }
 0x2bd   :  { %4391 = vmatpush1.bf16.msra.mxu0 %v7216_v34 }
 0x2be   :  { %4392 = vmatprep.subr.bf16.mxu0 %v7224_v35 }
 0x2c1   :  { %4393 = vmatpush1.bf16.msra.mxu0 %v7222_v36 }
 0x2c2   :  { %4394 = vmatprep.subr.bf16.mxu0 %v7230_v37 }
 0x2c5   :  { %4395 = vmatpush1.bf16.msra.mxu0 %v7228_v38 }
 0x2c6   :  { %4396 = vmatprep.subr.bf16.mxu0 %v7236_v39 }
 0x2c9   :  { %4397 = vmatpush1.bf16.msra.mxu0 %v7234_v40 }
 0x2ca   :  { %4398 = vmatprep.subr.bf16.mxu0 %v7242_v41 }
 0x2cd   :  { %4399 = vmatpush1.bf16.msra.mxu0 %v7240_v42 }
 0x2ce   :  { %4400 = vmatprep.subr.bf16.mxu0 %v7248_v47 }
 0x2d1   :  { %4401 = vmatpush1.bf16.msra.mxu0 %v7246_v48  ;;  %v7309_v48 = vld [vmem:[#allocation7 + $0x200] ss:$16 sps:$4 sm:$0xff]  }
 0x2d2   :  { %4402 = vmatprep.subr.bf16.mxu0 %v7254_v44  ;;  %v7312_v44 = vld [vmem:[#allocation7 + $0x208] ss:$16 sps:$4 sm:$0xff]  }
 0x2d5   :  { %4403 = vmatpush1.bf16.msra.mxu0 %v7252_v49  ;;  %v7317_v49 = vld [vmem:[#allocation7 + $0x224] ss:$16 sps:$4 sm:$0xff]  }
 0x2d6   :  { %4404 = vmatprep.subr.bf16.mxu0 %v7260_v50  ;;  %v7320_v50 = vld [vmem:[#allocation7 + $0x22c] ss:$16 sps:$4 sm:$0xff]  }
 0x2d9   :  { %4405 = vmatpush1.bf16.msra.mxu0 %v7258_v51  ;;  %v7315_v51 = vld [vmem:[#allocation7 + $0x220] ss:$16 sps:$4 sm:$0xff]  }
 0x2da   :  { %4406 = vmatprep.subr.bf16.mxu0 %v7266_v52  ;;  %v7318_v52 = vld [vmem:[#allocation7 + $0x228] ss:$16 sps:$4 sm:$0xff]  }
 0x2dd   :  { %4407 = vmatpush1.bf16.msra.mxu0 %v7264_v53  ;;  %v7323_v53 = vld [vmem:[#allocation7 + $0x244] ss:$16 sps:$4 sm:$0xff]  }
 0x2de   :  { %4408 = vmatprep.subr.bf16.mxu0 %v7272_v54  ;;  %v7326_v54 = vld [vmem:[#allocation7 + $0x24c] ss:$16 sps:$4 sm:$0xff]  }
 0x2e1   :  { %4409 = vmatpush1.bf16.msra.mxu0 %v7270_v55  ;;  %v7321_v55 = vld [vmem:[#allocation7 + $0x240] ss:$16 sps:$4 sm:$0xff]  }
 0x2e2   :  { %4410 = vmatprep.subr.bf16.mxu0 %v7278_v56  ;;  %v7324_v56 = vld [vmem:[#allocation7 + $0x248] ss:$16 sps:$4 sm:$0xff]  }
 0x2e5   :  { %4411 = vmatpush1.bf16.msra.mxu0 %v7276_v57  ;;  %v7329_v57 = vld [vmem:[#allocation7 + $0x264] ss:$16 sps:$4 sm:$0xff]  }
 0x2e6   :  { %4412 = vmatprep.subr.bf16.mxu0 %v7284_v58  ;;  %v7332_v58 = vld [vmem:[#allocation7 + $0x26c] ss:$16 sps:$4 sm:$0xff]  }
 0x2e9   :  { %4413 = vmatpush1.bf16.msra.mxu0 %v7282_v59  ;;  %v7327_v59 = vld [vmem:[#allocation7 + $0x260] ss:$16 sps:$4 sm:$0xff]  }
 0x2ea   :  { %4414 = vmatprep.subr.bf16.mxu0 %v7290_v60  ;;  %v7330_v60 = vld [vmem:[#allocation7 + $0x268] ss:$16 sps:$4 sm:$0xff]  }
 0x2ed   :  { %4415 = vmatpush1.bf16.msra.mxu0 %v7288_v61  ;;  %v7335_v61 = vld [vmem:[#allocation7 + $0x284] ss:$16 sps:$4 sm:$0xff]  }
 0x2ee   :  { %4416 = vmatprep.subr.bf16.mxu0 %v7296_v62  ;;  %v7338_v62 = vld [vmem:[#allocation7 + $0x28c] ss:$16 sps:$4 sm:$0xff]  }
 0x2f1   :  { %4417 = vmatpush1.bf16.msra.mxu0 %v7294_v63  ;;  %v7333_v63 = vld [vmem:[#allocation7 + $0x280] ss:$16 sps:$4 sm:$0xff]  }
 0x2f2   :  { %4418 = vmatprep.subr.bf16.mxu0 %v7302_v0  ;;  %v7336_v0 = vld [vmem:[#allocation7 + $0x288] ss:$16 sps:$4 sm:$0xff]  }
 0x2f5   :  { %4419 = vmatpush1.bf16.msra.mxu0 %v7300_v1  ;;  %v7341_v1 = vld [vmem:[#allocation7 + $0x2a4] ss:$16 sps:$4 sm:$0xff]  }
 0x2f6   :  { %4420 = vmatprep.subr.bf16.mxu0 %v7308_v2  ;;  %v7344_v2 = vld [vmem:[#allocation7 + $0x2ac] ss:$16 sps:$4 sm:$0xff]  }
 0x2f9   :  { %4421 = vmatpush1.bf16.msra.mxu0 %v7306_v3  ;;  %v7339_v3 = vld [vmem:[#allocation7 + $0x2a0] ss:$16 sps:$4 sm:$0xff]  }
 0x2fa   :  { %4433 = vmatprep.subr.bf16.mxu0 %v7314_v4  ;;  %v7342_v4 = vld [vmem:[#allocation7 + $0x2a8] ss:$16 sps:$4 sm:$0xff]  }
 0x30f   :  { %v2852_v7 = vpop.f32.mrb[4].mxu0  ;;  %v2938_v8 = vpop.f32.mrb[4].mxu1 }
 0x310   :  { %v6537_v12 = vadd.f32 %v2852_v7, %v1788_v45  ;;  %v6541_v15 = vadd.f32 %v2938_v8, %v1796_v46  ;;  %v2854_v16 = vpop.f32.mrb[5].mxu0  ;;  %v2940_v17 = vpop.f32.mrb[5].mxu1  ;;  %v7353_v7 = vld [vmem:[#allocation7 + $0x2e4] ss:$16 sps:$4 sm:$0xff]   ;;  %v7356_v8 = vld [vmem:[#allocation7 + $0x2ec] ss:$16 sps:$4 sm:$0xff]  }
 0x311   :  { %v6538_v18 = vadd.f32 %v2854_v16, %v1792_v5  ;;  %v6542_v19 = vadd.f32 %v2940_v17, %v1800_v6  ;;  %v2856_v20 = vpop.f32.mrb[6].mxu0  ;;  %v2942_v21 = vpop.f32.mrb[6].mxu1  ;;  %v7359_v16 = vld [vmem:[#allocation7 + $0x304] ss:$16 sps:$4 sm:$0xff]   ;;  %v7362_v17 = vld [vmem:[#allocation7 + $0x30c] ss:$16 sps:$4 sm:$0xff]  }
 0x312   :  { %v3033_v22 = vmax.f32 %v6537_v12, 0.0  ;;  %v3035_v23 = vmax.f32 %v6541_v15, 0.0  ;;  %v6539_v24 = vadd.f32 %v2856_v20, %v1788_v45  ;;  %v6543_v25 = vadd.f32 %v2942_v21, %v1796_v46  ;;  %v2858_v26 = vpop.f32.mrb[7].mxu0  ;;  %v2944_v27 = vpop.f32.mrb[7].mxu1  ;;  %v7347_v45 = vld [vmem:[#allocation7 + $0x2c4] ss:$16 sps:$4 sm:$0xff]  }
 0x313   :  { %v3034_v28 = vmax.f32 %v6538_v18, 0.0  ;;  %v3036_v29 = vmax.f32 %v6542_v19, 0.0  ;;  %v6540_v30 = vadd.f32 %v2858_v26, %v1792_v5  ;;  %v6544_v31 = vadd.f32 %v2944_v27, %v1800_v6  ;;  %v7350_v46 = vld [vmem:[#allocation7 + $0x2cc] ss:$16 sps:$4 sm:$0xff]   ;;  %v7345_v5 = vld [vmem:[#allocation7 + $0x2c0] ss:$16 sps:$4 sm:$0xff]  }
 0x314   :  { %v3039_v32 = vmax.f32 %v6539_v24, 0.0  ;;  %v3041_v33 = vmax.f32 %v6543_v25, 0.0  ;;  %v7348_v6 = vld [vmem:[#allocation7 + $0x2c8] ss:$16 sps:$4 sm:$0xff]   ;;  %v7351_v12 = vld [vmem:[#allocation7 + $0x2e0] ss:$16 sps:$4 sm:$0xff]  }
 0x315   :  { %v6428_v34 = vpack.c.bf16 %v3034_v28, %v3033_v22  ;;  %v6429_v35 = vpack.c.bf16 %v3036_v29, %v3035_v23  ;;  %v3040_v36 = vmax.f32 %v6540_v30, 0.0  ;;  %v3042_v37 = vmax.f32 %v6544_v31, 0.0  ;;  %v7354_v15 = vld [vmem:[#allocation7 + $0x2e8] ss:$16 sps:$4 sm:$0xff]   ;;  %v7357_v18 = vld [vmem:[#allocation7 + $0x300] ss:$16 sps:$4 sm:$0xff]  }
 0x316   :  { %v3045_v38 = vpack.c.bf16 %v3039_v32, %v3033_v22  ;;  %v8060_v39 = vpack.c.bf16 %v3041_v33, %v3035_v23  ;;  %v7360_v19 = vld [vmem:[#allocation7 + $0x308] ss:$16 sps:$4 sm:$0xff]   ;;  %v7365_v20 = vld [vmem:[#allocation7 + $0x324] ss:$16 sps:$4 sm:$0xff]   ;;  %v7368_v21 = vld [vmem:[#allocation7 + $0x32c] ss:$16 sps:$4 sm:$0xff]  }
 0x317   :  { %3081 = vst [vmem:[#allocation12] sm:$0xff] %v6428_v34  ;;  %3082 = vst [vmem:[#allocation12 + $0x8] sm:$0xff] %v6429_v35  ;;  %v3046_v40 = vpack.c.bf16 %v3040_v36, %v3034_v28  ;;  %v6431_v41 = vpack.c.bf16 %v3040_v36, %v3039_v32  ;;  %v3048_v42 = vpack.c.bf16 %v3042_v37, %v3036_v29  ;;  %v7363_v22 = vld [vmem:[#allocation7 + $0x320] ss:$16 sps:$4 sm:$0xff]   ;;  %v7366_v23 = vld [vmem:[#allocation7 + $0x328] ss:$16 sps:$4 sm:$0xff]  }
 0x318   :  { %v6432_v47 = vpack.c.bf16 %v3042_v37, %v3041_v33  ;;  %v7371_v24 = vld [vmem:[#allocation7 + $0x344] ss:$16 sps:$4 sm:$0xff]   ;;  %v7374_v25 = vld [vmem:[#allocation7 + $0x34c] ss:$16 sps:$4 sm:$0xff]   ;;  %v7369_v26 = vld [vmem:[#allocation7 + $0x340] ss:$16 sps:$4 sm:$0xff]  }
 0x319   :  { %3084 = vst [vmem:[#allocation12 + $0x18] sm:$0xff] %v6431_v41  ;;  %4293 = vmatprep.mubr.bf16.mxu1 %v3046_v40  ;;  %4422 = vmatprep.mubr.bf16.mxu0 %v3046_v40  ;;  %v7372_v27 = vld [vmem:[#allocation7 + $0x348] ss:$16 sps:$4 sm:$0xff]   ;;  %v7377_v28 = vld [vmem:[#allocation7 + $0x364] ss:$16 sps:$4 sm:$0xff]  }
 0x31a   :  { %3085 = vst [vmem:[#allocation12 + $0x20] sm:$0xff] %v6432_v47  ;;  %4294 = vmatmul.mubr.bf16.vlgmr.msra.gmra.mrb[8].mxu1 %v3045_v38  ;;  %4423 = vmatmul.mubr.bf16.vlgmr.msra.gmra.mrb[12].mxu0 %v3045_v38  ;;  %v7380_v29 = vld [vmem:[#allocation7 + $0x36c] ss:$16 sps:$4 sm:$0xff]   ;;  %v7375_v30 = vld [vmem:[#allocation7 + $0x360] ss:$16 sps:$4 sm:$0xff]  }
 0x31b   :  { %4305 = vmatpush1.bf16.msra.mxu1 %v7309_v48  ;;  %4434 = vmatpush1.bf16.msra.mxu0 %v7312_v44  ;;  %v7378_v31 = vld [vmem:[#allocation7 + $0x368] ss:$16 sps:$4 sm:$0xff]   ;;  %v7383_v32 = vld [vmem:[#allocation7 + $0x384] ss:$16 sps:$4 sm:$0xff]   ;;  %v7386_v33 = vld [vmem:[#allocation7 + $0x38c] ss:$16 sps:$4 sm:$0xff]  }
 0x31c   :  { %4336 = vmatprep.mubr.bf16.mxu1 %v3048_v42  ;;  %4465 = vmatprep.mubr.bf16.mxu0 %v3048_v42  ;;  %v7381_v34 = vld [vmem:[#allocation7 + $0x380] ss:$16 sps:$4 sm:$0xff]   ;;  %v7384_v35 = vld [vmem:[#allocation7 + $0x388] ss:$16 sps:$4 sm:$0xff]   ;;  %v7389_v36 = vld [vmem:[#allocation7 + $0x3a4] ss:$16 sps:$4 sm:$0xff]  }
 0x31d   :  { %4306 = vmatprep.subr.bf16.mxu1 %v7317_v49  ;;  %4435 = vmatprep.subr.bf16.mxu0 %v7320_v50  ;;  %v7392_v37 = vld [vmem:[#allocation7 + $0x3ac] ss:$16 sps:$4 sm:$0xff]   ;;  %v7387_v38 = vld [vmem:[#allocation7 + $0x3a0] ss:$16 sps:$4 sm:$0xff]   ;;  %v7390_v40 = vld [vmem:[#allocation7 + $0x3a8] ss:$16 sps:$4 sm:$0xff]  }
 0x31e   :  { %v7395_v41 = vld [vmem:[#allocation7 + $0x3c4] ss:$16 sps:$4 sm:$0xff]   ;;  %v7398_v42 = vld [vmem:[#allocation7 + $0x3cc] ss:$16 sps:$4 sm:$0xff]   ;;  %v7393_v47 = vld [vmem:[#allocation7 + $0x3c0] ss:$16 sps:$4 sm:$0xff]  }
 0x31f   :  { %4307 = vmatpush1.bf16.msra.mxu1 %v7315_v51  ;;  %4436 = vmatpush1.bf16.msra.mxu0 %v7318_v52  ;;  %v7396_v48 = vld [vmem:[#allocation7 + $0x3c8] ss:$16 sps:$4 sm:$0xff]   ;;  %v7401_v44 = vld [vmem:[#allocation7 + $0x3e4] ss:$16 sps:$4 sm:$0xff]   ;;  %v7404_v49 = vld [vmem:[#allocation7 + $0x3ec] ss:$16 sps:$4 sm:$0xff]  }
 0x320   :  { %4308 = vmatprep.subr.bf16.mxu1 %v7323_v53  ;;  %4437 = vmatprep.subr.bf16.mxu0 %v7326_v54  ;;  %v7399_v50 = vld [vmem:[#allocation7 + $0x3e0] ss:$16 sps:$4 sm:$0xff]   ;;  %v7402_v51 = vld [vmem:[#allocation7 + $0x3e8] ss:$16 sps:$4 sm:$0xff]   ;;  %v7407_v52 = vld [vmem:[#allocation7 + $0x404] ss:$16 sps:$4 sm:$0xff]  }
 0x321   :  { %v7410_v53 = vld [vmem:[#allocation7 + $0x40c] ss:$16 sps:$4 sm:$0xff]   ;;  %v7405_v54 = vld [vmem:[#allocation7 + $0x400] ss:$16 sps:$4 sm:$0xff]  }
 0x323   :  { %4309 = vmatpush1.bf16.msra.mxu1 %v7321_v55  ;;  %4438 = vmatpush1.bf16.msra.mxu0 %v7324_v56  ;;  %v7408_v55 = vld [vmem:[#allocation7 + $0x408] ss:$16 sps:$4 sm:$0xff]   ;;  %v7413_v56 = vld [vmem:[#allocation7 + $0x424] ss:$16 sps:$4 sm:$0xff]  }
 0x324   :  { %4310 = vmatprep.subr.bf16.mxu1 %v7329_v57  ;;  %4439 = vmatprep.subr.bf16.mxu0 %v7332_v58  ;;  %v7416_v57 = vld [vmem:[#allocation7 + $0x42c] ss:$16 sps:$4 sm:$0xff]   ;;  %v7411_v58 = vld [vmem:[#allocation7 + $0x420] ss:$16 sps:$4 sm:$0xff]  }
 0x327   :  { %4311 = vmatpush1.bf16.msra.mxu1 %v7327_v59  ;;  %4440 = vmatpush1.bf16.msra.mxu0 %v7330_v60  ;;  %v7414_v59 = vld [vmem:[#allocation7 + $0x428] ss:$16 sps:$4 sm:$0xff]   ;;  %v7419_v60 = vld [vmem:[#allocation7 + $0x444] ss:$16 sps:$4 sm:$0xff]  }
 0x328   :  { %4312 = vmatprep.subr.bf16.mxu1 %v7335_v61  ;;  %4441 = vmatprep.subr.bf16.mxu0 %v7338_v62  ;;  %v7422_v61 = vld [vmem:[#allocation7 + $0x44c] ss:$16 sps:$4 sm:$0xff]   ;;  %v7417_v62 = vld [vmem:[#allocation7 + $0x440] ss:$16 sps:$4 sm:$0xff]  }
 0x32b   :  { %4313 = vmatpush1.bf16.msra.mxu1 %v7333_v63  ;;  %4442 = vmatpush1.bf16.msra.mxu0 %v7336_v0  ;;  %v7420_v63 = vld [vmem:[#allocation7 + $0x448] ss:$16 sps:$4 sm:$0xff]   ;;  %v7425_v0 = vld [vmem:[#allocation7 + $0x464] ss:$16 sps:$4 sm:$0xff]  }
 0x32c   :  { %4314 = vmatprep.subr.bf16.mxu1 %v7341_v1  ;;  %4443 = vmatprep.subr.bf16.mxu0 %v7344_v2  ;;  %v7428_v1 = vld [vmem:[#allocation7 + $0x46c] ss:$16 sps:$4 sm:$0xff]   ;;  %v7423_v2 = vld [vmem:[#allocation7 + $0x460] ss:$16 sps:$4 sm:$0xff]  }
 0x32f   :  { %4315 = vmatpush1.bf16.msra.mxu1 %v7339_v3  ;;  %4444 = vmatpush1.bf16.msra.mxu0 %v7342_v4  ;;  %v7431_v3 = vld [vmem:[#allocation7 + $0x484] ss:$16 sps:$4 sm:$0xff]   ;;  %v7434_v4 = vld [vmem:[#allocation7 + $0x48c] ss:$16 sps:$4 sm:$0xff]  }
 0x330   :  { %4316 = vmatprep.subr.bf16.mxu1 %v7347_v45  ;;  %4445 = vmatprep.subr.bf16.mxu0 %v7350_v46  ;;  %v7429_v45 = vld [vmem:[#allocation7 + $0x480] ss:$16 sps:$4 sm:$0xff]   ;;  %v7432_v46 = vld [vmem:[#allocation7 + $0x488] ss:$16 sps:$4 sm:$0xff]  }
 0x333   :  { %4317 = vmatpush1.bf16.msra.mxu1 %v7345_v5  ;;  %4446 = vmatpush1.bf16.msra.mxu0 %v7348_v6  ;;  %v7437_v5 = vld [vmem:[#allocation7 + $0x4a4] ss:$16 sps:$4 sm:$0xff]   ;;  %v7440_v6 = vld [vmem:[#allocation7 + $0x4ac] ss:$16 sps:$4 sm:$0xff]  }
 0x334   :  { %4318 = vmatprep.subr.bf16.mxu1 %v7353_v7  ;;  %4447 = vmatprep.subr.bf16.mxu0 %v7356_v8  ;;  %v7435_v7 = vld [vmem:[#allocation7 + $0x4a0] ss:$16 sps:$4 sm:$0xff]   ;;  %v7438_v8 = vld [vmem:[#allocation7 + $0x4a8] ss:$16 sps:$4 sm:$0xff]  }
 0x337   :  { %4319 = vmatpush1.bf16.msra.mxu1 %v7351_v12  ;;  %4448 = vmatpush1.bf16.msra.mxu0 %v7354_v15  ;;  %v7443_v12 = vld [vmem:[#allocation7 + $0x4c4] ss:$16 sps:$4 sm:$0xff]   ;;  %v7446_v15 = vld [vmem:[#allocation7 + $0x4cc] ss:$16 sps:$4 sm:$0xff]  }
 0x338   :  { %4320 = vmatprep.subr.bf16.mxu1 %v7359_v16  ;;  %4449 = vmatprep.subr.bf16.mxu0 %v7362_v17  ;;  %v7441_v16 = vld [vmem:[#allocation7 + $0x4c0] ss:$16 sps:$4 sm:$0xff]   ;;  %v7444_v17 = vld [vmem:[#allocation7 + $0x4c8] ss:$16 sps:$4 sm:$0xff]  }
 0x33b   :  { %4321 = vmatpush1.bf16.msra.mxu1 %v7357_v18  ;;  %4450 = vmatpush1.bf16.msra.mxu0 %v7360_v19  ;;  %v7449_v18 = vld [vmem:[#allocation7 + $0x4e4] ss:$16 sps:$4 sm:$0xff]   ;;  %v7452_v19 = vld [vmem:[#allocation7 + $0x4ec] ss:$16 sps:$4 sm:$0xff]  }
 0x33c   :  { %4322 = vmatprep.subr.bf16.mxu1 %v7365_v20  ;;  %4451 = vmatprep.subr.bf16.mxu0 %v7368_v21  ;;  %v7447_v20 = vld [vmem:[#allocation7 + $0x4e0] ss:$16 sps:$4 sm:$0xff]   ;;  %v7450_v21 = vld [vmem:[#allocation7 + $0x4e8] ss:$16 sps:$4 sm:$0xff]  }
 0x33f   :  { %4323 = vmatpush1.bf16.msra.mxu1 %v7363_v22  ;;  %4452 = vmatpush1.bf16.msra.mxu0 %v7366_v23  ;;  %v7455_v22 = vld [vmem:[#allocation7 + $0x504] ss:$16 sps:$4 sm:$0xff]   ;;  %v7458_v23 = vld [vmem:[#allocation7 + $0x50c] ss:$16 sps:$4 sm:$0xff]  }
 0x340   :  { %4324 = vmatprep.subr.bf16.mxu1 %v7371_v24  ;;  %4453 = vmatprep.subr.bf16.mxu0 %v7374_v25  ;;  %v7453_v24 = vld [vmem:[#allocation7 + $0x500] ss:$16 sps:$4 sm:$0xff]   ;;  %v7456_v25 = vld [vmem:[#allocation7 + $0x508] ss:$16 sps:$4 sm:$0xff]  }
 0x343   :  { %4325 = vmatpush1.bf16.msra.mxu1 %v7369_v26  ;;  %4454 = vmatpush1.bf16.msra.mxu0 %v7372_v27  ;;  %v7461_v26 = vld [vmem:[#allocation7 + $0x524] ss:$16 sps:$4 sm:$0xff]   ;;  %v7464_v27 = vld [vmem:[#allocation7 + $0x52c] ss:$16 sps:$4 sm:$0xff]  }
 0x344   :  { %4326 = vmatprep.subr.bf16.mxu1 %v7377_v28  ;;  %4455 = vmatprep.subr.bf16.mxu0 %v7380_v29  ;;  %v7459_v28 = vld [vmem:[#allocation7 + $0x520] ss:$16 sps:$4 sm:$0xff]   ;;  %v7462_v29 = vld [vmem:[#allocation7 + $0x528] ss:$16 sps:$4 sm:$0xff]  }
 0x347   :  { %4327 = vmatpush1.bf16.msra.mxu1 %v7375_v30  ;;  %4456 = vmatpush1.bf16.msra.mxu0 %v7378_v31  ;;  %v7467_v30 = vld [vmem:[#allocation7 + $0x544] ss:$16 sps:$4 sm:$0xff]   ;;  %v7470_v31 = vld [vmem:[#allocation7 + $0x54c] ss:$16 sps:$4 sm:$0xff]  }
 0x348   :  { %4328 = vmatprep.subr.bf16.mxu1 %v7383_v32  ;;  %4457 = vmatprep.subr.bf16.mxu0 %v7386_v33  ;;  %v7465_v32 = vld [vmem:[#allocation7 + $0x540] ss:$16 sps:$4 sm:$0xff]   ;;  %v7468_v33 = vld [vmem:[#allocation7 + $0x548] ss:$16 sps:$4 sm:$0xff]  }
 0x34b   :  { %4329 = vmatpush1.bf16.msra.mxu1 %v7381_v34  ;;  %4458 = vmatpush1.bf16.msra.mxu0 %v7384_v35  ;;  %v7473_v34 = vld [vmem:[#allocation7 + $0x564] ss:$16 sps:$4 sm:$0xff]   ;;  %v7476_v35 = vld [vmem:[#allocation7 + $0x56c] ss:$16 sps:$4 sm:$0xff]  }
 0x34c   :  { %4330 = vmatprep.subr.bf16.mxu1 %v7389_v36  ;;  %4459 = vmatprep.subr.bf16.mxu0 %v7392_v37  ;;  %v7471_v36 = vld [vmem:[#allocation7 + $0x560] ss:$16 sps:$4 sm:$0xff]   ;;  %v7474_v37 = vld [vmem:[#allocation7 + $0x568] ss:$16 sps:$4 sm:$0xff]  }
 0x34f   :  { %4331 = vmatpush1.bf16.msra.mxu1 %v7387_v38  ;;  %4460 = vmatpush1.bf16.msra.mxu0 %v7390_v40  ;;  %v7479_v38 = vld [vmem:[#allocation7 + $0x584] ss:$16 sps:$4 sm:$0xff]   ;;  %v7482_v40 = vld [vmem:[#allocation7 + $0x58c] ss:$16 sps:$4 sm:$0xff]  }
 0x350   :  { %4332 = vmatprep.subr.bf16.mxu1 %v7395_v41  ;;  %4461 = vmatprep.subr.bf16.mxu0 %v7398_v42  ;;  %v7477_v41 = vld [vmem:[#allocation7 + $0x580] ss:$16 sps:$4 sm:$0xff]   ;;  %v7480_v42 = vld [vmem:[#allocation7 + $0x588] ss:$16 sps:$4 sm:$0xff]  }
 0x353   :  { %4333 = vmatpush1.bf16.msra.mxu1 %v7393_v47  ;;  %4462 = vmatpush1.bf16.msra.mxu0 %v7396_v48  ;;  %v7485_v47 = vld [vmem:[#allocation7 + $0x5a4] ss:$16 sps:$4 sm:$0xff]   ;;  %v7488_v48 = vld [vmem:[#allocation7 + $0x5ac] ss:$16 sps:$4 sm:$0xff]  }
 0x354   :  { %4334 = vmatprep.subr.bf16.mxu1 %v7401_v44  ;;  %4463 = vmatprep.subr.bf16.mxu0 %v7404_v49  ;;  %v1803_v44 = vsub.s32 4, %v8006_v9  ;;  %v1807_v49 = vsub.s32 5, %v8006_v9  ;;  %v7497_v9 = vld [vmem:[#allocation7 + $0x5e4] ss:$16 sps:$4 sm:$0xff]  }
 0x357   :  { %4335 = vmatpush1.bf16.msra.mxu1 %v7399_v50  ;;  %4464 = vmatpush1.bf16.msra.mxu0 %v7402_v51  ;;  %v7483_v50 = vld [vmem:[#allocation7 + $0x5a0] ss:$16 sps:$4 sm:$0xff]   ;;  %v7486_v51 = vld [vmem:[#allocation7 + $0x5a8] ss:$16 sps:$4 sm:$0xff]  }
 0x358   :  { %4347 = vmatprep.subr.bf16.mxu1 %v7407_v52  ;;  %4476 = vmatprep.subr.bf16.mxu0 %v7410_v53  ;;  %v1804_v52 = vrot.slane %v8050_v43, %v1803_v44  ;;  %v7491_v53 = vld [vmem:[#allocation7 + $0x5c4] ss:$16 sps:$4 sm:$0xff]  }
 0x359   :  { %v7530_v44 = vld [vmem:[#allocation8 + $0xd8] ss:$12 sps:$4 sm:$0xff]  }
 0x35a   :  { %4337 = vmatmul.mubr.bf16.vlgmr.msra.gmra.mrb[8].mxu1 %v8060_v39  ;;  %4466 = vmatmul.mubr.bf16.vlgmr.msra.gmra.mrb[12].mxu0 %v8060_v39  ;;  %v7426_v39 = vld [vmem:[#allocation7 + $0x468] ss:$16 sps:$4 sm:$0xff]  }
 0x35b   :  { %4348 = vmatpush1.bf16.msra.mxu1 %v7405_v54  ;;  %4477 = vmatpush1.bf16.msra.mxu0 %v7408_v55  ;;  %v7494_v54 = vld [vmem:[#allocation7 + $0x5cc] ss:$16 sps:$4 sm:$0xff]   ;;  %v1808_v55 = vrot.slane %v8050_v43, %v1807_v49  ;;  %v7495_v43 = vld [vmem:[#allocation7 + $0x5e0] ss:$16 sps:$4 sm:$0xff]  }
 0x35c   :  { %4349 = vmatprep.subr.bf16.mxu1 %v7413_v56  ;;  %4478 = vmatprep.subr.bf16.mxu0 %v7416_v57  ;;  %v7489_v57 = vld [vmem:[#allocation7 + $0x5c0] ss:$16 sps:$4 sm:$0xff]  }
 0x35d   :  { %v7537_v49 = vld [vmem:[#allocation8 + $0xf4] ss:$12 sps:$4 sm:$0xff]  }
 0x35f   :  { %4350 = vmatpush1.bf16.msra.mxu1 %v7411_v58  ;;  %4479 = vmatpush1.bf16.msra.mxu0 %v7414_v59  ;;  %v7492_v58 = vld [vmem:[#allocation7 + $0x5c8] ss:$16 sps:$4 sm:$0xff]  }
 0x360   :  { %4351 = vmatprep.subr.bf16.mxu1 %v7419_v60  ;;  %4480 = vmatprep.subr.bf16.mxu0 %v7422_v61  ;;  %v7500_v61 = vld [vmem:[#allocation7 + $0x5ec] ss:$16 sps:$4 sm:$0xff]  }
 0x363   :  { %4352 = vmatpush1.bf16.msra.mxu1 %v7417_v62  ;;  %4481 = vmatpush1.bf16.msra.mxu0 %v7420_v63 }
 0x364   :  { %4353 = vmatprep.subr.bf16.mxu1 %v7425_v0  ;;  %4482 = vmatprep.subr.bf16.mxu0 %v7428_v1 }
 0x367   :  { %4354 = vmatpush1.bf16.msra.mxu1 %v7423_v2  ;;  %4483 = vmatpush1.bf16.msra.mxu0 %v7426_v39 }
 0x368   :  { %4355 = vmatprep.subr.bf16.mxu1 %v7431_v3  ;;  %4484 = vmatprep.subr.bf16.mxu0 %v7434_v4  ;;  %v7498_v4 = vld [vmem:[#allocation7 + $0x5e8] ss:$16 sps:$4 sm:$0xff]  }
 0x36b   :  { %4356 = vmatpush1.bf16.msra.mxu1 %v7429_v45  ;;  %4485 = vmatpush1.bf16.msra.mxu0 %v7432_v46  ;;  %v7503_v46 = vld [vmem:[#allocation8 + $0x4] ss:$12 sps:$4 sm:$0xff]  }
 0x36c   :  { %4357 = vmatprep.subr.bf16.mxu1 %v7437_v5  ;;  %4486 = vmatprep.subr.bf16.mxu0 %v7440_v6  ;;  %v7528_v5 = vld [vmem:[#allocation8 + $0xc8] ss:$12 sps:$4 sm:$0xff]  }
 0x36f   :  { %4358 = vmatpush1.bf16.msra.mxu1 %v7435_v7  ;;  %4487 = vmatpush1.bf16.msra.mxu0 %v7438_v8 }
 0x370   :  { %4359 = vmatprep.subr.bf16.mxu1 %v7443_v12  ;;  %4488 = vmatprep.subr.bf16.mxu0 %v7446_v15 }
 0x373   :  { %4360 = vmatpush1.bf16.msra.mxu1 %v7441_v16  ;;  %4489 = vmatpush1.bf16.msra.mxu0 %v7444_v17  ;;  %v7501_v16 = vld [vmem:[#allocation8] ss:$12 sps:$4 sm:$0xff]   ;;  %v7529_v17 = vld [vmem:[#allocation8 + $0x8] ss:$12 sps:$4 sm:$0xff]  }
 0x374   :  { %4361 = vmatprep.subr.bf16.mxu1 %v7449_v18  ;;  %4490 = vmatprep.subr.bf16.mxu0 %v7452_v19  ;;  %v7506_v18 = vld [vmem:[#allocation8 + $0x1c] ss:$12 sps:$4 sm:$0xff]   ;;  %v7533_v19 = vld [vmem:[#allocation8 + $0xe0] ss:$12 sps:$4 sm:$0xff]  }
 0x377   :  { %4362 = vmatpush1.bf16.msra.mxu1 %v7447_v20  ;;  %4491 = vmatpush1.bf16.msra.mxu0 %v7450_v21  ;;  %v7504_v20 = vld [vmem:[#allocation8 + $0x18] ss:$12 sps:$4 sm:$0xff]   ;;  %v7534_v21 = vld [vmem:[#allocation8 + $0x20] ss:$12 sps:$4 sm:$0xff]  }
 0x378   :  { %4363 = vmatprep.subr.bf16.mxu1 %v7455_v22  ;;  %4492 = vmatprep.subr.bf16.mxu0 %v7458_v23  ;;  %v7509_v22 = vld [vmem:[#allocation8 + $0x34] ss:$12 sps:$4 sm:$0xff]   ;;  %v7538_v23 = vld [vmem:[#allocation8 + $0xf8] ss:$12 sps:$4 sm:$0xff]  }
 0x37b   :  { %4364 = vmatpush1.bf16.msra.mxu1 %v7453_v24  ;;  %4493 = vmatpush1.bf16.msra.mxu0 %v7456_v25  ;;  %v7507_v24 = vld [vmem:[#allocation8 + $0x30] ss:$12 sps:$4 sm:$0xff]   ;;  %v7539_v25 = vld [vmem:[#allocation8 + $0x38] ss:$12 sps:$4 sm:$0xff]  }
 0x37c   :  { %4365 = vmatprep.subr.bf16.mxu1 %v7461_v26  ;;  %4494 = vmatprep.subr.bf16.mxu0 %v7464_v27  ;;  %v7512_v26 = vld [vmem:[#allocation8 + $0x4c] ss:$12 sps:$4 sm:$0xff]   ;;  %v7543_v27 = vld [vmem:[#allocation8 + $0x110] ss:$12 sps:$4 sm:$0xff]  }
 0x37f   :  { %4366 = vmatpush1.bf16.msra.mxu1 %v7459_v28  ;;  %4495 = vmatpush1.bf16.msra.mxu0 %v7462_v29  ;;  %v7510_v28 = vld [vmem:[#allocation8 + $0x48] ss:$12 sps:$4 sm:$0xff]   ;;  %v7544_v29 = vld [vmem:[#allocation8 + $0x50] ss:$12 sps:$4 sm:$0xff]  }
 0x380   :  { %4367 = vmatprep.subr.bf16.mxu1 %v7467_v30  ;;  %4496 = vmatprep.subr.bf16.mxu0 %v7470_v31  ;;  %v7515_v30 = vld [vmem:[#allocation8 + $0x64] ss:$12 sps:$4 sm:$0xff]   ;;  %v7548_v31 = vld [vmem:[#allocation8 + $0x128] ss:$12 sps:$4 sm:$0xff]  }
 0x383   :  { %4368 = vmatpush1.bf16.msra.mxu1 %v7465_v32  ;;  %4497 = vmatpush1.bf16.msra.mxu0 %v7468_v33  ;;  %v7513_v32 = vld [vmem:[#allocation8 + $0x60] ss:$12 sps:$4 sm:$0xff]   ;;  %v7549_v33 = vld [vmem:[#allocation8 + $0x68] ss:$12 sps:$4 sm:$0xff]  }
 0x384   :  { %4369 = vmatprep.subr.bf16.mxu1 %v7473_v34  ;;  %4498 = vmatprep.subr.bf16.mxu0 %v7476_v35  ;;  %v7518_v34 = vld [vmem:[#allocation8 + $0x7c] ss:$12 sps:$4 sm:$0xff]   ;;  %v7553_v35 = vld [vmem:[#allocation8 + $0x140] ss:$12 sps:$4 sm:$0xff]  }
 0x387   :  { %4370 = vmatpush1.bf16.msra.mxu1 %v7471_v36  ;;  %4499 = vmatpush1.bf16.msra.mxu0 %v7474_v37  ;;  %v7516_v36 = vld [vmem:[#allocation8 + $0x78] ss:$12 sps:$4 sm:$0xff]   ;;  %v7521_v37 = vld [vmem:[#allocation8 + $0x94] ss:$12 sps:$4 sm:$0xff]  }
 0x388   :  { %4371 = vmatprep.subr.bf16.mxu1 %v7479_v38  ;;  %4500 = vmatprep.subr.bf16.mxu0 %v7482_v40  ;;  %v7519_v38 = vld [vmem:[#allocation8 + $0x90] ss:$12 sps:$4 sm:$0xff]   ;;  %v7524_v40 = vld [vmem:[#allocation8 + $0xac] ss:$12 sps:$4 sm:$0xff]  }
 0x38b   :  { %4372 = vmatpush1.bf16.msra.mxu1 %v7477_v41  ;;  %4501 = vmatpush1.bf16.msra.mxu0 %v7480_v42  ;;  %v7522_v41 = vld [vmem:[#allocation8 + $0xa8] ss:$12 sps:$4 sm:$0xff]   ;;  %v7527_v42 = vld [vmem:[#allocation8 + $0xc4] ss:$12 sps:$4 sm:$0xff]  }
 0x38c   :  { %4373 = vmatprep.subr.bf16.mxu1 %v7485_v47  ;;  %4502 = vmatprep.subr.bf16.mxu0 %v7488_v48  ;;  %v7525_v47 = vld [vmem:[#allocation8 + $0xc0] ss:$12 sps:$4 sm:$0xff]   ;;  %v7532_v48 = vld [vmem:[#allocation8 + $0xdc] ss:$12 sps:$4 sm:$0xff]  }
 0x38f   :  { %v3024_v56 = vpop.f32.mrb[8].mxu0  ;;  %4374 = vmatpush1.bf16.msra.mxu1 %v7483_v50  ;;  %4503 = vmatpush1.bf16.msra.mxu0 %v7486_v51  ;;  %v7535_v50 = vld [vmem:[#allocation8 + $0xf0] ss:$12 sps:$4 sm:$0xff]   ;;  %v7542_v51 = vld [vmem:[#allocation8 + $0x10c] ss:$12 sps:$4 sm:$0xff]  }
 0x390   :  { %v6545_v59 = vadd.f32 %v3024_v56, %v1804_v52  ;;  %v3026_v60 = vpop.f32.mrb[9].mxu0  ;;  %4375 = vmatprep.subr.bf16.mxu1 %v7491_v53  ;;  %4504 = vmatprep.subr.bf16.mxu0 %v7494_v54  ;;  %v7547_v53 = vld [vmem:[#allocation8 + $0x124] ss:$12 sps:$4 sm:$0xff]   ;;  %v7545_v54 = vld [vmem:[#allocation8 + $0x120] ss:$12 sps:$4 sm:$0xff]  }
 0x391   :  { %v6546_v62 = vadd.f32 %v3026_v60, %v1808_v55  ;;  %v3028_v63 = vpop.f32.mrb[10].mxu0  ;;  %v7550_v56 = vld [vmem:[#allocation8 + $0x138] ss:$12 sps:$4 sm:$0xff]  }
 0x392   :  { %v3037_v0 = vmax.f32 %v6545_v59, 0.0  ;;  %v6547_v1 = vadd.f32 %v3028_v63, %v1804_v52  ;;  %v3030_v2 = vpop.f32.mrb[11].mxu0  ;;  %v7540_v52 = vld [vmem:[#allocation8 + $0x108] ss:$12 sps:$4 sm:$0xff]   ;;  %v7555_v59 = vld [vmem:[#allocation8 + $0x150] ss:$12 sps:$4 sm:$0xff]  }
 0x393   :  { %v3038_v39 = vmax.f32 %v6546_v62, 0.0  ;;  %v6548_v3 = vadd.f32 %v3030_v2, %v1808_v55  ;;  %4376 = vmatpush1.bf16.msra.mxu1 %v7489_v57  ;;  %4505 = vmatpush1.bf16.msra.mxu0 %v7492_v58  ;;  %v7552_v55 = vld [vmem:[#allocation8 + $0x13c] ss:$12 sps:$4 sm:$0xff]   ;;  %v7554_v57 = vld [vmem:[#allocation8 + $0x80] ss:$12 sps:$4 sm:$0xff]  }
 0x394   :  { %v3043_v45 = vmax.f32 %v6547_v1, 0.0  ;;  %4377 = vmatprep.subr.bf16.mxu1 %v7497_v9  ;;  %4506 = vmatprep.subr.bf16.mxu0 %v7500_v61  ;;  %v7557_v58 = vld [vmem:[#allocation8 + $0x154] ss:$12 sps:$4 sm:$0xff]   ;;  %v7558_v60 = vld [vmem:[#allocation8 + $0x158] ss:$12 sps:$4 sm:$0xff]  }
 0x395   :  { %v6430_v6 = vpack.c.bf16 %v3038_v39, %v3037_v0  ;;  %v3044_v7 = vmax.f32 %v6548_v3, 0.0  ;;  %v7559_v9 = vld [vmem:[#allocation8 + $0x98] ss:$12 sps:$4 sm:$0xff]   ;;  %v7560_v62 = vld [vmem:[#allocation8 + $0x168] ss:$12 sps:$4 sm:$0xff]  }
 0x396   :  { %v3049_v8 = vpack.c.bf16 %v3043_v45, %v3037_v0  ;;  %v7562_v61 = vld [vmem:[#allocation8 + $0x16c] ss:$12 sps:$4 sm:$0xff]   ;;  %v7563_v63 = vld [vmem:[#allocation8 + $0x170] ss:$12 sps:$4 sm:$0xff]   ;;  %v3279_v2 = vld [vmem:[%s8125_s6] sm:$0xf] }
 0x397   :  { %3083 = vst [vmem:[#allocation12 + $0x10] sm:$0xff] %v6430_v6  ;;  %v3050_v12 = vpack.c.bf16 %v3044_v7, %v3038_v39  ;;  %v6433_v15 = vpack.c.bf16 %v3044_v7, %v3043_v45  ;;  %4378 = vmatpush1.bf16.msra.mxu1 %v7495_v43  ;;  %4507 = vmatpush1.bf16.msra.mxu0 %v7498_v4  ;;  %v7564_v0 = vld [vmem:[#allocation8 + $0xb0] ss:$12 sps:$4 sm:$0xff]  }
 0x398   :  { %5188 = vmatprep.subr.bf16.mxu1 %v7503_v46  ;;  %6434 = vmatprep.subr.bf16.mxu0 %v7528_v5  ;;  %v7567_v1 = vld [vmem:[#allocation8 + $0x184] ss:$12 sps:$4 sm:$0xff]   ;;  %v3284_v39 = vrot.slane %v3279_v2, %v8009_v10  ;;  %v3292_v3 = vrot.slane %v3279_v2, %v8012_v11  ;;  %v3288_v43 = vrot.slane %v3279_v2, %v8018_v13 }
 0x399   :  { %3086 = vst [vmem:[#allocation12 + $0x28] sm:$0xff] %v6433_v15  ;;  %4379 = vmatprep.mubr.bf16.mxu1 %v3050_v12  ;;  %4508 = vmatprep.mubr.bf16.mxu0 %v3050_v12  ;;  %v3296_v4 = vrot.slane %v3279_v2, %v8021_v14  ;;  %v7607_v2 = vld [vmem:[#allocation8 + $0x2d0] ss:$12 sps:$4 sm:$0xff]  }
 0x39a   :  { %4380 = vmatmul.mubr.bf16.vlgmr.msra.gmra.mrb[8].mxu1 %v3049_v8  ;;  %4509 = vmatmul.mubr.bf16.vlgmr.msra.gmra.mrb[12].mxu0 %v3049_v8 }
 0x39b   :  { %5189 = vmatpush1.bf16.msra.mxu1 %v7501_v16  ;;  %6435 = vmatpush3.bf16.msra.mxu0 %v7529_v17 }
 0x39c   :  { %5190 = vmatprep.subr.bf16.mxu1 %v7506_v18  ;;  %6436 = vmatprep.subr.bf16.mxu0 %v7533_v19 }
 0x39f   :  { %5191 = vmatpush1.bf16.msra.mxu1 %v7504_v20  ;;  %6437 = vmatpush3.bf16.msra.mxu0 %v7534_v21 }
 0x3a0   :  { %5192 = vmatprep.subr.bf16.mxu1 %v7509_v22  ;;  %6438 = vmatprep.subr.bf16.mxu0 %v7538_v23 }
 0x3a3   :  { %5193 = vmatpush1.bf16.msra.mxu1 %v7507_v24  ;;  %6439 = vmatpush3.bf16.msra.mxu0 %v7539_v25 }
 0x3a4   :  { %5194 = vmatprep.subr.bf16.mxu1 %v7512_v26  ;;  %6440 = vmatprep.subr.bf16.mxu0 %v7543_v27 }
 0x3a7   :  { %5195 = vmatpush1.bf16.msra.mxu1 %v7510_v28  ;;  %6441 = vmatpush3.bf16.msra.mxu0 %v7544_v29 }
 0x3a8   :  { %5196 = vmatprep.subr.bf16.mxu1 %v7515_v30  ;;  %6442 = vmatprep.subr.bf16.mxu0 %v7548_v31 }
 0x3ab   :  { %5197 = vmatpush1.bf16.msra.mxu1 %v7513_v32  ;;  %6443 = vmatpush3.bf16.msra.mxu0 %v7549_v33 }
 0x3ac   :  { %5198 = vmatprep.subr.bf16.mxu1 %v7518_v34  ;;  %6444 = vmatprep.subr.bf16.mxu0 %v7553_v35  ;;  %v7565_v35 = vld [vmem:[#allocation8 + $0x180] ss:$12 sps:$4 sm:$0xff]  }
 0x3af   :  { %5199 = vmatpush1.bf16.msra.mxu1 %v7516_v36  ;;  %6445 = vmatpush3.bf16.msra.mxu0 %v7554_v57  ;;  %v7570_v36 = vld [vmem:[#allocation8 + $0x19c] ss:$12 sps:$4 sm:$0xff]   ;;  %v7592_v57 = vld [vmem:[#allocation8 + $0x258] ss:$12 sps:$4 sm:$0xff]  }
 0x3b0   :  { %5200 = vmatprep.subr.bf16.mxu1 %v7521_v37  ;;  %6446 = vmatprep.subr.bf16.mxu0 %v7558_v60  ;;  %v7568_v37 = vld [vmem:[#allocation8 + $0x198] ss:$12 sps:$4 sm:$0xff]  }
 0x3b1   :  { %v7600_v60 = vld [vmem:[#allocation8 + $0x28c] ss:$12 sps:$4 sm:$0xff]  }
 0x3b3   :  { %5201 = vmatpush1.bf16.msra.mxu1 %v7519_v38  ;;  %6447 = vmatpush3.bf16.msra.mxu0 %v7559_v9  ;;  %v7573_v38 = vld [vmem:[#allocation8 + $0x1b4] ss:$12 sps:$4 sm:$0xff]  }
 0x3b4   :  { %5202 = vmatprep.subr.bf16.mxu1 %v7524_v40  ;;  %6448 = vmatprep.subr.bf16.mxu0 %v7563_v63  ;;  %v7571_v40 = vld [vmem:[#allocation8 + $0x1b0] ss:$12 sps:$4 sm:$0xff]   ;;  %v7598_v9 = vld [vmem:[#allocation8 + $0x288] ss:$12 sps:$4 sm:$0xff]  }
 0x3b5   :  { %v7606_v63 = vld [vmem:[#allocation8 + $0x2bc] ss:$12 sps:$4 sm:$0xff]  }
 0x3b7   :  { %5203 = vmatpush1.bf16.msra.mxu1 %v7522_v41  ;;  %6449 = vmatpush3.bf16.msra.mxu0 %v7564_v0  ;;  %v7576_v41 = vld [vmem:[#allocation8 + $0x1cc] ss:$12 sps:$4 sm:$0xff]  }
 0x3b8   :  { %5204 = vmatprep.subr.bf16.mxu1 %v7527_v42  ;;  %v7574_v42 = vld [vmem:[#allocation8 + $0x1c8] ss:$12 sps:$4 sm:$0xff]   ;;  %v7604_v0 = vld [vmem:[#allocation8 + $0x2b8] ss:$12 sps:$4 sm:$0xff]  }
 0x3bb   :  { %5205 = vmatpush1.bf16.msra.mxu1 %v7525_v47  ;;  %v7579_v47 = vld [vmem:[#allocation8 + $0x1e4] ss:$12 sps:$4 sm:$0xff]  }
 0x3bc   :  { %5206 = vmatprep.subr.bf16.mxu1 %v7532_v48  ;;  %v7577_v48 = vld [vmem:[#allocation8 + $0x1e0] ss:$12 sps:$4 sm:$0xff]  }
 0x3bf   :  { %5207 = vmatpush1.bf16.msra.mxu1 %v7530_v44  ;;  %v7582_v44 = vld [vmem:[#allocation8 + $0x1fc] ss:$12 sps:$4 sm:$0xff]  }
 0x3c0   :  { %5208 = vmatprep.subr.bf16.mxu1 %v7537_v49  ;;  %v7580_v49 = vld [vmem:[#allocation8 + $0x1f8] ss:$12 sps:$4 sm:$0xff]  }
 0x3c3   :  { %5209 = vmatpush1.bf16.msra.mxu1 %v7535_v50  ;;  %v7585_v50 = vld [vmem:[#allocation8 + $0x214] ss:$12 sps:$4 sm:$0xff]  }
 0x3c4   :  { %5210 = vmatprep.subr.bf16.mxu1 %v7542_v51  ;;  %v7583_v51 = vld [vmem:[#allocation8 + $0x210] ss:$12 sps:$4 sm:$0xff]  }
 0x3c7   :  { %5211 = vmatpush1.bf16.msra.mxu1 %v7540_v52  ;;  %v7588_v52 = vld [vmem:[#allocation8 + $0x22c] ss:$12 sps:$4 sm:$0xff]  }
 0x3c8   :  { %5212 = vmatprep.subr.bf16.mxu1 %v7547_v53  ;;  %v7586_v53 = vld [vmem:[#allocation8 + $0x228] ss:$12 sps:$4 sm:$0xff]  }
 0x3cb   :  { %5213 = vmatpush1.bf16.msra.mxu1 %v7545_v54  ;;  %v7591_v54 = vld [vmem:[#allocation8 + $0x244] ss:$12 sps:$4 sm:$0xff]  }
 0x3cc   :  { %5214 = vmatprep.subr.bf16.mxu1 %v7552_v55  ;;  %v7589_v55 = vld [vmem:[#allocation8 + $0x240] ss:$12 sps:$4 sm:$0xff]  }
 0x3cf   :  { %5215 = vmatpush1.bf16.msra.mxu1 %v7550_v56  ;;  %v7594_v56 = vld [vmem:[#allocation8 + $0x25c] ss:$12 sps:$4 sm:$0xff]  }
 0x3d0   :  { %5216 = vmatprep.subr.bf16.mxu1 %v7557_v58  ;;  %v7597_v58 = vld [vmem:[#allocation8 + $0x274] ss:$12 sps:$4 sm:$0xff]  }
 0x3d3   :  { %5217 = vmatpush1.bf16.msra.mxu1 %v7555_v59  ;;  %v7595_v59 = vld [vmem:[#allocation8 + $0x270] ss:$12 sps:$4 sm:$0xff]  }
 0x3d4   :  { %5218 = vmatprep.subr.bf16.mxu1 %v7562_v61  ;;  %v7603_v61 = vld [vmem:[#allocation8 + $0x2a4] ss:$12 sps:$4 sm:$0xff]  }
 0x3d7   :  { %5219 = vmatpush1.bf16.msra.mxu1 %v7560_v62  ;;  %v7601_v62 = vld [vmem:[#allocation8 + $0x2a0] ss:$12 sps:$4 sm:$0xff]  }
 0x3d8   :  { %5231 = vmatprep.subr.bf16.mxu1 %v7567_v1  ;;  %v7609_v1 = vld [vmem:[#allocation8 + $0x2d4] ss:$12 sps:$4 sm:$0xff]  }
 0x46d   :  { %v4381_v45 = vpop.f32.mrb[8].mxu1  ;;  %v4510_v46 = vpop.f32.mrb[12].mxu0 }
 0x46e   :  { %v6549_v5 = vadd.f32 %v4381_v45, %v3284_v39  ;;  %v6553_v6 = vadd.f32 %v4510_v46, %v3292_v3  ;;  %v4383_v7 = vpop.f32.mrb[9].mxu1  ;;  %v4512_v8 = vpop.f32.mrb[13].mxu0  ;;  %v7615_v45 = vld [vmem:[#allocation8 + $0x260] ss:$12 sps:$4 sm:$0xff]  }
 0x46f   :  { %v6550_v12 = vadd.f32 %v4383_v7, %v3288_v43  ;;  %v6554_v15 = vadd.f32 %v4512_v8, %v3296_v4  ;;  %v4385_v16 = vpop.f32.mrb[10].mxu1  ;;  %v4514_v17 = vpop.f32.mrb[14].mxu0  ;;  %v7616_v46 = vld [vmem:[#allocation8 + $0x1a0] ss:$12 sps:$4 sm:$0xff]   ;;  %v7619_v7 = vld [vmem:[#allocation8 + $0x290] ss:$12 sps:$4 sm:$0xff]  }
 0x470   :  { %v6551_v18 = vadd.f32 %v4385_v16, %v3284_v39  ;;  %v6555_v19 = vadd.f32 %v4514_v17, %v3292_v3  ;;  %v4387_v20 = vpop.f32.mrb[11].mxu1  ;;  %v4516_v21 = vpop.f32.mrb[15].mxu0  ;;  %v4519_v24 = vmax.f32 %v6549_v5, 0.0  ;;  %v4521_v25 = vmax.f32 %v6553_v6, 0.0  ;;  %v7612_v39 = vld [vmem:[#allocation8 + $0x2ec] ss:$12 sps:$4 sm:$0xff]  }
 0x471   :  { %v6552_v22 = vadd.f32 %v4387_v20, %v3288_v43  ;;  %v6556_v23 = vadd.f32 %v4516_v21, %v3296_v4  ;;  %v4520_v27 = vmax.f32 %v6550_v12, 0.0  ;;  %v4522_v28 = vmax.f32 %v6554_v15, 0.0  ;;  %v7610_v3 = vld [vmem:[#allocation8 + $0x2e8] ss:$12 sps:$4 sm:$0xff]   ;;  %v7617_v5 = vld [vmem:[#allocation8 + $0x278] ss:$12 sps:$4 sm:$0xff]  }
 0x472   :  { %v4523_v26 = vmax.f32 %v6551_v18, 0.0  ;;  %v4525_v14 = vmax.f32 %v6555_v19, 0.0  ;;  %v7613_v43 = vld [vmem:[#allocation8 + $0x248] ss:$12 sps:$4 sm:$0xff]   ;;  %v7618_v6 = vld [vmem:[#allocation8 + $0x1b8] ss:$12 sps:$4 sm:$0xff]  }
 0x473   :  { %v4524_v29 = vmax.f32 %v6552_v22, 0.0  ;;  %v4526_v30 = vmax.f32 %v6556_v23, 0.0  ;;  %v7614_v4 = vld [vmem:[#allocation8 + $0x188] ss:$12 sps:$4 sm:$0xff]   ;;  %v7620_v8 = vld [vmem:[#allocation8 + $0x1d0] ss:$12 sps:$4 sm:$0xff]  }
 0x474   :  { %v4527_v31 = vpack.c.bf16 %v4523_v26, %v4519_v24  ;;  %v8075_v32 = vpack.c.bf16 %v4525_v14, %v4521_v25  ;;  %v7621_v12 = vld [vmem:[#allocation8 + $0x2a8] ss:$12 sps:$4 sm:$0xff]   ;;  %v7623_v16 = vld [vmem:[#allocation8 + $0x2c0] ss:$12 sps:$4 sm:$0xff]   ;;  %v7625_v18 = vld [vmem:[#allocation8 + $0x2d8] ss:$12 sps:$4 sm:$0xff]  }
 0x475   :  { %v4528_v33 = vpack.c.bf16 %v4524_v29, %v4520_v27  ;;  %v8077_v34 = vpack.c.bf16 %v4526_v30, %v4522_v28  ;;  %v7622_v15 = vld [vmem:[#allocation8 + $0x1e8] ss:$12 sps:$4 sm:$0xff]   ;;  %v7624_v17 = vld [vmem:[#allocation8 + $0x200] ss:$12 sps:$4 sm:$0xff]   ;;  %v7626_v19 = vld [vmem:[#allocation8 + $0x218] ss:$12 sps:$4 sm:$0xff]  }
 0x476   :  { %v7627_v20 = vld [vmem:[#allocation8 + $0x2f0] ss:$12 sps:$4 sm:$0xff]   ;;  %v7629_v22 = vld [vmem:[#allocation10 + $0x40] sm:$0xff]   ;;  %v7631_v24 = vld [vmem:[#allocation10 + $0x48] sm:$0xff]  }
 0x477   :  { %5220 = vmatprep.mubr.bf16.mxu1 %v4528_v33  ;;  %5306 = vmatprep.mubr.bf16.mxu0 %v4528_v33  ;;  %v7628_v21 = vld [vmem:[#allocation8 + $0x230] ss:$12 sps:$4 sm:$0xff]   ;;  %v7630_v23 = vld [vmem:[#allocation10] sm:$0xff]   ;;  %v7632_v25 = vld [vmem:[#allocation10 + $0x8] sm:$0xff]  }
 0x478   :  { %5221 = vmatmul.mubr.bf16.vlgmr.msra.gmra.mrb[12].mxu1 %v4527_v31  ;;  %5307 = vmatmul.mubr.bf16.vlgmr.msra.gmra.mrb[16].mxu0 %v4527_v31  ;;  %v7633_v26 = vld [vmem:[#allocation10 + $0x50] sm:$0xff]   ;;  %v7635_v27 = vld [vmem:[#allocation10 + $0x58] sm:$0xff]   ;;  %v7637_v29 = vld [vmem:[#allocation10 + $0x60] sm:$0xff]  }
 0x479   :  { %5232 = vmatpush1.bf16.msra.mxu1 %v7565_v35  ;;  %5263 = vmatprep.mubr.bf16.mxu1 %v8077_v34  ;;  %v7634_v14 = vld [vmem:[#allocation10 + $0x10] sm:$0xff]   ;;  %v7636_v28 = vld [vmem:[#allocation10 + $0x18] sm:$0xff]   ;;  %v7638_v30 = vld [vmem:[#allocation10 + $0x20] sm:$0xff]  }
 0x47a   :  { %5233 = vmatprep.subr.bf16.mxu1 %v7570_v36  ;;  %6478 = vmatprep.subr.bf16.mxu0 %v7629_v22  ;;  %v7639_v31 = vld [vmem:[#allocation10 + $0x68] sm:$0xff]   ;;  %v7641_v33 = vld [vmem:[#allocation10 + $0x70] sm:$0xff]   ;;  %v7643_v35 = vld [vmem:[#allocation10 + $0x78] sm:$0xff]  }
 0x47b   :  { %6479 = vmatpush3.bf16.msra.mxu0 %v7630_v23  ;;  %v7644_v36 = vld [vmem:[#allocation10 + $0x38] sm:$0xff]  }
 0x47c   :  { %6480 = vmatprep.subr.bf16.mxu0 %v7631_v24 }
 0x47d   :  { %5234 = vmatpush1.bf16.msra.mxu1 %v7568_v37  ;;  %v7645_v37 = vld [vmem:[#allocation10 + $0x80] sm:$0xff]  }
 0x47e   :  { %5235 = vmatprep.subr.bf16.mxu1 %v7573_v38  ;;  %v7854_v38 = vmov 0.0  }
 0x47f   :  { %6481 = vmatpush3.bf16.msra.mxu0 %v7632_v25 }
 0x480   :  { %6482 = vmatprep.subr.bf16.mxu0 %v7633_v26 }
 0x481   :  { %5236 = vmatpush1.bf16.msra.mxu1 %v7571_v40  ;;  %v7646_v40 = vld [vmem:[#allocation10 + $0x88] sm:$0xff]  }
 0x482   :  { %5237 = vmatprep.subr.bf16.mxu1 %v7576_v41  ;;  %v7647_v41 = vld [vmem:[#allocation10 + $0x90] sm:$0xff]  }
 0x483   :  { %6483 = vmatpush3.bf16.msra.mxu0 %v7634_v14 }
 0x484   :  { %6484 = vmatprep.subr.bf16.mxu0 %v7635_v27 }
 0x485   :  { %5238 = vmatpush1.bf16.msra.mxu1 %v7574_v42  ;;  %v7648_v42 = vld [vmem:[#allocation10 + $0x98] sm:$0xff]  }
 0x486   :  { %5239 = vmatprep.subr.bf16.mxu1 %v7579_v47  ;;  %v7649_v47 = vld [vmem:[#allocation10 + $0xa0] sm:$0xff]  }
 0x487   :  { %6485 = vmatpush3.bf16.msra.mxu0 %v7636_v28 }
 0x488   :  { %6486 = vmatprep.subr.bf16.mxu0 %v7637_v29 }
 0x489   :  { %5240 = vmatpush1.bf16.msra.mxu1 %v7577_v48  ;;  %v7650_v48 = vld [vmem:[#allocation10 + $0xa8] sm:$0xff]  }
 0x48a   :  { %5241 = vmatprep.subr.bf16.mxu1 %v7582_v44  ;;  %v7651_v44 = vld [vmem:[#allocation10 + $0xb0] sm:$0xff]  }
 0x48b   :  { %6487 = vmatpush3.bf16.msra.mxu0 %v7638_v30 }
 0x48c   :  { %6488 = vmatprep.subr.bf16.mxu0 %v7639_v31 }
 0x48d   :  { %5242 = vmatpush1.bf16.msra.mxu1 %v7580_v49  ;;  %v7652_v49 = vld [vmem:[#allocation10 + $0xb8] sm:$0xff]  }
 0x48e   :  { %5243 = vmatprep.subr.bf16.mxu1 %v7585_v50 }
 0x491   :  { %5244 = vmatpush1.bf16.msra.mxu1 %v7583_v51 }
 0x492   :  { %5245 = vmatprep.subr.bf16.mxu1 %v7588_v52 }
 0x495   :  { %5246 = vmatpush1.bf16.msra.mxu1 %v7586_v53 }
 0x496   :  { %5247 = vmatprep.subr.bf16.mxu1 %v7591_v54 }
 0x499   :  { %5248 = vmatpush1.bf16.msra.mxu1 %v7589_v55 }
 0x49a   :  { %5249 = vmatprep.subr.bf16.mxu1 %v7594_v56  ;;  %v4659_v56 = vld [vmem:[%s8127_s8] sm:$0x7]  ;;  %s7856_s8 = smov [#allocation12]  }
 0x49b   :  { %s5695_s17 = sshll.u32 %s7856_s8, 4  ;;  %s5696_s17 = int_to_ptr.vmem [resolvable:$true] %s5695_s17 }
 0x49c   :  { %s7787_s5 = scalar_lea.vmem %s5696_s17, 768  ;;  %p7792_p13 = scmp.lt.s32.totalorder %s5696_s17, %s5696_s17 }
 0x49d   :  { %5250 = vmatpush1.bf16.msra.mxu1 %v7592_v57  ;;  %v4664_v57 = vrot.slane %v4659_v56, %v8009_v10  ;;  %p7788_p12 = scmp.ne.s32.totalorder %s5696_s17, %s7787_s5  ;;  %p7793_p0 = scmp.lt.s32.totalorder %s7787_s5, %s7787_s5 }
 0x49e   :  { %5251 = vmatprep.subr.bf16.mxu1 %v7597_v58  ;;  %v4668_v58 = vrot.slane %v4659_v56, %v8018_v13 }
 0x49f   :  { %p7794_p1 = por %p7793_p0, %p7792_p13 }
 0x4a1   :  { %5252 = vmatpush1.bf16.msra.mxu1 %v7595_v59  ;;  %p7795_p2 = pnand %p7794_p1, %p7788_p12 }
 0x4a2   :  { %5253 = vmatprep.subr.bf16.mxu1 %v7600_v60 }
 0x4a5   :  { %5254 = vmatpush1.bf16.msra.mxu1 %v7598_v9 }
 0x4a6   :  { %5255 = vmatprep.subr.bf16.mxu1 %v7603_v61 }
 0x4a9   :  { %5256 = vmatpush1.bf16.msra.mxu1 %v7601_v62 }
 0x4aa   :  { %5257 = vmatprep.subr.bf16.mxu1 %v7606_v63 }
 0x4ad   :  { %5258 = vmatpush1.bf16.msra.mxu1 %v7604_v0 }
 0x4ae   :  { %5259 = vmatprep.subr.bf16.mxu1 %v7609_v1 }
 0x4b1   :  { %5260 = vmatpush1.bf16.msra.mxu1 %v7607_v2 }
 0x4b2   :  { %5261 = vmatprep.subr.bf16.mxu1 %v7612_v39 }
 0x4b5   :  { %5262 = vmatpush1.bf16.msra.mxu1 %v7610_v3 }
 0x4b6   :  { %6456 = vmatprep.subr.bf16.mxu1 %v7613_v43 }
 0x4b8   :  { %5264 = vmatmul.mubr.bf16.vlgmr.msra.gmra.mrb[12].mxu1 %v8075_v32 }
 0x4b9   :  { %6457 = vmatpush3.bf16.msra.mxu1 %v7614_v4  ;;  %5347 = vmatprep.mubr.bf16.mxu1 %v8077_v34  ;;  %v7642_v34 = vld [vmem:[#allocation10 + $0x30] sm:$0xff]  }
 0x4ba   :  { %6458 = vmatprep.subr.bf16.mxu1 %v7615_v45 }
 0x4bd   :  { %6459 = vmatpush3.bf16.msra.mxu1 %v7616_v46 }
 0x4be   :  { %6460 = vmatprep.subr.bf16.mxu1 %v7617_v5 }
 0x4c1   :  { %6461 = vmatpush3.bf16.msra.mxu1 %v7618_v6 }
 0x4c2   :  { %6462 = vmatprep.subr.bf16.mxu1 %v7619_v7 }
 0x4c5   :  { %6463 = vmatpush3.bf16.msra.mxu1 %v7620_v8 }
 0x4c6   :  { %6464 = vmatprep.subr.bf16.mxu1 %v7621_v12 }
 0x4c9   :  { %6465 = vmatpush3.bf16.msra.mxu1 %v7622_v15 }
 0x4ca   :  { %6466 = vmatprep.subr.bf16.mxu1 %v7623_v16  ;;  %v4672_v16 = vrot.slane %v4659_v56, %v8012_v11 }
 0x4cd   :  { %6467 = vmatpush3.bf16.msra.mxu1 %v7624_v17 }
 0x4ce   :  { %6468 = vmatprep.subr.bf16.mxu1 %v7625_v18 }
 0x4d1   :  { %6469 = vmatpush3.bf16.msra.mxu1 %v7626_v19 }
 0x4d2   :  { %6470 = vmatprep.subr.bf16.mxu1 %v7627_v20 }
 0x4d5   :  { %6471 = vmatpush3.bf16.msra.mxu1 %v7628_v21 }
 0x4d6   :  { %6509 = vmatprep.subr.bf16.mxu1 %v7854_v38 }
 0x4d8   :  { %5348 = vmatmul.mubr.bf16.vlgmr.msra.gmra.mrb[16].mxu1 %v8075_v32  ;;  %v7640_v32 = vld [vmem:[#allocation10 + $0x28] sm:$0xff]  }
 0x4d9   :  { %6489 = vmatpush3.bf16.msra.mxu0 %v7640_v32  ;;  %6510 = vmatpush3.bf16.msra.mxu1 %v7645_v37 }
 0x4da   :  { %6490 = vmatprep.subr.bf16.mxu0 %v7641_v33  ;;  %6511 = vmatprep.subr.bf16.mxu1 %v7854_v38 }
 0x4db   :  { %6525 = vmatprep.mubr.msk.bf16.mxu1 %vm7855_vm0, %v7854_v38 }
 0x4dd   :  { %6491 = vmatpush3.bf16.msra.mxu0 %v7642_v34  ;;  %6512 = vmatpush3.bf16.msra.mxu1 %v7646_v40 }
 0x4de   :  { %6492 = vmatprep.subr.bf16.mxu0 %v7643_v35  ;;  %6513 = vmatprep.subr.bf16.mxu1 %v7854_v38 }
 0x4e1   :  { %6493 = vmatpush3.bf16.msra.mxu0 %v7644_v36  ;;  %6514 = vmatpush3.bf16.msra.mxu1 %v7647_v41 }
 0x4e2   :  { %6515 = vmatprep.subr.bf16.mxu1 %v7854_v38 }
 0x4e5   :  { %6516 = vmatpush3.bf16.msra.mxu1 %v7648_v42 }
 0x4e6   :  { %6517 = vmatprep.subr.bf16.mxu1 %v7854_v38 }
 0x4e9   :  { %6518 = vmatpush3.bf16.msra.mxu1 %v7649_v47 }
 0x4ea   :  { %6519 = vmatprep.subr.bf16.mxu1 %v7854_v38 }
 0x4ed   :  { %6520 = vmatpush3.bf16.msra.mxu1 %v7650_v48 }
 0x4ee   :  { %6521 = vmatprep.subr.bf16.mxu1 %v7854_v38 }
 0x4f1   :  { %6522 = vmatpush3.bf16.msra.mxu1 %v7651_v44 }
 0x4f2   :  { %6523 = vmatprep.subr.bf16.mxu1 %v7854_v38 }
 0x4f5   :  { %6524 = vmatpush3.bf16.msra.mxu1 %v7652_v49 }
 0x54b   :  { %v6450_v50 = vpop.f32.mrb[16].mxu0 }
 0x54c   :  { %v6451_v51 = vpop.f32.mrb[17].mxu0 }
 0x54d   :  { %v6452_v52 = vadd.f32 %v6451_v51, %v6450_v50  ;;  %v6453_v53 = vpop.f32.mrb[18].mxu0 }
 0x54e   :  { %v6454_v54 = vpop.f32.mrb[19].mxu0 }
 0x54f   :  { %v6455_v55 = vadd.f32 %v6454_v54, %v6453_v53  ;;  %v5309_v22 = vadd.f32 %v6452_v52, %v4672_v16 }
 0x551   :  { %v5312_v26 = vadd.f32 %v6455_v55, %v4672_v16 }
 0x58b   :  { %v5265_v59 = vpop.f32.mrb[12].mxu1 }
 0x58c   :  { %v6557_v60 = vadd.f32 %v5265_v59, %v4664_v57  ;;  %v5267_v9 = vpop.f32.mrb[13].mxu1 }
 0x58d   :  { %v6558_v61 = vadd.f32 %v5267_v9, %v4668_v58  ;;  %v5269_v62 = vpop.f32.mrb[14].mxu1 }
 0x58e   :  { %v6397_v63 = vmul.f32 -1.442695, %v6557_v60  ;;  %v6559_v0 = vadd.f32 %v5269_v62, %v4664_v57  ;;  %v5271_v1 = vpop.f32.mrb[15].mxu1 }
 0x58f   :  { %v6398_v2 = vmul.f32 -1.442695, %v6558_v61  ;;  %v6560_v39 = vadd.f32 %v5271_v1, %v4668_v58 }
 0x590   :  { %7653 = vpow2.f32 %v6397_v63  ;;  %v6400_v3 = vmul.f32 -1.442695, %v6559_v0 }
 0x591   :  { %7655 = vpow2.f32 %v6398_v2  ;;  %v6401_v43 = vmul.f32 -1.442695, %v6560_v39 }
 0x592   :  { %7657 = vpow2.f32 %v6400_v3 }
 0x593   :  { %7659 = vpow2.f32 %v6401_v43 }
 0x59a   :  { %v7654_v4 = vpop.eup %7653 }
 0x59b   :  { %v7656_v10 = vpop.eup %7655  ;;  %v5374_v45 = vadd.f32 1.0, %v7654_v4 }
 0x59c   :  { %v7658_v13 = vpop.eup %7657  ;;  %v5375_v46 = vadd.f32 1.0, %v7656_v10 }
 0x59d   :  { %v7660_v5 = vpop.eup %7659  ;;  %7661 = vrcp.f32 %v5374_v45  ;;  %v5377_v6 = vadd.f32 1.0, %v7658_v13 }
 0x59e   :  { %7663 = vrcp.f32 %v5375_v46  ;;  %v5378_v7 = vadd.f32 1.0, %v7660_v5 }
 0x59f   :  { %7665 = vrcp.f32 %v5377_v6 }
 0x5a0   :  { %7667 = vrcp.f32 %v5378_v7 }
 0x5a7   :  { %v7662_v8 = vpop.eup %7661 }
 0x5a8   :  { %v7664_v12 = vpop.eup %7663 }
 0x5a9   :  { %v7666_v15 = vpop.eup %7665 }
 0x5aa   :  { %v7668_v17 = vpop.eup %7667  ;;  %v5392_v18 = vpack.c.bf16 %v7666_v15, %v7662_v8 }
 0x5ab   :  { %v6472_v19 = vpop.f32.mrb[16].mxu1  ;;  %v5393_v20 = vpack.c.bf16 %v7668_v17, %v7664_v12 }
 0x5ac   :  { %v6473_v21 = vpop.f32.mrb[17].mxu1 }
 0x5ad   :  { %v6474_v23 = vadd.f32 %v6473_v21, %v6472_v19  ;;  %v6475_v24 = vpop.f32.mrb[18].mxu1  ;;  %5626 = vmatprep.mubr.bf16.mxu0 %v5393_v20 }
 0x5ae   :  { %v6476_v25 = vpop.f32.mrb[19].mxu1  ;;  %5627 = vmatmul.mubr.bf16.vlgmr.msra.gmra.mrb[20].mxu0 %v5392_v18 }
 0x5af   :  { %v5350_v14 = vadd.f32 %v6474_v23, %v5309_v22  ;;  %v6477_v27 = vadd.f32 %v6476_v25, %v6475_v24 }
 0x5b1   :  { %v6399_v28 = vmul.f32 -1.442695, %v5350_v14  ;;  %v5353_v29 = vadd.f32 %v6477_v27, %v5312_v26 }
 0x5b3   :  { %7669 = vpow2.f32 %v6399_v28  ;;  %v6402_v30 = vmul.f32 -1.442695, %v5353_v29 }
 0x5b5   :  { %7671 = vpow2.f32 %v6402_v30 }
 0x5bd   :  { %v7670_v11 = vpop.eup %7669 }
 0x5be   :  { %v5376_v31 = vadd.f32 1.0, %v7670_v11 }
 0x5bf   :  { %v7672_v32 = vpop.eup %7671 }
 0x5c0   :  { %v5379_v33 = vadd.f32 1.0, %v7672_v32  ;;  %7673 = vrcp.f32 %v5376_v31 }
 0x5c2   :  { %7675 = vrcp.f32 %v5379_v33 }
 0x5ca   :  { %v7674_v34 = vpop.eup %7673 }
 0x5cc   :  { %v7676_v35 = vpop.eup %7675 }
 0x5cd   :  { %v5394_v36 = vpack.c.bf16 %v7676_v35, %v7674_v34 }
 0x5cf   :  { %6526 = vmatmul.mubr.bf16.vlgmr.msra.gmra.mrb[20].mxu1 %v5394_v36 }
 0x5d0   :  { %7798 = shalt.err (!%p7795_p2)
}
 0x5d1   :  { %s7799_s22 = scalar_lea.hbm %s8131_s12, 768 }
 0x5d2   :  { %p7800_p3 = scmp.ne.s32.totalorder %s8131_s12, %s7799_s22  ;;  %p7803_p4 = scmp.lt.u32.totalorder %s7799_s22, %s8131_s12 }
 0x5d4   :  { %p7805_p5 = pnand %p7803_p4, %p7800_p3 }
 0x5d6   :  { %7808 = shalt.err (!%p7805_p5)
}
 0x5d7   :  { %5701 = dma.vmem_to_hbm [thread:$0]  %s5696_s17, 768, %s8131_s12, [#allocation13], %s7842_s13, %s7842_s13, %s7843_s14  }
 0x5d8   :  { %v6403_v48 = vld [vmem:[%s8129_s10] ss:$0 sm:$0xff]  ;;  %s7857_s24 = smov [#allocation11]  }
 0x5d9   :  { %s5683_s25 = sshll.u32 %s7857_s24, 4  ;;  %s5684_s25 = int_to_ptr.vmem [resolvable:$true] %s5683_s25 }
 0x5da   :  { %s7809_s12 = scalar_lea.vmem %s5684_s25, 256  ;;  %p7814_p7 = scmp.lt.s32.totalorder %s5684_s25, %s5684_s25 }
 0x5db   :  { %p7810_p6 = scmp.ne.s32.totalorder %s5684_s25, %s7809_s12  ;;  %p7815_p8 = scmp.lt.s32.totalorder %s7809_s12, %s7809_s12 }
 0x5dd   :  { %p7816_p9 = por %p7815_p8, %p7814_p7 }
 0x5df   :  { %p7817_p10 = pnand %p7816_p9, %p7810_p6 }
 0x681   :  { %v6494_v37 = vpop.f32.mrb[20].mxu0 }
 0x682   :  { %v6495_v38 = vpop.f32.mrb[21].mxu0 }
 0x683   :  { %v6496_v40 = vadd.f32 %v6495_v38, %v6494_v37  ;;  %v6497_v41 = vpop.f32.mrb[22].mxu0 }
 0x684   :  { %v6498_v42 = vpop.f32.mrb[23].mxu0 }
 0x685   :  { %v6499_v47 = vadd.f32 %v6498_v42, %v6497_v41  ;;  %v5629_v44 = vadd.f32 %v6496_v40, %v6403_v48 }
 0x687   :  { %v5632_v52 = vadd.f32 %v6499_v47, %v6403_v48 }
 0x6a2   :  { %v5669_v49 = vpop.f32.mrb[20].mxu1 }
 0x6a3   :  { %v5670_v50 = vadd.f32 %v5669_v49, %v5629_v44  ;;  %v6527_v51 = vpop.f32.mrb[21].mxu1 }
 0x6a4   :  { %v5672_v53 = vpop.f32.mrb[22].mxu1 }
 0x6a5   :  { %5676 = vst [vmem:[#allocation11] sm:$0xff] %v5670_v50  ;;  %v5673_v54 = vadd.f32 %v5672_v53, %v5632_v52  ;;  %v6528_v55 = vpop.f32.mrb[23].mxu1 }
 0x6a7   :  { %5677 = vst [vmem:[#allocation11 + $0x8] sm:$0xff] %v5673_v54 }
 0x6a8   :  { %7820 = shalt.err (!%p7817_p10)
}
 0x6a9   :  { %s7821_s14 = scalar_lea.hbm %s8130_s11, 256 }
 0x6aa   :  { %p7822_p11 = scmp.ne.s32.totalorder %s8130_s11, %s7821_s14  ;;  %p7825_p12 = scmp.lt.u32.totalorder %s7821_s14, %s8130_s11 }
 0x6ac   :  { %p7827_p13 = pnand %p7825_p12, %p7822_p11 }
 0x6ae   :  { %7830 = shalt.err (!%p7827_p13)
}
 0x6af   :  { %s7858_s2 = smov 128   ;;  %s7859_s28 = smov 8  }
 0x6b0   :  { %5689 = dma.vmem_to_hbm [thread:$0]  %s5684_s25, 256, %s8130_s11, [#allocation4], %s7858_s2, %s7858_s2, %s7859_s28  }
 0x6b1   :  { %7837 = dma.done.wait [#allocation4], 256  }
 0x6b2   :  { %7838 = vsyncadd [#allocation4], 4294967040 }
 0x6b3   :  { %7839 = dma.done.wait [#allocation13], 768  }
 0x6b4   :  { %7840 = vsyncadd [#allocation13], 4294966528 }
 0x6b5   :  { %5708 = vsyncpa [#allocation3], 1 }
 0x6b6   :  { %5709 = vsyncpa [#allocation6], 1 }
 0x6b7   :  { %5710 = vsyncpa [#allocation9], 1 }
 0x6b8   :  { %5711 = vsyncpa [#allocation4], 1 }
 0x6b9   :  { %5712 = vsyncpa [#allocation13], 1 }

</bundles_post_ra>
